<compile_context>
chip_gen: v6e
topology: v6e:2x2x1
jax: 0.10.0
libtpu: 0.0.40
codegen_flags: <defaults>
</compile_context>

<pallas_src>
import functools

import jax
import jax.numpy as jnp
from jax.experimental import pallas as pl
from jax.experimental.pallas import tpu as pltpu

GRID = 3                       # KAN grid size
K = 3                          # spline order
NUM_BASIS = GRID + K           # 6 B-spline coefficients per edge
N_GRID_PTS = GRID + 2 * K + 1  # 10 extended grid points

D_IN0, D_SUM, D_MULT, MULT_ARITY = 16, 16, 4, 2
D_OUT0 = D_SUM + D_MULT * MULT_ARITY   # 24 subnodes produced by layer 0
D_IN1 = D_SUM + D_MULT                 # 20 nodes feeding layer 1
D_IN1_PAD = 24                         # padded to a sublane-friendly 24 rows
D_OUT1 = 16
F0 = (NUM_BASIS + 1) * D_IN0           # 112 fused-feature rows, layer 0
F1 = (NUM_BASIS + 1) * D_IN1_PAD       # 168 fused-feature rows, layer 1

# Uniform extended grid on [-1, 1] (fresh-init pykan): compile-time constants.
H = 2.0 / GRID
KNOTS = [-1.0 - K * H + H * t for t in range(N_GRID_PTS)]
KNOT0 = KNOTS[0]
INV_H = 1.0 / H

LANE_CHUNK = 256               # lane sub-chunk: keeps live basis set < 64 vregs


# ----------------------------------------------------------------------------
# kernel-side math (transposed layout: (features, batch))
# ----------------------------------------------------------------------------
def _write_features(x, f_ref):
    """Write [silu(x); B_0(x); ...; B_5(x)] as row blocks of f_ref.

    x: (d, c) f32.  Closed-form uniform cubic B-spline: per point only 4 bases
    are nonzero -- the cardinal cubic weights of u = frac((x - knot0)/h),
    scattered to rows by the interval index (nested selects).  Matches the
    Cox-de Boor recursion on this uniform grid exactly (C2 continuity makes the
    half-open interval convention irrelevant away from the outermost knots,
    where both give zero).
    """
    d = x.shape[0]
    f_ref[0:d, :] = x * jax.nn.sigmoid(x)            # silu block (EUP slot)

    z = (x - KNOT0) * INV_H                          # normalized coordinate
    jf = jnp.floor(z)                                # interval index (float)
    u = z - jf
    u2 = u * u
    u3 = u2 * u
    wd = u3 * (1.0 / 6.0)                            # weight for basis t == j
    wc = 0.5 * u3 - u2 + (2.0 / 3.0)                 # basis t == j - 2
    om = 1.0 - u
    wa = om * om * om * (1.0 / 6.0)                  # basis t == j - 3
    wb = 1.0 - wa - wc - wd                          # basis t == j - 1

    for t in range(NUM_BASIS):
        bt = jnp.where(jf == t, wd,
             jnp.where(jf == t + 1, wb,
             jnp.where(jf == t + 2, wc,
             jnp.where(jf == t + 3, wa, 0.0))))
        f_ref[(t + 1) * d:(t + 2) * d, :] = bt       # 8-aligned block store


def embedder_kernel(x_ref, w0_ref, b0_ref, ns0m_ref, nb0m_ref,
                    w1_ref, b1_ref, o_ref, f0_ref, f1_ref):
    b_tile = x_ref.shape[1]
    # Static unroll over 256-lane chunks: bounds vreg live ranges of the basis
    # math (intermediates die at each scratch store) while keeping full-lane
    # VPU work and lane-dense 256-wide output stores.
    for c in range(b_tile // LANE_CHUNK):
        sl = slice(c * LANE_CHUNK, (c + 1) * LANE_CHUNK)
        xc = x_ref[:, sl]                                           # (16, C)

        # ---- layer 0: fused (24, 112) @ (112, C) matmul + bias -------------
        _write_features(xc, f0_ref)
        y0 = jnp.dot(w0_ref[...], f0_ref[...],
                     preferred_element_type=jnp.float32) + b0_ref[...]   # (24, C)

        # ---- mult nodes: rows pre-permuted offline into two groups ---------
        prods = y0[16:20, :] * y0[20:24, :]                          # (4, C)
        prods = prods * ns0m_ref[...] + nb0m_ref[...]                # node affine

        # layer-1 input padded to 24 rows; rows 20..23 are don't-care (their
        # weight columns are zero), so duplicate prods for an aligned 8-row tile.
        x1 = jnp.concatenate([y0[0:16, :], prods, prods], axis=0)    # (24, C)

        # ---- layer 1: fused (16, 168) @ (168, C) matmul + bias -------------
        _write_features(x1, f1_ref)
        o_ref[:, sl] = (jnp.dot(w1_ref[...], f1_ref[...],
                                preferred_element_type=jnp.float32)
                        + b1_ref[...])


# ----------------------------------------------------------------------------
# parameter construction / offline fusion
# ----------------------------------------------------------------------------
def make_params(key):
    """Synthetic, deterministic raw KAN parameters (pykan-style orientation)."""
    def make_kan_layer(k, d_in, d_out):
        k1, k2, k3, k4 = jax.random.split(k, 4)
        coef = 0.1 * jax.random.normal(k1, (d_in, d_out, NUM_BASIS), jnp.float32)
        scale_base = (1.0 / jnp.sqrt(jnp.float32(d_in))
                      + 0.1 * jax.random.normal(k2, (d_in, d_out), jnp.float32))
        scale_sp = jnp.ones((d_in, d_out), jnp.float32) / jnp.sqrt(jnp.float32(d_in))
        mask = jnp.ones((d_in, d_out), jnp.float32)
        wb = scale_base * mask                                   # (d_in, d_out)
        wsp = (jnp.transpose(coef, (0, 2, 1))
               * (scale_sp * mask)[:, None, :])                  # (d_in, NB, d_out)
        ss = 1.0 + 0.05 * jax.random.normal(k3, (d_out,), jnp.float32)
        sb = 0.05 * jax.random.normal(k4, (d_out,), jnp.float32)
        return wb, wsp, ss, sb

    k0, k1, k2 = jax.random.split(key, 3)
    wb0, wsp0, ss0, sb0 = make_kan_layer(k0, D_IN0, D_OUT0)
    wb1, wsp1, ss1, sb1 = make_kan_layer(k1, D_IN1, D_OUT1)
    ka, kb, kc, kd = jax.random.split(k2, 4)
    ns0 = 1.0 + 0.05 * jax.random.normal(ka, (D_IN1,), jnp.float32)
    nb0 = 0.05 * jax.random.normal(kb, (D_IN1,), jnp.float32)
    ns1 = 1.0 + 0.05 * jax.random.normal(kc, (D_OUT1,), jnp.float32)
    nb1 = 0.05 * jax.random.normal(kd, (D_OUT1,), jnp.float32)
    return (wb0, wsp0, ss0, sb0, ns0, nb0, wb1, wsp1, ss1, sb1, ns1, nb1)


def fuse_params(raw):
    """Build fused kernel weights offline: wide-K weights, folded affines,
    permuted mult rows, 24-row padded layer-1 feature columns."""
    (wb0, wsp0, ss0, sb0, ns0, nb0, wb1, wsp1, ss1, sb1, ns1, nb1) = raw

    def fuse_layer(wb, wsp, out_scale):
        # Column order matches _write_features: [silu | basis_0 | ... | basis_5]
        blocks = [wb.T] + [wsp[:, t, :].T for t in range(NUM_BASIS)]
        return jnp.concatenate(blocks, axis=1) * out_scale[:, None]

    # ---- layer 0: ss0 folded; rows permuted so mult pairs are contiguous;
    #      ns0/nb0 folded into the 16 sum-node rows. ---------------------------
    w0 = fuse_layer(wb0, wsp0, ss0)                    # (24, 112)
    b0 = sb0                                           # (24,)
    perm = jnp.asarray(list(range(D_SUM))
                       + list(range(D_SUM, D_OUT0, 2))       # first of each pair
                       + list(range(D_SUM + 1, D_OUT0, 2)))  # second of each pair
    w0 = w0[perm]
    b0 = b0[perm]
    row_scale = jnp.concatenate([ns0[:D_SUM],
                                 jnp.ones((D_OUT0 - D_SUM,), jnp.float32)])
    row_shift = jnp.concatenate([nb0[:D_SUM],
                                 jnp.zeros((D_OUT0 - D_SUM,), jnp.float32)])
    w0 = w0 * row_scale[:, None]
    b0 = b0 * row_scale + row_shift

    # ---- mult-node affine stays at runtime (cannot fold through products) ----
    ns0m = ns0[D_SUM:][:, None]                        # (4, 1)
    nb0m = nb0[D_SUM:][:, None]                        # (4, 1)

    # ---- layer 1: ss1 * ns1 and sb1*ns1 + nb1 folded; feature columns padded
    #      from 20 -> 24 per block (8-aligned sublane offsets in the kernel). ---
    w1 = fuse_layer(wb1, wsp1, ss1 * ns1)              # (16, 140)
    b1 = (sb1 * ns1 + nb1)[:, None]                    # (16, 1)
    pad = jnp.zeros((D_OUT1, D_IN1_PAD - D_IN1), jnp.float32)
    w1_blocks = jnp.split(w1, NUM_BASIS + 1, axis=1)
    w1 = jnp.concatenate(
        [jnp.concatenate([blk, pad], axis=1) for blk in w1_blocks], axis=1)  # (16, 168)

    return w0, b0[:, None], ns0m, nb0m, w1, b1


# ----------------------------------------------------------------------------
# wrappers
# ----------------------------------------------------------------------------
def _round_up(x, m):
    return (x + m - 1) // m * m


def embedder_forward_t(xt, fused_params, *, b_tile=2048):
    """Core kernel entry in (features, batch) layout: xt (16, B) -> (16, B).

    Callers that keep the transposed layout end-to-end should use this directly
    and avoid the wrapper transposes entirely.
    """
    w0, b0, ns0m, nb0m, w1, b1 = fused_params
    batch = xt.shape[1]

    b_tile = min(b_tile, _round_up(batch, LANE_CHUNK))
    b_tile = _round_up(max(b_tile, LANE_CHUNK), LANE_CHUNK)
    padded = _round_up(batch, b_tile)
    if padded != batch:                               # remainder handling
        xt = jnp.pad(xt, ((0, 0), (0, padded - batch)))

    def batch_spec(rows):
        return pl.BlockSpec((rows, b_tile), lambda i: (0, i))

    def full_spec(shape):
        zeros = (0,) * len(shape)
        return pl.BlockSpec(shape, lambda i: zeros)

    out = pl.pallas_call(
        embedder_kernel,
        out_shape=jax.ShapeDtypeStruct((D_OUT1, padded), jnp.float32),
        grid=(padded // b_tile,),
        in_specs=[batch_spec(D_IN0),
                  full_spec(w0.shape), full_spec(b0.shape),
                  full_spec(ns0m.shape), full_spec(nb0m.shape),
                  full_spec(w1.shape), full_spec(b1.shape)],
        out_specs=batch_spec(D_OUT1),
        scratch_shapes=[pltpu.VMEM((F0, LANE_CHUNK), jnp.float32),
                        pltpu.VMEM((F1, LANE_CHUNK), jnp.float32)],
        compiler_params=pltpu.CompilerParams(
            dimension_semantics=("parallel",)),       # megacore split on v7x
    )(xt, w0, b0, ns0m, nb0m, w1, b1)

    return out[:, :batch] if padded != batch else out


def embedder_forward(x, raw_params, *, b_tile=2048):
    """Module-contract layout: x (B, 16) -> (B, 16)."""
    fused = fuse_params(raw_params)
    out_t = embedder_forward_t(jnp.transpose(x), fused, b_tile=b_tile)
    return jnp.transpose(out_t)


# ----------------------------------------------------------------------------
# independent reference (standard (B, features) layout, un-fused weights,
# Cox-de Boor recursion with real divisions) -- a different code path.
# ----------------------------------------------------------------------------
def _reference_forward(x, raw):
    (wb0, wsp0, ss0, sb0, ns0, nb0, wb1, wsp1, ss1, sb1, ns1, nb1) = raw
    knots = jnp.asarray(KNOTS, jnp.float32)

    def basis(x):
        vals = [((x >= knots[t]) & (x < knots[t + 1])).astype(jnp.float32)
                for t in range(N_GRID_PTS - 1)]
        for p in range(1, K + 1):
            nv = []
            for t in range(len(vals) - 1):
                a = (x - knots[t]) / (knots[t + p] - knots[t]) * vals[t]
                b = ((knots[t + p + 1] - x)
                     / (knots[t + p + 1] - knots[t + 1]) * vals[t + 1])
                nv.append(a + b)
            vals = nv
        return vals

    def kan_layer(x, wb, wsp, ss, sb):
        y = (x * jax.nn.sigmoid(x)) @ wb
        for t, bt in enumerate(basis(x)):
            y = y + bt @ wsp[:, t, :]
        return y * ss[None, :] + sb[None, :]

    y0 = kan_layer(x, wb0, wsp0, ss0, sb0)                     # (B, 24)
    prods = y0[:, D_SUM::2] * y0[:, D_SUM + 1::2]              # (B, 4)
    x1 = (jnp.concatenate([y0[:, :D_SUM], prods], axis=1)
          * ns0[None, :] + nb0[None, :])                       # (B, 20)
    y1 = kan_layer(x1, wb1, wsp1, ss1, sb1)
    return y1 * ns1[None, :] + nb1[None, :]


if __name__ == "__main__":
    key = jax.random.PRNGKey(0)
    kx, kp = jax.random.split(key)
    B = 2000                     # non-multiple of the tile: exercises padding path
    x = jax.random.uniform(kx, (B, D_IN0), jnp.float32, minval=-1.0, maxval=1.0)
    raw = make_params(kp)

    # b_tile=512 -> padded batch 2048 -> grid of 4 tiles (>= 2 steps per v7x TC).
    fwd = jax.jit(functools.partial(embedder_forward, b_tile=512))
    out = jax.block_until_ready(fwd(x, raw))

    ref = _reference_forward(x, raw)
    assert out.shape == (B, D_OUT1)
    err = float(jnp.max(jnp.abs(out - ref)))
    assert jnp.allclose(out, ref, atol=1e-4, rtol=1e-4), err
    print("KERNEL_OK")
</pallas_src>

<mosaic_0001>
module attributes {stable_mosaic.version = 11 : i64} {
  func.func @embedder_kernel(%arg0: i32, %arg1: memref<16x512xf32, #tpu.memory_space<vmem>>, %arg2: memref<24x112xf32, #tpu.memory_space<vmem>>, %arg3: memref<24x1xf32, #tpu.memory_space<vmem>>, %arg4: memref<4x1xf32, #tpu.memory_space<vmem>>, %arg5: memref<4x1xf32, #tpu.memory_space<vmem>>, %arg6: memref<16x168xf32, #tpu.memory_space<vmem>>, %arg7: memref<16x1xf32, #tpu.memory_space<vmem>>, %arg8: memref<16x512xf32, #tpu.memory_space<vmem>>, %arg9: memref<112x256xf32, #tpu.memory_space<vmem>>, %arg10: memref<168x256xf32, #tpu.memory_space<vmem>>) attributes {dimension_semantics = [#tpu.dimension_semantics<parallel>], iteration_bounds = array<i64: 4>, scalar_prefetch = 0 : i64, scratch_operands = 2 : i64, tpu.core_type = #tpu.core_type<tc>, window_params = [{transform_indices = @transform_0, window_bounds = array<i64: 16, 512>}, {pipeline_mode = #tpu.pipeline_mode<synchronous>, transform_indices = @transform_1, window_bounds = array<i64: 24, 112>}, {pipeline_mode = #tpu.pipeline_mode<synchronous>, transform_indices = @transform_2, window_bounds = array<i64: 24, 1>}, {pipeline_mode = #tpu.pipeline_mode<synchronous>, transform_indices = @transform_3, window_bounds = array<i64: 4, 1>}, {pipeline_mode = #tpu.pipeline_mode<synchronous>, transform_indices = @transform_4, window_bounds = array<i64: 4, 1>}, {pipeline_mode = #tpu.pipeline_mode<synchronous>, transform_indices = @transform_5, window_bounds = array<i64: 16, 168>}, {pipeline_mode = #tpu.pipeline_mode<synchronous>, transform_indices = @transform_6, window_bounds = array<i64: 16, 1>}, {transform_indices = @transform_7, window_bounds = array<i64: 16, 512>}]} {
    %c0 = arith.constant 0 : index
    %c0_0 = arith.constant 0 : index
    %0 = vector.load %arg1[%c0, %c0_0] : memref<16x512xf32, #tpu.memory_space<vmem>>, vector<16x256xf32>
    %1 = arith.negf %0 : vector<16x256xf32>
    %2 = math.exp %1 : vector<16x256xf32>
    %cst = arith.constant 1.000000e+00 : f32
    %3 = vector.broadcast %cst : f32 to vector<16x256xf32>
    %4 = arith.addf %3, %2 : vector<16x256xf32>
    %5 = arith.divf %3, %4 : vector<16x256xf32>
    %6 = arith.mulf %0, %5 : vector<16x256xf32>
    %c0_1 = arith.constant 0 : index
    %c0_2 = arith.constant 0 : index
    %7 = vector.load %arg9[%c0_1, %c0_2] : memref<112x256xf32, #tpu.memory_space<vmem>>, vector<16x256xf32>
    tpu.vector_store %arg9[%c0_1, %c0_2], %6 {strides = array<i32>} : memref<112x256xf32, #tpu.memory_space<vmem>>, vector<16x256xf32>,
    %cst_3 = arith.constant -3.000000e+00 : f32
    %8 = vector.broadcast %cst_3 : f32 to vector<16x256xf32>
    %9 = arith.subf %0, %8 : vector<16x256xf32>
    %cst_4 = arith.constant 1.500000e+00 : f32
    %10 = vector.broadcast %cst_4 : f32 to vector<16x256xf32>
    %11 = arith.mulf %9, %10 : vector<16x256xf32>
    %12 = math.floor %11 : vector<16x256xf32>
    %13 = arith.subf %11, %12 : vector<16x256xf32>
    %14 = arith.mulf %13, %13 : vector<16x256xf32>
    %15 = arith.mulf %14, %13 : vector<16x256xf32>
    %cst_5 = arith.constant 0.166666672 : f32
    %16 = vector.broadcast %cst_5 : f32 to vector<16x256xf32>
    %17 = arith.mulf %15, %16 : vector<16x256xf32>
    %cst_6 = arith.constant 5.000000e-01 : f32
    %18 = vector.broadcast %cst_6 : f32 to vector<16x256xf32>
    %19 = arith.mulf %18, %15 : vector<16x256xf32>
    %20 = arith.subf %19, %14 : vector<16x256xf32>
    %cst_7 = arith.constant 0.666666686 : f32
    %21 = vector.broadcast %cst_7 : f32 to vector<16x256xf32>
    %22 = arith.addf %20, %21 : vector<16x256xf32>
    %cst_8 = arith.constant 1.000000e+00 : f32
    %23 = vector.broadcast %cst_8 : f32 to vector<16x256xf32>
    %24 = arith.subf %23, %13 : vector<16x256xf32>
    %25 = arith.mulf %24, %24 : vector<16x256xf32>
    %26 = arith.mulf %25, %24 : vector<16x256xf32>
    %cst_9 = arith.constant 0.166666672 : f32
    %27 = vector.broadcast %cst_9 : f32 to vector<16x256xf32>
    %28 = arith.mulf %26, %27 : vector<16x256xf32>
    %cst_10 = arith.constant 1.000000e+00 : f32
    %29 = vector.broadcast %cst_10 : f32 to vector<16x256xf32>
    %30 = arith.subf %29, %28 : vector<16x256xf32>
    %31 = arith.subf %30, %22 : vector<16x256xf32>
    %32 = arith.subf %31, %17 : vector<16x256xf32>
    %cst_11 = arith.constant 0.000000e+00 : f32
    %33 = vector.broadcast %cst_11 : f32 to vector<16x256xf32>
    %34 = arith.cmpf oeq, %12, %33 : vector<16x256xf32>
    %cst_12 = arith.constant 1.000000e+00 : f32
    %35 = vector.broadcast %cst_12 : f32 to vector<16x256xf32>
    %36 = arith.cmpf oeq, %12, %35 : vector<16x256xf32>
    %cst_13 = arith.constant 2.000000e+00 : f32
    %37 = vector.broadcast %cst_13 : f32 to vector<16x256xf32>
    %38 = arith.cmpf oeq, %12, %37 : vector<16x256xf32>
    %cst_14 = arith.constant 3.000000e+00 : f32
    %39 = vector.broadcast %cst_14 : f32 to vector<16x256xf32>
    %40 = arith.cmpf oeq, %12, %39 : vector<16x256xf32>
    %cst_15 = arith.constant 0.000000e+00 : f32
    %41 = vector.broadcast %cst_15 : f32 to vector<16x256xf32>
    %42 = arith.select %40, %28, %41 : vector<16x256xi1>, vector<16x256xf32>
    %43 = arith.select %38, %22, %42 : vector<16x256xi1>, vector<16x256xf32>
    %44 = arith.select %36, %32, %43 : vector<16x256xi1>, vector<16x256xf32>
    %45 = arith.select %34, %17, %44 : vector<16x256xi1>, vector<16x256xf32>
    %c16 = arith.constant 16 : index
    %c0_16 = arith.constant 0 : index
    %46 = vector.load %arg9[%c16, %c0_16] : memref<112x256xf32, #tpu.memory_space<vmem>>, vector<16x256xf32>
    tpu.vector_store %arg9[%c16, %c0_16], %45 {strides = array<i32>} : memref<112x256xf32, #tpu.memory_space<vmem>>, vector<16x256xf32>,
    %cst_17 = arith.constant 1.000000e+00 : f32
    %47 = vector.broadcast %cst_17 : f32 to vector<16x256xf32>
    %48 = arith.cmpf oeq, %12, %47 : vector<16x256xf32>
    %cst_18 = arith.constant 2.000000e+00 : f32
    %49 = vector.broadcast %cst_18 : f32 to vector<16x256xf32>
    %50 = arith.cmpf oeq, %12, %49 : vector<16x256xf32>
    %cst_19 = arith.constant 3.000000e+00 : f32
    %51 = vector.broadcast %cst_19 : f32 to vector<16x256xf32>
    %52 = arith.cmpf oeq, %12, %51 : vector<16x256xf32>
    %cst_20 = arith.constant 4.000000e+00 : f32
    %53 = vector.broadcast %cst_20 : f32 to vector<16x256xf32>
    %54 = arith.cmpf oeq, %12, %53 : vector<16x256xf32>
    %cst_21 = arith.constant 0.000000e+00 : f32
    %55 = vector.broadcast %cst_21 : f32 to vector<16x256xf32>
    %56 = arith.select %54, %28, %55 : vector<16x256xi1>, vector<16x256xf32>
    %57 = arith.select %52, %22, %56 : vector<16x256xi1>, vector<16x256xf32>
    %58 = arith.select %50, %32, %57 : vector<16x256xi1>, vector<16x256xf32>
    %59 = arith.select %48, %17, %58 : vector<16x256xi1>, vector<16x256xf32>
    %c32 = arith.constant 32 : index
    %c0_22 = arith.constant 0 : index
    %60 = vector.load %arg9[%c32, %c0_22] : memref<112x256xf32, #tpu.memory_space<vmem>>, vector<16x256xf32>
    tpu.vector_store %arg9[%c32, %c0_22], %59 {strides = array<i32>} : memref<112x256xf32, #tpu.memory_space<vmem>>, vector<16x256xf32>,
    %cst_23 = arith.constant 2.000000e+00 : f32
    %61 = vector.broadcast %cst_23 : f32 to vector<16x256xf32>
    %62 = arith.cmpf oeq, %12, %61 : vector<16x256xf32>
    %cst_24 = arith.constant 3.000000e+00 : f32
    %63 = vector.broadcast %cst_24 : f32 to vector<16x256xf32>
    %64 = arith.cmpf oeq, %12, %63 : vector<16x256xf32>
    %cst_25 = arith.constant 4.000000e+00 : f32
    %65 = vector.broadcast %cst_25 : f32 to vector<16x256xf32>
    %66 = arith.cmpf oeq, %12, %65 : vector<16x256xf32>
    %cst_26 = arith.constant 5.000000e+00 : f32
    %67 = vector.broadcast %cst_26 : f32 to vector<16x256xf32>
    %68 = arith.cmpf oeq, %12, %67 : vector<16x256xf32>
    %cst_27 = arith.constant 0.000000e+00 : f32
    %69 = vector.broadcast %cst_27 : f32 to vector<16x256xf32>
    %70 = arith.select %68, %28, %69 : vector<16x256xi1>, vector<16x256xf32>
    %71 = arith.select %66, %22, %70 : vector<16x256xi1>, vector<16x256xf32>
    %72 = arith.select %64, %32, %71 : vector<16x256xi1>, vector<16x256xf32>
    %73 = arith.select %62, %17, %72 : vector<16x256xi1>, vector<16x256xf32>
    %c48 = arith.constant 48 : index
    %c0_28 = arith.constant 0 : index
    %74 = vector.load %arg9[%c48, %c0_28] : memref<112x256xf32, #tpu.memory_space<vmem>>, vector<16x256xf32>
    tpu.vector_store %arg9[%c48, %c0_28], %73 {strides = array<i32>} : memref<112x256xf32, #tpu.memory_space<vmem>>, vector<16x256xf32>,
    %cst_29 = arith.constant 3.000000e+00 : f32
    %75 = vector.broadcast %cst_29 : f32 to vector<16x256xf32>
    %76 = arith.cmpf oeq, %12, %75 : vector<16x256xf32>
    %cst_30 = arith.constant 4.000000e+00 : f32
    %77 = vector.broadcast %cst_30 : f32 to vector<16x256xf32>
    %78 = arith.cmpf oeq, %12, %77 : vector<16x256xf32>
    %cst_31 = arith.constant 5.000000e+00 : f32
    %79 = vector.broadcast %cst_31 : f32 to vector<16x256xf32>
    %80 = arith.cmpf oeq, %12, %79 : vector<16x256xf32>
    %cst_32 = arith.constant 6.000000e+00 : f32
    %81 = vector.broadcast %cst_32 : f32 to vector<16x256xf32>
    %82 = arith.cmpf oeq, %12, %81 : vector<16x256xf32>
    %cst_33 = arith.constant 0.000000e+00 : f32
    %83 = vector.broadcast %cst_33 : f32 to vector<16x256xf32>
    %84 = arith.select %82, %28, %83 : vector<16x256xi1>, vector<16x256xf32>
    %85 = arith.select %80, %22, %84 : vector<16x256xi1>, vector<16x256xf32>
    %86 = arith.select %78, %32, %85 : vector<16x256xi1>, vector<16x256xf32>
    %87 = arith.select %76, %17, %86 : vector<16x256xi1>, vector<16x256xf32>
    %c64 = arith.constant 64 : index
    %c0_34 = arith.constant 0 : index
    %88 = vector.load %arg9[%c64, %c0_34] : memref<112x256xf32, #tpu.memory_space<vmem>>, vector<16x256xf32>
    tpu.vector_store %arg9[%c64, %c0_34], %87 {strides = array<i32>} : memref<112x256xf32, #tpu.memory_space<vmem>>, vector<16x256xf32>,
    %cst_35 = arith.constant 4.000000e+00 : f32
    %89 = vector.broadcast %cst_35 : f32 to vector<16x256xf32>
    %90 = arith.cmpf oeq, %12, %89 : vector<16x256xf32>
    %cst_36 = arith.constant 5.000000e+00 : f32
    %91 = vector.broadcast %cst_36 : f32 to vector<16x256xf32>
    %92 = arith.cmpf oeq, %12, %91 : vector<16x256xf32>
    %cst_37 = arith.constant 6.000000e+00 : f32
    %93 = vector.broadcast %cst_37 : f32 to vector<16x256xf32>
    %94 = arith.cmpf oeq, %12, %93 : vector<16x256xf32>
    %cst_38 = arith.constant 7.000000e+00 : f32
    %95 = vector.broadcast %cst_38 : f32 to vector<16x256xf32>
    %96 = arith.cmpf oeq, %12, %95 : vector<16x256xf32>
    %cst_39 = arith.constant 0.000000e+00 : f32
    %97 = vector.broadcast %cst_39 : f32 to vector<16x256xf32>
    %98 = arith.select %96, %28, %97 : vector<16x256xi1>, vector<16x256xf32>
    %99 = arith.select %94, %22, %98 : vector<16x256xi1>, vector<16x256xf32>
    %100 = arith.select %92, %32, %99 : vector<16x256xi1>, vector<16x256xf32>
    %101 = arith.select %90, %17, %100 : vector<16x256xi1>, vector<16x256xf32>
    %c80 = arith.constant 80 : index
    %c0_40 = arith.constant 0 : index
    %102 = vector.load %arg9[%c80, %c0_40] : memref<112x256xf32, #tpu.memory_space<vmem>>, vector<16x256xf32>
    tpu.vector_store %arg9[%c80, %c0_40], %101 {strides = array<i32>} : memref<112x256xf32, #tpu.memory_space<vmem>>, vector<16x256xf32>,
    %cst_41 = arith.constant 5.000000e+00 : f32
    %103 = vector.broadcast %cst_41 : f32 to vector<16x256xf32>
    %104 = arith.cmpf oeq, %12, %103 : vector<16x256xf32>
    %cst_42 = arith.constant 6.000000e+00 : f32
    %105 = vector.broadcast %cst_42 : f32 to vector<16x256xf32>
    %106 = arith.cmpf oeq, %12, %105 : vector<16x256xf32>
    %cst_43 = arith.constant 7.000000e+00 : f32
    %107 = vector.broadcast %cst_43 : f32 to vector<16x256xf32>
    %108 = arith.cmpf oeq, %12, %107 : vector<16x256xf32>
    %cst_44 = arith.constant 8.000000e+00 : f32
    %109 = vector.broadcast %cst_44 : f32 to vector<16x256xf32>
    %110 = arith.cmpf oeq, %12, %109 : vector<16x256xf32>
    %cst_45 = arith.constant 0.000000e+00 : f32
    %111 = vector.broadcast %cst_45 : f32 to vector<16x256xf32>
    %112 = arith.select %110, %28, %111 : vector<16x256xi1>, vector<16x256xf32>
    %113 = arith.select %108, %22, %112 : vector<16x256xi1>, vector<16x256xf32>
    %114 = arith.select %106, %32, %113 : vector<16x256xi1>, vector<16x256xf32>
    %115 = arith.select %104, %17, %114 : vector<16x256xi1>, vector<16x256xf32>
    %c96 = arith.constant 96 : index
    %c0_46 = arith.constant 0 : index
    %116 = vector.load %arg9[%c96, %c0_46] : memref<112x256xf32, #tpu.memory_space<vmem>>, vector<16x256xf32>
    tpu.vector_store %arg9[%c96, %c0_46], %115 {strides = array<i32>} : memref<112x256xf32, #tpu.memory_space<vmem>>, vector<16x256xf32>,
    %c0_47 = arith.constant 0 : index
    %c0_48 = arith.constant 0 : index
    %117 = vector.load %arg2[%c0_47, %c0_48] : memref<24x112xf32, #tpu.memory_space<vmem>>, vector<24x112xf32>
    %c0_49 = arith.constant 0 : index
    %c0_50 = arith.constant 0 : index
    %118 = vector.load %arg9[%c0_49, %c0_50] : memref<112x256xf32, #tpu.memory_space<vmem>>, vector<112x256xf32>
    %cst_51 = arith.constant dense<0.000000e+00> : vector<24x256xf32>
    %119 = tpu.matmul %117, %118, %cst_51 {dimension_numbers = #tpu.dot_dimension_numbers<[1], [0], [0], [1], [0, 0, 1, 1], [], []>} : vector<24x112xf32>, vector<112x256xf32>, vector<24x256xf32> -> vector<24x256xf32>
    %c0_52 = arith.constant 0 : index
    %c0_53 = arith.constant 0 : index
    %120 = vector.load %arg3[%c0_52, %c0_53] : memref<24x1xf32, #tpu.memory_space<vmem>>, vector<24x1xf32>
    %121 = vector.broadcast %120 : vector<24x1xf32> to vector<24x256xf32>
    %122 = arith.addf %119, %121 : vector<24x256xf32>
    %123 = vector.extract_strided_slice %122 {offsets = [16, 0], sizes = [4, 256], strides = [1, 1]} : vector<24x256xf32> to vector<4x256xf32>
    %124 = vector.extract_strided_slice %122 {offsets = [20, 0], sizes = [4, 256], strides = [1, 1]} : vector<24x256xf32> to vector<4x256xf32>
    %125 = arith.mulf %123, %124 : vector<4x256xf32>
    %c0_54 = arith.constant 0 : index
    %c0_55 = arith.constant 0 : index
    %126 = vector.load %arg4[%c0_54, %c0_55] : memref<4x1xf32, #tpu.memory_space<vmem>>, vector<4x1xf32>
    %127 = vector.broadcast %126 : vector<4x1xf32> to vector<4x256xf32>
    %128 = arith.mulf %125, %127 : vector<4x256xf32>
    %c0_56 = arith.constant 0 : index
    %c0_57 = arith.constant 0 : index
    %129 = vector.load %arg5[%c0_56, %c0_57] : memref<4x1xf32, #tpu.memory_space<vmem>>, vector<4x1xf32>
    %130 = vector.broadcast %129 : vector<4x1xf32> to vector<4x256xf32>
    %131 = arith.addf %128, %130 : vector<4x256xf32>
    %132 = vector.extract_strided_slice %122 {offsets = [0, 0], sizes = [16, 256], strides = [1, 1]} : vector<24x256xf32> to vector<16x256xf32>
    %133 = tpu.concatenate %132, %131, %131 in 0 : vector<16x256xf32>, vector<4x256xf32>, vector<4x256xf32> -> vector<24x256xf32>
    %134 = arith.negf %133 : vector<24x256xf32>
    %135 = math.exp %134 : vector<24x256xf32>
    %cst_58 = arith.constant 1.000000e+00 : f32
    %136 = vector.broadcast %cst_58 : f32 to vector<24x256xf32>
    %137 = arith.addf %136, %135 : vector<24x256xf32>
    %138 = arith.divf %136, %137 : vector<24x256xf32>
    %139 = arith.mulf %133, %138 : vector<24x256xf32>
    %c0_59 = arith.constant 0 : index
    %c0_60 = arith.constant 0 : index
    %140 = vector.load %arg10[%c0_59, %c0_60] : memref<168x256xf32, #tpu.memory_space<vmem>>, vector<24x256xf32>
    tpu.vector_store %arg10[%c0_59, %c0_60], %139 {strides = array<i32>} : memref<168x256xf32, #tpu.memory_space<vmem>>, vector<24x256xf32>,
    %cst_61 = arith.constant -3.000000e+00 : f32
    %141 = vector.broadcast %cst_61 : f32 to vector<24x256xf32>
    %142 = arith.subf %133, %141 : vector<24x256xf32>
    %cst_62 = arith.constant 1.500000e+00 : f32
    %143 = vector.broadcast %cst_62 : f32 to vector<24x256xf32>
    %144 = arith.mulf %142, %143 : vector<24x256xf32>
    %145 = math.floor %144 : vector<24x256xf32>
    %146 = arith.subf %144, %145 : vector<24x256xf32>
    %147 = arith.mulf %146, %146 : vector<24x256xf32>
    %148 = arith.mulf %147, %146 : vector<24x256xf32>
    %cst_63 = arith.constant 0.166666672 : f32
    %149 = vector.broadcast %cst_63 : f32 to vector<24x256xf32>
    %150 = arith.mulf %148, %149 : vector<24x256xf32>
    %cst_64 = arith.constant 5.000000e-01 : f32
    %151 = vector.broadcast %cst_64 : f32 to vector<24x256xf32>
    %152 = arith.mulf %151, %148 : vector<24x256xf32>
    %153 = arith.subf %152, %147 : vector<24x256xf32>
    %cst_65 = arith.constant 0.666666686 : f32
    %154 = vector.broadcast %cst_65 : f32 to vector<24x256xf32>
    %155 = arith.addf %153, %154 : vector<24x256xf32>
    %cst_66 = arith.constant 1.000000e+00 : f32
    %156 = vector.broadcast %cst_66 : f32 to vector<24x256xf32>
    %157 = arith.subf %156, %146 : vector<24x256xf32>
    %158 = arith.mulf %157, %157 : vector<24x256xf32>
    %159 = arith.mulf %158, %157 : vector<24x256xf32>
    %cst_67 = arith.constant 0.166666672 : f32
    %160 = vector.broadcast %cst_67 : f32 to vector<24x256xf32>
    %161 = arith.mulf %159, %160 : vector<24x256xf32>
    %cst_68 = arith.constant 1.000000e+00 : f32
    %162 = vector.broadcast %cst_68 : f32 to vector<24x256xf32>
    %163 = arith.subf %162, %161 : vector<24x256xf32>
    %164 = arith.subf %163, %155 : vector<24x256xf32>
    %165 = arith.subf %164, %150 : vector<24x256xf32>
    %cst_69 = arith.constant 0.000000e+00 : f32
    %166 = vector.broadcast %cst_69 : f32 to vector<24x256xf32>
    %167 = arith.cmpf oeq, %145, %166 : vector<24x256xf32>
    %cst_70 = arith.constant 1.000000e+00 : f32
    %168 = vector.broadcast %cst_70 : f32 to vector<24x256xf32>
    %169 = arith.cmpf oeq, %145, %168 : vector<24x256xf32>
    %cst_71 = arith.constant 2.000000e+00 : f32
    %170 = vector.broadcast %cst_71 : f32 to vector<24x256xf32>
    %171 = arith.cmpf oeq, %145, %170 : vector<24x256xf32>
    %cst_72 = arith.constant 3.000000e+00 : f32
    %172 = vector.broadcast %cst_72 : f32 to vector<24x256xf32>
    %173 = arith.cmpf oeq, %145, %172 : vector<24x256xf32>
    %cst_73 = arith.constant 0.000000e+00 : f32
    %174 = vector.broadcast %cst_73 : f32 to vector<24x256xf32>
    %175 = arith.select %173, %161, %174 : vector<24x256xi1>, vector<24x256xf32>
    %176 = arith.select %171, %155, %175 : vector<24x256xi1>, vector<24x256xf32>
    %177 = arith.select %169, %165, %176 : vector<24x256xi1>, vector<24x256xf32>
    %178 = arith.select %167, %150, %177 : vector<24x256xi1>, vector<24x256xf32>
    %c24 = arith.constant 24 : index
    %c0_74 = arith.constant 0 : index
    %179 = vector.load %arg10[%c24, %c0_74] : memref<168x256xf32, #tpu.memory_space<vmem>>, vector<24x256xf32>
    tpu.vector_store %arg10[%c24, %c0_74], %178 {strides = array<i32>} : memref<168x256xf32, #tpu.memory_space<vmem>>, vector<24x256xf32>,
    %cst_75 = arith.constant 1.000000e+00 : f32
    %180 = vector.broadcast %cst_75 : f32 to vector<24x256xf32>
    %181 = arith.cmpf oeq, %145, %180 : vector<24x256xf32>
    %cst_76 = arith.constant 2.000000e+00 : f32
    %182 = vector.broadcast %cst_76 : f32 to vector<24x256xf32>
    %183 = arith.cmpf oeq, %145, %182 : vector<24x256xf32>
    %cst_77 = arith.constant 3.000000e+00 : f32
    %184 = vector.broadcast %cst_77 : f32 to vector<24x256xf32>
    %185 = arith.cmpf oeq, %145, %184 : vector<24x256xf32>
    %cst_78 = arith.constant 4.000000e+00 : f32
    %186 = vector.broadcast %cst_78 : f32 to vector<24x256xf32>
    %187 = arith.cmpf oeq, %145, %186 : vector<24x256xf32>
    %cst_79 = arith.constant 0.000000e+00 : f32
    %188 = vector.broadcast %cst_79 : f32 to vector<24x256xf32>
    %189 = arith.select %187, %161, %188 : vector<24x256xi1>, vector<24x256xf32>
    %190 = arith.select %185, %155, %189 : vector<24x256xi1>, vector<24x256xf32>
    %191 = arith.select %183, %165, %190 : vector<24x256xi1>, vector<24x256xf32>
    %192 = arith.select %181, %150, %191 : vector<24x256xi1>, vector<24x256xf32>
    %c48_80 = arith.constant 48 : index
    %c0_81 = arith.constant 0 : index
    %193 = vector.load %arg10[%c48_80, %c0_81] : memref<168x256xf32, #tpu.memory_space<vmem>>, vector<24x256xf32>
    tpu.vector_store %arg10[%c48_80, %c0_81], %192 {strides = array<i32>} : memref<168x256xf32, #tpu.memory_space<vmem>>, vector<24x256xf32>,
    %cst_82 = arith.constant 2.000000e+00 : f32
    %194 = vector.broadcast %cst_82 : f32 to vector<24x256xf32>
    %195 = arith.cmpf oeq, %145, %194 : vector<24x256xf32>
    %cst_83 = arith.constant 3.000000e+00 : f32
    %196 = vector.broadcast %cst_83 : f32 to vector<24x256xf32>
    %197 = arith.cmpf oeq, %145, %196 : vector<24x256xf32>
    %cst_84 = arith.constant 4.000000e+00 : f32
    %198 = vector.broadcast %cst_84 : f32 to vector<24x256xf32>
    %199 = arith.cmpf oeq, %145, %198 : vector<24x256xf32>
    %cst_85 = arith.constant 5.000000e+00 : f32
    %200 = vector.broadcast %cst_85 : f32 to vector<24x256xf32>
    %201 = arith.cmpf oeq, %145, %200 : vector<24x256xf32>
    %cst_86 = arith.constant 0.000000e+00 : f32
    %202 = vector.broadcast %cst_86 : f32 to vector<24x256xf32>
    %203 = arith.select %201, %161, %202 : vector<24x256xi1>, vector<24x256xf32>
    %204 = arith.select %199, %155, %203 : vector<24x256xi1>, vector<24x256xf32>
    %205 = arith.select %197, %165, %204 : vector<24x256xi1>, vector<24x256xf32>
    %206 = arith.select %195, %150, %205 : vector<24x256xi1>, vector<24x256xf32>
    %c72 = arith.constant 72 : index
    %c0_87 = arith.constant 0 : index
    %207 = vector.load %arg10[%c72, %c0_87] : memref<168x256xf32, #tpu.memory_space<vmem>>, vector<24x256xf32>
    tpu.vector_store %arg10[%c72, %c0_87], %206 {strides = array<i32>} : memref<168x256xf32, #tpu.memory_space<vmem>>, vector<24x256xf32>,
    %cst_88 = arith.constant 3.000000e+00 : f32
    %208 = vector.broadcast %cst_88 : f32 to vector<24x256xf32>
    %209 = arith.cmpf oeq, %145, %208 : vector<24x256xf32>
    %cst_89 = arith.constant 4.000000e+00 : f32
    %210 = vector.broadcast %cst_89 : f32 to vector<24x256xf32>
    %211 = arith.cmpf oeq, %145, %210 : vector<24x256xf32>
    %cst_90 = arith.constant 5.000000e+00 : f32
    %212 = vector.broadcast %cst_90 : f32 to vector<24x256xf32>
    %213 = arith.cmpf oeq, %145, %212 : vector<24x256xf32>
    %cst_91 = arith.constant 6.000000e+00 : f32
    %214 = vector.broadcast %cst_91 : f32 to vector<24x256xf32>
    %215 = arith.cmpf oeq, %145, %214 : vector<24x256xf32>
    %cst_92 = arith.constant 0.000000e+00 : f32
    %216 = vector.broadcast %cst_92 : f32 to vector<24x256xf32>
    %217 = arith.select %215, %161, %216 : vector<24x256xi1>, vector<24x256xf32>
    %218 = arith.select %213, %155, %217 : vector<24x256xi1>, vector<24x256xf32>
    %219 = arith.select %211, %165, %218 : vector<24x256xi1>, vector<24x256xf32>
    %220 = arith.select %209, %150, %219 : vector<24x256xi1>, vector<24x256xf32>
    %c96_93 = arith.constant 96 : index
    %c0_94 = arith.constant 0 : index
    %221 = vector.load %arg10[%c96_93, %c0_94] : memref<168x256xf32, #tpu.memory_space<vmem>>, vector<24x256xf32>
    tpu.vector_store %arg10[%c96_93, %c0_94], %220 {strides = array<i32>} : memref<168x256xf32, #tpu.memory_space<vmem>>, vector<24x256xf32>,
    %cst_95 = arith.constant 4.000000e+00 : f32
    %222 = vector.broadcast %cst_95 : f32 to vector<24x256xf32>
    %223 = arith.cmpf oeq, %145, %222 : vector<24x256xf32>
    %cst_96 = arith.constant 5.000000e+00 : f32
    %224 = vector.broadcast %cst_96 : f32 to vector<24x256xf32>
    %225 = arith.cmpf oeq, %145, %224 : vector<24x256xf32>
    %cst_97 = arith.constant 6.000000e+00 : f32
    %226 = vector.broadcast %cst_97 : f32 to vector<24x256xf32>
    %227 = arith.cmpf oeq, %145, %226 : vector<24x256xf32>
    %cst_98 = arith.constant 7.000000e+00 : f32
    %228 = vector.broadcast %cst_98 : f32 to vector<24x256xf32>
    %229 = arith.cmpf oeq, %145, %228 : vector<24x256xf32>
    %cst_99 = arith.constant 0.000000e+00 : f32
    %230 = vector.broadcast %cst_99 : f32 to vector<24x256xf32>
    %231 = arith.select %229, %161, %230 : vector<24x256xi1>, vector<24x256xf32>
    %232 = arith.select %227, %155, %231 : vector<24x256xi1>, vector<24x256xf32>
    %233 = arith.select %225, %165, %232 : vector<24x256xi1>, vector<24x256xf32>
    %234 = arith.select %223, %150, %233 : vector<24x256xi1>, vector<24x256xf32>
    %c120 = arith.constant 120 : index
    %c0_100 = arith.constant 0 : index
    %235 = vector.load %arg10[%c120, %c0_100] : memref<168x256xf32, #tpu.memory_space<vmem>>, vector<24x256xf32>
    tpu.vector_store %arg10[%c120, %c0_100], %234 {strides = array<i32>} : memref<168x256xf32, #tpu.memory_space<vmem>>, vector<24x256xf32>,
    %cst_101 = arith.constant 5.000000e+00 : f32
    %236 = vector.broadcast %cst_101 : f32 to vector<24x256xf32>
    %237 = arith.cmpf oeq, %145, %236 : vector<24x256xf32>
    %cst_102 = arith.constant 6.000000e+00 : f32
    %238 = vector.broadcast %cst_102 : f32 to vector<24x256xf32>
    %239 = arith.cmpf oeq, %145, %238 : vector<24x256xf32>
    %cst_103 = arith.constant 7.000000e+00 : f32
    %240 = vector.broadcast %cst_103 : f32 to vector<24x256xf32>
    %241 = arith.cmpf oeq, %145, %240 : vector<24x256xf32>
    %cst_104 = arith.constant 8.000000e+00 : f32
    %242 = vector.broadcast %cst_104 : f32 to vector<24x256xf32>
    %243 = arith.cmpf oeq, %145, %242 : vector<24x256xf32>
    %cst_105 = arith.constant 0.000000e+00 : f32
    %244 = vector.broadcast %cst_105 : f32 to vector<24x256xf32>
    %245 = arith.select %243, %161, %244 : vector<24x256xi1>, vector<24x256xf32>
    %246 = arith.select %241, %155, %245 : vector<24x256xi1>, vector<24x256xf32>
    %247 = arith.select %239, %165, %246 : vector<24x256xi1>, vector<24x256xf32>
    %248 = arith.select %237, %150, %247 : vector<24x256xi1>, vector<24x256xf32>
    %c144 = arith.constant 144 : index
    %c0_106 = arith.constant 0 : index
    %249 = vector.load %arg10[%c144, %c0_106] : memref<168x256xf32, #tpu.memory_space<vmem>>, vector<24x256xf32>
    tpu.vector_store %arg10[%c144, %c0_106], %248 {strides = array<i32>} : memref<168x256xf32, #tpu.memory_space<vmem>>, vector<24x256xf32>,
    %c0_107 = arith.constant 0 : index
    %c0_108 = arith.constant 0 : index
    %250 = vector.load %arg6[%c0_107, %c0_108] : memref<16x168xf32, #tpu.memory_space<vmem>>, vector<16x168xf32>
    %c0_109 = arith.constant 0 : index
    %c0_110 = arith.constant 0 : index
    %251 = vector.load %arg10[%c0_109, %c0_110] : memref<168x256xf32, #tpu.memory_space<vmem>>, vector<168x256xf32>
    %cst_111 = arith.constant dense<0.000000e+00> : vector<16x256xf32>
    %252 = tpu.matmul %250, %251, %cst_111 {dimension_numbers = #tpu.dot_dimension_numbers<[1], [0], [0], [1], [0, 0, 1, 1], [], []>} : vector<16x168xf32>, vector<168x256xf32>, vector<16x256xf32> -> vector<16x256xf32>
    %c0_112 = arith.constant 0 : index
    %c0_113 = arith.constant 0 : index
    %253 = vector.load %arg7[%c0_112, %c0_113] : memref<16x1xf32, #tpu.memory_space<vmem>>, vector<16x1xf32>
    %254 = vector.broadcast %253 : vector<16x1xf32> to vector<16x256xf32>
    %255 = arith.addf %252, %254 : vector<16x256xf32>
    %c0_114 = arith.constant 0 : index
    %c0_115 = arith.constant 0 : index
    %256 = vector.load %arg8[%c0_114, %c0_115] : memref<16x512xf32, #tpu.memory_space<vmem>>, vector<16x256xf32>
    tpu.vector_store %arg8[%c0_114, %c0_115], %255 {strides = array<i32>} : memref<16x512xf32, #tpu.memory_space<vmem>>, vector<16x256xf32>,
    %c0_116 = arith.constant 0 : index
    %c256 = arith.constant 256 : index
    %257 = vector.load %arg1[%c0_116, %c256] : memref<16x512xf32, #tpu.memory_space<vmem>>, vector<16x256xf32>
    %258 = arith.negf %257 : vector<16x256xf32>
    %259 = math.exp %258 : vector<16x256xf32>
    %cst_117 = arith.constant 1.000000e+00 : f32
    %260 = vector.broadcast %cst_117 : f32 to vector<16x256xf32>
    %261 = arith.addf %260, %259 : vector<16x256xf32>
    %262 = arith.divf %260, %261 : vector<16x256xf32>
    %263 = arith.mulf %257, %262 : vector<16x256xf32>
    %c0_118 = arith.constant 0 : index
    %c0_119 = arith.constant 0 : index
    %264 = vector.load %arg9[%c0_118, %c0_119] : memref<112x256xf32, #tpu.memory_space<vmem>>, vector<16x256xf32>
    tpu.vector_store %arg9[%c0_118, %c0_119], %263 {strides = array<i32>} : memref<112x256xf32, #tpu.memory_space<vmem>>, vector<16x256xf32>,
    %cst_120 = arith.constant -3.000000e+00 : f32
    %265 = vector.broadcast %cst_120 : f32 to vector<16x256xf32>
    %266 = arith.subf %257, %265 : vector<16x256xf32>
    %cst_121 = arith.constant 1.500000e+00 : f32
    %267 = vector.broadcast %cst_121 : f32 to vector<16x256xf32>
    %268 = arith.mulf %266, %267 : vector<16x256xf32>
    %269 = math.floor %268 : vector<16x256xf32>
    %270 = arith.subf %268, %269 : vector<16x256xf32>
    %271 = arith.mulf %270, %270 : vector<16x256xf32>
    %272 = arith.mulf %271, %270 : vector<16x256xf32>
    %cst_122 = arith.constant 0.166666672 : f32
    %273 = vector.broadcast %cst_122 : f32 to vector<16x256xf32>
    %274 = arith.mulf %272, %273 : vector<16x256xf32>
    %cst_123 = arith.constant 5.000000e-01 : f32
    %275 = vector.broadcast %cst_123 : f32 to vector<16x256xf32>
    %276 = arith.mulf %275, %272 : vector<16x256xf32>
    %277 = arith.subf %276, %271 : vector<16x256xf32>
    %cst_124 = arith.constant 0.666666686 : f32
    %278 = vector.broadcast %cst_124 : f32 to vector<16x256xf32>
    %279 = arith.addf %277, %278 : vector<16x256xf32>
    %cst_125 = arith.constant 1.000000e+00 : f32
    %280 = vector.broadcast %cst_125 : f32 to vector<16x256xf32>
    %281 = arith.subf %280, %270 : vector<16x256xf32>
    %282 = arith.mulf %281, %281 : vector<16x256xf32>
    %283 = arith.mulf %282, %281 : vector<16x256xf32>
    %cst_126 = arith.constant 0.166666672 : f32
    %284 = vector.broadcast %cst_126 : f32 to vector<16x256xf32>
    %285 = arith.mulf %283, %284 : vector<16x256xf32>
    %cst_127 = arith.constant 1.000000e+00 : f32
    %286 = vector.broadcast %cst_127 : f32 to vector<16x256xf32>
    %287 = arith.subf %286, %285 : vector<16x256xf32>
    %288 = arith.subf %287, %279 : vector<16x256xf32>
    %289 = arith.subf %288, %274 : vector<16x256xf32>
    %cst_128 = arith.constant 0.000000e+00 : f32
    %290 = vector.broadcast %cst_128 : f32 to vector<16x256xf32>
    %291 = arith.cmpf oeq, %269, %290 : vector<16x256xf32>
    %cst_129 = arith.constant 1.000000e+00 : f32
    %292 = vector.broadcast %cst_129 : f32 to vector<16x256xf32>
    %293 = arith.cmpf oeq, %269, %292 : vector<16x256xf32>
    %cst_130 = arith.constant 2.000000e+00 : f32
    %294 = vector.broadcast %cst_130 : f32 to vector<16x256xf32>
    %295 = arith.cmpf oeq, %269, %294 : vector<16x256xf32>
    %cst_131 = arith.constant 3.000000e+00 : f32
    %296 = vector.broadcast %cst_131 : f32 to vector<16x256xf32>
    %297 = arith.cmpf oeq, %269, %296 : vector<16x256xf32>
    %cst_132 = arith.constant 0.000000e+00 : f32
    %298 = vector.broadcast %cst_132 : f32 to vector<16x256xf32>
    %299 = arith.select %297, %285, %298 : vector<16x256xi1>, vector<16x256xf32>
    %300 = arith.select %295, %279, %299 : vector<16x256xi1>, vector<16x256xf32>
    %301 = arith.select %293, %289, %300 : vector<16x256xi1>, vector<16x256xf32>
    %302 = arith.select %291, %274, %301 : vector<16x256xi1>, vector<16x256xf32>
    %c16_133 = arith.constant 16 : index
    %c0_134 = arith.constant 0 : index
    %303 = vector.load %arg9[%c16_133, %c0_134] : memref<112x256xf32, #tpu.memory_space<vmem>>, vector<16x256xf32>
    tpu.vector_store %arg9[%c16_133, %c0_134], %302 {strides = array<i32>} : memref<112x256xf32, #tpu.memory_space<vmem>>, vector<16x256xf32>,
    %cst_135 = arith.constant 1.000000e+00 : f32
    %304 = vector.broadcast %cst_135 : f32 to vector<16x256xf32>
    %305 = arith.cmpf oeq, %269, %304 : vector<16x256xf32>
    %cst_136 = arith.constant 2.000000e+00 : f32
    %306 = vector.broadcast %cst_136 : f32 to vector<16x256xf32>
    %307 = arith.cmpf oeq, %269, %306 : vector<16x256xf32>
    %cst_137 = arith.constant 3.000000e+00 : f32
    %308 = vector.broadcast %cst_137 : f32 to vector<16x256xf32>
    %309 = arith.cmpf oeq, %269, %308 : vector<16x256xf32>
    %cst_138 = arith.constant 4.000000e+00 : f32
    %310 = vector.broadcast %cst_138 : f32 to vector<16x256xf32>
    %311 = arith.cmpf oeq, %269, %310 : vector<16x256xf32>
    %cst_139 = arith.constant 0.000000e+00 : f32
    %312 = vector.broadcast %cst_139 : f32 to vector<16x256xf32>
    %313 = arith.select %311, %285, %312 : vector<16x256xi1>, vector<16x256xf32>
    %314 = arith.select %309, %279, %313 : vector<16x256xi1>, vector<16x256xf32>
    %315 = arith.select %307, %289, %314 : vector<16x256xi1>, vector<16x256xf32>
    %316 = arith.select %305, %274, %315 : vector<16x256xi1>, vector<16x256xf32>
    %c32_140 = arith.constant 32 : index
    %c0_141 = arith.constant 0 : index
    %317 = vector.load %arg9[%c32_140, %c0_141] : memref<112x256xf32, #tpu.memory_space<vmem>>, vector<16x256xf32>
    tpu.vector_store %arg9[%c32_140, %c0_141], %316 {strides = array<i32>} : memref<112x256xf32, #tpu.memory_space<vmem>>, vector<16x256xf32>,
    %cst_142 = arith.constant 2.000000e+00 : f32
    %318 = vector.broadcast %cst_142 : f32 to vector<16x256xf32>
    %319 = arith.cmpf oeq, %269, %318 : vector<16x256xf32>
    %cst_143 = arith.constant 3.000000e+00 : f32
    %320 = vector.broadcast %cst_143 : f32 to vector<16x256xf32>
    %321 = arith.cmpf oeq, %269, %320 : vector<16x256xf32>
    %cst_144 = arith.constant 4.000000e+00 : f32
    %322 = vector.broadcast %cst_144 : f32 to vector<16x256xf32>
    %323 = arith.cmpf oeq, %269, %322 : vector<16x256xf32>
    %cst_145 = arith.constant 5.000000e+00 : f32
    %324 = vector.broadcast %cst_145 : f32 to vector<16x256xf32>
    %325 = arith.cmpf oeq, %269, %324 : vector<16x256xf32>
    %cst_146 = arith.constant 0.000000e+00 : f32
    %326 = vector.broadcast %cst_146 : f32 to vector<16x256xf32>
    %327 = arith.select %325, %285, %326 : vector<16x256xi1>, vector<16x256xf32>
    %328 = arith.select %323, %279, %327 : vector<16x256xi1>, vector<16x256xf32>
    %329 = arith.select %321, %289, %328 : vector<16x256xi1>, vector<16x256xf32>
    %330 = arith.select %319, %274, %329 : vector<16x256xi1>, vector<16x256xf32>
    %c48_147 = arith.constant 48 : index
    %c0_148 = arith.constant 0 : index
    %331 = vector.load %arg9[%c48_147, %c0_148] : memref<112x256xf32, #tpu.memory_space<vmem>>, vector<16x256xf32>
    tpu.vector_store %arg9[%c48_147, %c0_148], %330 {strides = array<i32>} : memref<112x256xf32, #tpu.memory_space<vmem>>, vector<16x256xf32>,
    %cst_149 = arith.constant 3.000000e+00 : f32
    %332 = vector.broadcast %cst_149 : f32 to vector<16x256xf32>
    %333 = arith.cmpf oeq, %269, %332 : vector<16x256xf32>
    %cst_150 = arith.constant 4.000000e+00 : f32
    %334 = vector.broadcast %cst_150 : f32 to vector<16x256xf32>
    %335 = arith.cmpf oeq, %269, %334 : vector<16x256xf32>
    %cst_151 = arith.constant 5.000000e+00 : f32
    %336 = vector.broadcast %cst_151 : f32 to vector<16x256xf32>
    %337 = arith.cmpf oeq, %269, %336 : vector<16x256xf32>
    %cst_152 = arith.constant 6.000000e+00 : f32
    %338 = vector.broadcast %cst_152 : f32 to vector<16x256xf32>
    %339 = arith.cmpf oeq, %269, %338 : vector<16x256xf32>
    %cst_153 = arith.constant 0.000000e+00 : f32
    %340 = vector.broadcast %cst_153 : f32 to vector<16x256xf32>
    %341 = arith.select %339, %285, %340 : vector<16x256xi1>, vector<16x256xf32>
    %342 = arith.select %337, %279, %341 : vector<16x256xi1>, vector<16x256xf32>
    %343 = arith.select %335, %289, %342 : vector<16x256xi1>, vector<16x256xf32>
    %344 = arith.select %333, %274, %343 : vector<16x256xi1>, vector<16x256xf32>
    %c64_154 = arith.constant 64 : index
    %c0_155 = arith.constant 0 : index
    %345 = vector.load %arg9[%c64_154, %c0_155] : memref<112x256xf32, #tpu.memory_space<vmem>>, vector<16x256xf32>
    tpu.vector_store %arg9[%c64_154, %c0_155], %344 {strides = array<i32>} : memref<112x256xf32, #tpu.memory_space<vmem>>, vector<16x256xf32>,
    %cst_156 = arith.constant 4.000000e+00 : f32
    %346 = vector.broadcast %cst_156 : f32 to vector<16x256xf32>
    %347 = arith.cmpf oeq, %269, %346 : vector<16x256xf32>
    %cst_157 = arith.constant 5.000000e+00 : f32
    %348 = vector.broadcast %cst_157 : f32 to vector<16x256xf32>
    %349 = arith.cmpf oeq, %269, %348 : vector<16x256xf32>
    %cst_158 = arith.constant 6.000000e+00 : f32
    %350 = vector.broadcast %cst_158 : f32 to vector<16x256xf32>
    %351 = arith.cmpf oeq, %269, %350 : vector<16x256xf32>
    %cst_159 = arith.constant 7.000000e+00 : f32
    %352 = vector.broadcast %cst_159 : f32 to vector<16x256xf32>
    %353 = arith.cmpf oeq, %269, %352 : vector<16x256xf32>
    %cst_160 = arith.constant 0.000000e+00 : f32
    %354 = vector.broadcast %cst_160 : f32 to vector<16x256xf32>
    %355 = arith.select %353, %285, %354 : vector<16x256xi1>, vector<16x256xf32>
    %356 = arith.select %351, %279, %355 : vector<16x256xi1>, vector<16x256xf32>
    %357 = arith.select %349, %289, %356 : vector<16x256xi1>, vector<16x256xf32>
    %358 = arith.select %347, %274, %357 : vector<16x256xi1>, vector<16x256xf32>
    %c80_161 = arith.constant 80 : index
    %c0_162 = arith.constant 0 : index
    %359 = vector.load %arg9[%c80_161, %c0_162] : memref<112x256xf32, #tpu.memory_space<vmem>>, vector<16x256xf32>
    tpu.vector_store %arg9[%c80_161, %c0_162], %358 {strides = array<i32>} : memref<112x256xf32, #tpu.memory_space<vmem>>, vector<16x256xf32>,
    %cst_163 = arith.constant 5.000000e+00 : f32
    %360 = vector.broadcast %cst_163 : f32 to vector<16x256xf32>
    %361 = arith.cmpf oeq, %269, %360 : vector<16x256xf32>
    %cst_164 = arith.constant 6.000000e+00 : f32
    %362 = vector.broadcast %cst_164 : f32 to vector<16x256xf32>
    %363 = arith.cmpf oeq, %269, %362 : vector<16x256xf32>
    %cst_165 = arith.constant 7.000000e+00 : f32
    %364 = vector.broadcast %cst_165 : f32 to vector<16x256xf32>
    %365 = arith.cmpf oeq, %269, %364 : vector<16x256xf32>
    %cst_166 = arith.constant 8.000000e+00 : f32
    %366 = vector.broadcast %cst_166 : f32 to vector<16x256xf32>
    %367 = arith.cmpf oeq, %269, %366 : vector<16x256xf32>
    %cst_167 = arith.constant 0.000000e+00 : f32
    %368 = vector.broadcast %cst_167 : f32 to vector<16x256xf32>
    %369 = arith.select %367, %285, %368 : vector<16x256xi1>, vector<16x256xf32>
    %370 = arith.select %365, %279, %369 : vector<16x256xi1>, vector<16x256xf32>
    %371 = arith.select %363, %289, %370 : vector<16x256xi1>, vector<16x256xf32>
    %372 = arith.select %361, %274, %371 : vector<16x256xi1>, vector<16x256xf32>
    %c96_168 = arith.constant 96 : index
    %c0_169 = arith.constant 0 : index
    %373 = vector.load %arg9[%c96_168, %c0_169] : memref<112x256xf32, #tpu.memory_space<vmem>>, vector<16x256xf32>
    tpu.vector_store %arg9[%c96_168, %c0_169], %372 {strides = array<i32>} : memref<112x256xf32, #tpu.memory_space<vmem>>, vector<16x256xf32>,
    %c0_170 = arith.constant 0 : index
    %c0_171 = arith.constant 0 : index
    %374 = vector.load %arg2[%c0_170, %c0_171] : memref<24x112xf32, #tpu.memory_space<vmem>>, vector<24x112xf32>
    %c0_172 = arith.constant 0 : index
    %c0_173 = arith.constant 0 : index
    %375 = vector.load %arg9[%c0_172, %c0_173] : memref<112x256xf32, #tpu.memory_space<vmem>>, vector<112x256xf32>
    %cst_174 = arith.constant dense<0.000000e+00> : vector<24x256xf32>
    %376 = tpu.matmul %374, %375, %cst_174 {dimension_numbers = #tpu.dot_dimension_numbers<[1], [0], [0], [1], [0, 0, 1, 1], [], []>} : vector<24x112xf32>, vector<112x256xf32>, vector<24x256xf32> -> vector<24x256xf32>
    %c0_175 = arith.constant 0 : index
    %c0_176 = arith.constant 0 : index
    %377 = vector.load %arg3[%c0_175, %c0_176] : memref<24x1xf32, #tpu.memory_space<vmem>>, vector<24x1xf32>
    %378 = vector.broadcast %377 : vector<24x1xf32> to vector<24x256xf32>
    %379 = arith.addf %376, %378 : vector<24x256xf32>
    %380 = vector.extract_strided_slice %379 {offsets = [16, 0], sizes = [4, 256], strides = [1, 1]} : vector<24x256xf32> to vector<4x256xf32>
    %381 = vector.extract_strided_slice %379 {offsets = [20, 0], sizes = [4, 256], strides = [1, 1]} : vector<24x256xf32> to vector<4x256xf32>
    %382 = arith.mulf %380, %381 : vector<4x256xf32>
    %c0_177 = arith.constant 0 : index
    %c0_178 = arith.constant 0 : index
    %383 = vector.load %arg4[%c0_177, %c0_178] : memref<4x1xf32, #tpu.memory_space<vmem>>, vector<4x1xf32>
    %384 = vector.broadcast %383 : vector<4x1xf32> to vector<4x256xf32>
    %385 = arith.mulf %382, %384 : vector<4x256xf32>
    %c0_179 = arith.constant 0 : index
    %c0_180 = arith.constant 0 : index
    %386 = vector.load %arg5[%c0_179, %c0_180] : memref<4x1xf32, #tpu.memory_space<vmem>>, vector<4x1xf32>
    %387 = vector.broadcast %386 : vector<4x1xf32> to vector<4x256xf32>
    %388 = arith.addf %385, %387 : vector<4x256xf32>
    %389 = vector.extract_strided_slice %379 {offsets = [0, 0], sizes = [16, 256], strides = [1, 1]} : vector<24x256xf32> to vector<16x256xf32>
    %390 = tpu.concatenate %389, %388, %388 in 0 : vector<16x256xf32>, vector<4x256xf32>, vector<4x256xf32> -> vector<24x256xf32>
    %391 = arith.negf %390 : vector<24x256xf32>
    %392 = math.exp %391 : vector<24x256xf32>
    %cst_181 = arith.constant 1.000000e+00 : f32
    %393 = vector.broadcast %cst_181 : f32 to vector<24x256xf32>
    %394 = arith.addf %393, %392 : vector<24x256xf32>
    %395 = arith.divf %393, %394 : vector<24x256xf32>
    %396 = arith.mulf %390, %395 : vector<24x256xf32>
    %c0_182 = arith.constant 0 : index
    %c0_183 = arith.constant 0 : index
    %397 = vector.load %arg10[%c0_182, %c0_183] : memref<168x256xf32, #tpu.memory_space<vmem>>, vector<24x256xf32>
    tpu.vector_store %arg10[%c0_182, %c0_183], %396 {strides = array<i32>} : memref<168x256xf32, #tpu.memory_space<vmem>>, vector<24x256xf32>,
    %cst_184 = arith.constant -3.000000e+00 : f32
    %398 = vector.broadcast %cst_184 : f32 to vector<24x256xf32>
    %399 = arith.subf %390, %398 : vector<24x256xf32>
    %cst_185 = arith.constant 1.500000e+00 : f32
    %400 = vector.broadcast %cst_185 : f32 to vector<24x256xf32>
    %401 = arith.mulf %399, %400 : vector<24x256xf32>
    %402 = math.floor %401 : vector<24x256xf32>
    %403 = arith.subf %401, %402 : vector<24x256xf32>
    %404 = arith.mulf %403, %403 : vector<24x256xf32>
    %405 = arith.mulf %404, %403 : vector<24x256xf32>
    %cst_186 = arith.constant 0.166666672 : f32
    %406 = vector.broadcast %cst_186 : f32 to vector<24x256xf32>
    %407 = arith.mulf %405, %406 : vector<24x256xf32>
    %cst_187 = arith.constant 5.000000e-01 : f32
    %408 = vector.broadcast %cst_187 : f32 to vector<24x256xf32>
    %409 = arith.mulf %408, %405 : vector<24x256xf32>
    %410 = arith.subf %409, %404 : vector<24x256xf32>
    %cst_188 = arith.constant 0.666666686 : f32
    %411 = vector.broadcast %cst_188 : f32 to vector<24x256xf32>
    %412 = arith.addf %410, %411 : vector<24x256xf32>
    %cst_189 = arith.constant 1.000000e+00 : f32
    %413 = vector.broadcast %cst_189 : f32 to vector<24x256xf32>
    %414 = arith.subf %413, %403 : vector<24x256xf32>
    %415 = arith.mulf %414, %414 : vector<24x256xf32>
    %416 = arith.mulf %415, %414 : vector<24x256xf32>
    %cst_190 = arith.constant 0.166666672 : f32
    %417 = vector.broadcast %cst_190 : f32 to vector<24x256xf32>
    %418 = arith.mulf %416, %417 : vector<24x256xf32>
    %cst_191 = arith.constant 1.000000e+00 : f32
    %419 = vector.broadcast %cst_191 : f32 to vector<24x256xf32>
    %420 = arith.subf %419, %418 : vector<24x256xf32>
    %421 = arith.subf %420, %412 : vector<24x256xf32>
    %422 = arith.subf %421, %407 : vector<24x256xf32>
    %cst_192 = arith.constant 0.000000e+00 : f32
    %423 = vector.broadcast %cst_192 : f32 to vector<24x256xf32>
    %424 = arith.cmpf oeq, %402, %423 : vector<24x256xf32>
    %cst_193 = arith.constant 1.000000e+00 : f32
    %425 = vector.broadcast %cst_193 : f32 to vector<24x256xf32>
    %426 = arith.cmpf oeq, %402, %425 : vector<24x256xf32>
    %cst_194 = arith.constant 2.000000e+00 : f32
    %427 = vector.broadcast %cst_194 : f32 to vector<24x256xf32>
    %428 = arith.cmpf oeq, %402, %427 : vector<24x256xf32>
    %cst_195 = arith.constant 3.000000e+00 : f32
    %429 = vector.broadcast %cst_195 : f32 to vector<24x256xf32>
    %430 = arith.cmpf oeq, %402, %429 : vector<24x256xf32>
    %cst_196 = arith.constant 0.000000e+00 : f32
    %431 = vector.broadcast %cst_196 : f32 to vector<24x256xf32>
    %432 = arith.select %430, %418, %431 : vector<24x256xi1>, vector<24x256xf32>
    %433 = arith.select %428, %412, %432 : vector<24x256xi1>, vector<24x256xf32>
    %434 = arith.select %426, %422, %433 : vector<24x256xi1>, vector<24x256xf32>
    %435 = arith.select %424, %407, %434 : vector<24x256xi1>, vector<24x256xf32>
    %c24_197 = arith.constant 24 : index
    %c0_198 = arith.constant 0 : index
    %436 = vector.load %arg10[%c24_197, %c0_198] : memref<168x256xf32, #tpu.memory_space<vmem>>, vector<24x256xf32>
    tpu.vector_store %arg10[%c24_197, %c0_198], %435 {strides = array<i32>} : memref<168x256xf32, #tpu.memory_space<vmem>>, vector<24x256xf32>,
    %cst_199 = arith.constant 1.000000e+00 : f32
    %437 = vector.broadcast %cst_199 : f32 to vector<24x256xf32>
    %438 = arith.cmpf oeq, %402, %437 : vector<24x256xf32>
    %cst_200 = arith.constant 2.000000e+00 : f32
    %439 = vector.broadcast %cst_200 : f32 to vector<24x256xf32>
    %440 = arith.cmpf oeq, %402, %439 : vector<24x256xf32>
    %cst_201 = arith.constant 3.000000e+00 : f32
    %441 = vector.broadcast %cst_201 : f32 to vector<24x256xf32>
    %442 = arith.cmpf oeq, %402, %441 : vector<24x256xf32>
    %cst_202 = arith.constant 4.000000e+00 : f32
    %443 = vector.broadcast %cst_202 : f32 to vector<24x256xf32>
    %444 = arith.cmpf oeq, %402, %443 : vector<24x256xf32>
    %cst_203 = arith.constant 0.000000e+00 : f32
    %445 = vector.broadcast %cst_203 : f32 to vector<24x256xf32>
    %446 = arith.select %444, %418, %445 : vector<24x256xi1>, vector<24x256xf32>
    %447 = arith.select %442, %412, %446 : vector<24x256xi1>, vector<24x256xf32>
    %448 = arith.select %440, %422, %447 : vector<24x256xi1>, vector<24x256xf32>
    %449 = arith.select %438, %407, %448 : vector<24x256xi1>, vector<24x256xf32>
    %c48_204 = arith.constant 48 : index
    %c0_205 = arith.constant 0 : index
    %450 = vector.load %arg10[%c48_204, %c0_205] : memref<168x256xf32, #tpu.memory_space<vmem>>, vector<24x256xf32>
    tpu.vector_store %arg10[%c48_204, %c0_205], %449 {strides = array<i32>} : memref<168x256xf32, #tpu.memory_space<vmem>>, vector<24x256xf32>,
    %cst_206 = arith.constant 2.000000e+00 : f32
    %451 = vector.broadcast %cst_206 : f32 to vector<24x256xf32>
    %452 = arith.cmpf oeq, %402, %451 : vector<24x256xf32>
    %cst_207 = arith.constant 3.000000e+00 : f32
    %453 = vector.broadcast %cst_207 : f32 to vector<24x256xf32>
    %454 = arith.cmpf oeq, %402, %453 : vector<24x256xf32>
    %cst_208 = arith.constant 4.000000e+00 : f32
    %455 = vector.broadcast %cst_208 : f32 to vector<24x256xf32>
    %456 = arith.cmpf oeq, %402, %455 : vector<24x256xf32>
    %cst_209 = arith.constant 5.000000e+00 : f32
    %457 = vector.broadcast %cst_209 : f32 to vector<24x256xf32>
    %458 = arith.cmpf oeq, %402, %457 : vector<24x256xf32>
    %cst_210 = arith.constant 0.000000e+00 : f32
    %459 = vector.broadcast %cst_210 : f32 to vector<24x256xf32>
    %460 = arith.select %458, %418, %459 : vector<24x256xi1>, vector<24x256xf32>
    %461 = arith.select %456, %412, %460 : vector<24x256xi1>, vector<24x256xf32>
    %462 = arith.select %454, %422, %461 : vector<24x256xi1>, vector<24x256xf32>
    %463 = arith.select %452, %407, %462 : vector<24x256xi1>, vector<24x256xf32>
    %c72_211 = arith.constant 72 : index
    %c0_212 = arith.constant 0 : index
    %464 = vector.load %arg10[%c72_211, %c0_212] : memref<168x256xf32, #tpu.memory_space<vmem>>, vector<24x256xf32>
    tpu.vector_store %arg10[%c72_211, %c0_212], %463 {strides = array<i32>} : memref<168x256xf32, #tpu.memory_space<vmem>>, vector<24x256xf32>,
    %cst_213 = arith.constant 3.000000e+00 : f32
    %465 = vector.broadcast %cst_213 : f32 to vector<24x256xf32>
    %466 = arith.cmpf oeq, %402, %465 : vector<24x256xf32>
    %cst_214 = arith.constant 4.000000e+00 : f32
    %467 = vector.broadcast %cst_214 : f32 to vector<24x256xf32>
    %468 = arith.cmpf oeq, %402, %467 : vector<24x256xf32>
    %cst_215 = arith.constant 5.000000e+00 : f32
    %469 = vector.broadcast %cst_215 : f32 to vector<24x256xf32>
    %470 = arith.cmpf oeq, %402, %469 : vector<24x256xf32>
    %cst_216 = arith.constant 6.000000e+00 : f32
    %471 = vector.broadcast %cst_216 : f32 to vector<24x256xf32>
    %472 = arith.cmpf oeq, %402, %471 : vector<24x256xf32>
    %cst_217 = arith.constant 0.000000e+00 : f32
    %473 = vector.broadcast %cst_217 : f32 to vector<24x256xf32>
    %474 = arith.select %472, %418, %473 : vector<24x256xi1>, vector<24x256xf32>
    %475 = arith.select %470, %412, %474 : vector<24x256xi1>, vector<24x256xf32>
    %476 = arith.select %468, %422, %475 : vector<24x256xi1>, vector<24x256xf32>
    %477 = arith.select %466, %407, %476 : vector<24x256xi1>, vector<24x256xf32>
    %c96_218 = arith.constant 96 : index
    %c0_219 = arith.constant 0 : index
    %478 = vector.load %arg10[%c96_218, %c0_219] : memref<168x256xf32, #tpu.memory_space<vmem>>, vector<24x256xf32>
    tpu.vector_store %arg10[%c96_218, %c0_219], %477 {strides = array<i32>} : memref<168x256xf32, #tpu.memory_space<vmem>>, vector<24x256xf32>,
    %cst_220 = arith.constant 4.000000e+00 : f32
    %479 = vector.broadcast %cst_220 : f32 to vector<24x256xf32>
    %480 = arith.cmpf oeq, %402, %479 : vector<24x256xf32>
    %cst_221 = arith.constant 5.000000e+00 : f32
    %481 = vector.broadcast %cst_221 : f32 to vector<24x256xf32>
    %482 = arith.cmpf oeq, %402, %481 : vector<24x256xf32>
    %cst_222 = arith.constant 6.000000e+00 : f32
    %483 = vector.broadcast %cst_222 : f32 to vector<24x256xf32>
    %484 = arith.cmpf oeq, %402, %483 : vector<24x256xf32>
    %cst_223 = arith.constant 7.000000e+00 : f32
    %485 = vector.broadcast %cst_223 : f32 to vector<24x256xf32>
    %486 = arith.cmpf oeq, %402, %485 : vector<24x256xf32>
    %cst_224 = arith.constant 0.000000e+00 : f32
    %487 = vector.broadcast %cst_224 : f32 to vector<24x256xf32>
    %488 = arith.select %486, %418, %487 : vector<24x256xi1>, vector<24x256xf32>
    %489 = arith.select %484, %412, %488 : vector<24x256xi1>, vector<24x256xf32>
    %490 = arith.select %482, %422, %489 : vector<24x256xi1>, vector<24x256xf32>
    %491 = arith.select %480, %407, %490 : vector<24x256xi1>, vector<24x256xf32>
    %c120_225 = arith.constant 120 : index
    %c0_226 = arith.constant 0 : index
    %492 = vector.load %arg10[%c120_225, %c0_226] : memref<168x256xf32, #tpu.memory_space<vmem>>, vector<24x256xf32>
    tpu.vector_store %arg10[%c120_225, %c0_226], %491 {strides = array<i32>} : memref<168x256xf32, #tpu.memory_space<vmem>>, vector<24x256xf32>,
    %cst_227 = arith.constant 5.000000e+00 : f32
    %493 = vector.broadcast %cst_227 : f32 to vector<24x256xf32>
    %494 = arith.cmpf oeq, %402, %493 : vector<24x256xf32>
    %cst_228 = arith.constant 6.000000e+00 : f32
    %495 = vector.broadcast %cst_228 : f32 to vector<24x256xf32>
    %496 = arith.cmpf oeq, %402, %495 : vector<24x256xf32>
    %cst_229 = arith.constant 7.000000e+00 : f32
    %497 = vector.broadcast %cst_229 : f32 to vector<24x256xf32>
    %498 = arith.cmpf oeq, %402, %497 : vector<24x256xf32>
    %cst_230 = arith.constant 8.000000e+00 : f32
    %499 = vector.broadcast %cst_230 : f32 to vector<24x256xf32>
    %500 = arith.cmpf oeq, %402, %499 : vector<24x256xf32>
    %cst_231 = arith.constant 0.000000e+00 : f32
    %501 = vector.broadcast %cst_231 : f32 to vector<24x256xf32>
    %502 = arith.select %500, %418, %501 : vector<24x256xi1>, vector<24x256xf32>
    %503 = arith.select %498, %412, %502 : vector<24x256xi1>, vector<24x256xf32>
    %504 = arith.select %496, %422, %503 : vector<24x256xi1>, vector<24x256xf32>
    %505 = arith.select %494, %407, %504 : vector<24x256xi1>, vector<24x256xf32>
    %c144_232 = arith.constant 144 : index
    %c0_233 = arith.constant 0 : index
    %506 = vector.load %arg10[%c144_232, %c0_233] : memref<168x256xf32, #tpu.memory_space<vmem>>, vector<24x256xf32>
    tpu.vector_store %arg10[%c144_232, %c0_233], %505 {strides = array<i32>} : memref<168x256xf32, #tpu.memory_space<vmem>>, vector<24x256xf32>,
    %c0_234 = arith.constant 0 : index
    %c0_235 = arith.constant 0 : index
    %507 = vector.load %arg6[%c0_234, %c0_235] : memref<16x168xf32, #tpu.memory_space<vmem>>, vector<16x168xf32>
    %c0_236 = arith.constant 0 : index
    %c0_237 = arith.constant 0 : index
    %508 = vector.load %arg10[%c0_236, %c0_237] : memref<168x256xf32, #tpu.memory_space<vmem>>, vector<168x256xf32>
    %cst_238 = arith.constant dense<0.000000e+00> : vector<16x256xf32>
    %509 = tpu.matmul %507, %508, %cst_238 {dimension_numbers = #tpu.dot_dimension_numbers<[1], [0], [0], [1], [0, 0, 1, 1], [], []>} : vector<16x168xf32>, vector<168x256xf32>, vector<16x256xf32> -> vector<16x256xf32>
    %c0_239 = arith.constant 0 : index
    %c0_240 = arith.constant 0 : index
    %510 = vector.load %arg7[%c0_239, %c0_240] : memref<16x1xf32, #tpu.memory_space<vmem>>, vector<16x1xf32>
    %511 = vector.broadcast %510 : vector<16x1xf32> to vector<16x256xf32>
    %512 = arith.addf %509, %511 : vector<16x256xf32>
    %c0_241 = arith.constant 0 : index
    %c256_242 = arith.constant 256 : index
    %513 = vector.load %arg8[%c0_241, %c256_242] : memref<16x512xf32, #tpu.memory_space<vmem>>, vector<16x256xf32>
    tpu.vector_store %arg8[%c0_241, %c256_242], %512 {strides = array<i32>} : memref<16x512xf32, #tpu.memory_space<vmem>>, vector<16x256xf32>,
    return
  }
  func.func @transform_0(%arg0: i32) -> (i32, i32) {
    %c0_i32 = arith.constant 0 : i32
    %c0_i32_0 = arith.constant 0 : i32
    return %c0_i32, %arg0 : i32, i32
  }
  func.func @transform_1(%arg0: i32) -> (i32, i32) {
    %c0_i32 = arith.constant 0 : i32
    %c0_i32_0 = arith.constant 0 : i32
    %c0_i32_1 = arith.constant 0 : i32
    return %c0_i32, %c0_i32_0 : i32, i32
  }
  func.func @transform_2(%arg0: i32) -> (i32, i32) {
    %c0_i32 = arith.constant 0 : i32
    %c0_i32_0 = arith.constant 0 : i32
    %c0_i32_1 = arith.constant 0 : i32
    return %c0_i32, %c0_i32_0 : i32, i32
  }
  func.func @transform_3(%arg0: i32) -> (i32, i32) {
    %c0_i32 = arith.constant 0 : i32
    %c0_i32_0 = arith.constant 0 : i32
    %c0_i32_1 = arith.constant 0 : i32
    return %c0_i32, %c0_i32_0 : i32, i32
  }
  func.func @transform_4(%arg0: i32) -> (i32, i32) {
    %c0_i32 = arith.constant 0 : i32
    %c0_i32_0 = arith.constant 0 : i32
    %c0_i32_1 = arith.constant 0 : i32
    return %c0_i32, %c0_i32_0 : i32, i32
  }
  func.func @transform_5(%arg0: i32) -> (i32, i32) {
    %c0_i32 = arith.constant 0 : i32
    %c0_i32_0 = arith.constant 0 : i32
    %c0_i32_1 = arith.constant 0 : i32
    return %c0_i32, %c0_i32_0 : i32, i32
  }
  func.func @transform_6(%arg0: i32) -> (i32, i32) {
    %c0_i32 = arith.constant 0 : i32
    %c0_i32_0 = arith.constant 0 : i32
    %c0_i32_1 = arith.constant 0 : i32
    return %c0_i32, %c0_i32_0 : i32, i32
  }
  func.func @transform_7(%arg0: i32) -> (i32, i32) {
    %c0_i32 = arith.constant 0 : i32
    %c0_i32_0 = arith.constant 0 : i32
    return %c0_i32, %arg0 : i32, i32
  }
}

</mosaic_0001>

<bundles_post_ra>
// kernel: embedder_forward.1
= control target key start
LH: loop header
LB: loop body
LE: loop exit
PB: predicated region body
PF: predicated region fallthrough
CT: control target
= control target key end

     0   :  { %s2577_s24 = smov 0   ;;  %s2579_s25 = smov 0   ;;  %s4833_s0 = inlined_call_operand.vmem [shape: f32[16,2048], index: 0, kind: input, shape index: {}]   ;;  %s4834_s1 = inlined_call_operand.vmem [shape: f32[24,112], index: 1, kind: input, shape index: {}]   ;;  %s4835_s2 = inlined_call_operand.vmem [shape: f32[24,1], index: 2, kind: input, shape index: {}]   ;;  %s4836_s3 = inlined_call_operand.vmem [shape: f32[4,1], index: 3, kind: input, shape index: {}]   ;;  %s4837_s4 = inlined_call_operand.vmem [shape: f32[4,1], index: 4, kind: input, shape index: {}]   ;;  %s4838_s5 = inlined_call_operand.vmem [shape: f32[16,168], index: 5, kind: input, shape index: {}]   ;;  %s4839_s6 = inlined_call_operand.vmem [shape: f32[16,1], index: 6, kind: input, shape index: {}]   ;;  %s4840_s7 = inlined_call_operand.vmem [shape: f32[16,2048], index: 7, kind: output, shape index: {}]  }
   0x1   :  { %s2581_s26 = smov 0  }
   0x2 LB: > { %s2333_s27 = sadd.s32 4294967295, %s2533_s26   ;;  %s2594_s28 = sadd.s32 1, %s2533_s26   ;;  %s2533_s26 = sphi %s2581_s26, %s5064_s26   ;;  %s2529_s25 = sphi %s2579_s25, %s5063_s25   ;;  %s2525_s24 = sphi %s2577_s24, %s5062_s24  }
   0x3   : > { %s21_s29 = ssub.s32 %s2533_s26, %s2594_s28  ;;  %s24_s30 = sadd.s32 1, %s2529_s25 }
   0x4   : > { %p22_p0 = scmp.eq.s32.totalorder %s21_s29, 0  ;;  %p31_p1 = scmp.ne.s32.totalorder %s2529_s25, %s2525_s24 }
   0x5   : > { %p32_p2 = scmp.eq.s32.totalorder %s2533_s26, 0  ;;  %p187_p3 = scmp.eq.s32.totalorder %s2333_s27, 3 }
   0x6   : > { %s2605_s8 = scalar_select %p22_p0, %s2529_s25, %s24_s30  }
   0x7   : > { %p33_p4 = por %p32_p2, %p31_p1  ;;  %p2607_p5 = por %p187_p3, %p31_p1 }
   0x8   : > { %p2336_p6 = scmp.ge.s32.totalorder %s2533_s26, 4 }
   0xa   : > { %227 = sbr.rel (%p2336_p6) target bundleno = 23 (0x17), region = 40 }
   0xf   : > { %230 = sbr.rel (!%p33_p4) target bundleno = 23 (0x17), region = 44  ;;  %s232_s10 = sand.u32 (%p33_p4), 1, %s2529_s25  }
  0x10   : > { %s2398_s11 = sshll.u32 (%p33_p4), %s2533_s26, 5  ;;  %s2337_s12 = sshll.u32 (%p33_p4), %s232_s10, 6 }
  0x11   : > { %s237_s15 = scalar_lea.vmem (%p33_p4), %s4833_s0, %s2398_s11  ;;  %s234_s16 = scalar_lea.vmem (%p33_p4), [#allocation4], %s2337_s12 }
  0x12   : > { %v250_v0 = vld [vmem:[%s237_s15] sm:$0xff] (%p33_p4)  ;;  %v252_v1 = vld [vmem:[%s237_s15 + $0x8] sm:$0xff] (%p33_p4)  ;;  %v254_v2 = vld [vmem:[%s237_s15 + $0x10] sm:$0xff] (%p33_p4) }
  0x13   : > { %251 = vst [vmem:[%s234_s16] sm:$0xff] (%p33_p4), %v250_v0  ;;  %253 = vst [vmem:[%s234_s16 + $0x8] sm:$0xff] (%p33_p4), %v252_v1  ;;  %v256_v3 = vld [vmem:[%s237_s15 + $0x18] sm:$0xff] (%p33_p4)  ;;  %v258_v4 = vld [vmem:[%s237_s15 + $0x80] sm:$0xff] (%p33_p4) }
  0x14   : > { %255 = vst [vmem:[%s234_s16 + $0x10] sm:$0xff] %v254_v2  ;;  %v260_v5 = vld [vmem:[%s237_s15 + $0x88] sm:$0xff]  ;;  %257 = vst [vmem:[%s234_s16 + $0x18] sm:$0xff] %v256_v3  ;;  %v262_v6 = vld [vmem:[%s237_s15 + $0x90] sm:$0xff] }
  0x15   : > { %259 = vst [vmem:[%s234_s16 + $0x20] sm:$0xff] %v258_v4  ;;  %261 = vst [vmem:[%s234_s16 + $0x28] sm:$0xff] %v260_v5  ;;  %v264_v7 = vld [vmem:[%s237_s15 + $0x98] sm:$0xff] }
  0x16   : > { %263 = vst [vmem:[%s234_s16 + $0x30] sm:$0xff] %v262_v6  ;;  %265 = vst [vmem:[%s234_s16 + $0x38] sm:$0xff] %v264_v7 }
  0x17 PF: > { %p2340_p7 = scmp.ge.s32.totalorder %s2533_s26, 1  ;;  %p270_p8 = scmp.lt.s32.totalorder %s2533_s26, 5 }
  0x19   : > { %p271_p9 = pnand %p2340_p7, %p270_p8 }
  0x1b   : > { %274 = sbr.rel (%p271_p9) target bundleno = 714 (0x2ca), region = 67 }
  0x20   : > { %s277_s17 = sand.u32 1, %s2525_s24   ;;  %v2535_v8 = vmov 0.0  }
  0x21   : > { %s2620_s18 = sshll.u32 %s277_s17, 6  ;;  %692 = vmatprep.mubr.f32.mxu0 %v2535_v8 }
  0x22   : > { %s2624_s19 = scalar_lea.vmem [#allocation4], %s2620_s18  ;;  %s4798_s23 = scalar_lea.vmem [#allocation5], %s2620_s18 }
  0x23   : > { %v2627_v9 = vld [vmem:[%s2624_s19 + $0x28] sm:$0xff]  ;;  %v2630_v10 = vld [vmem:[%s2624_s19 + $0x20] sm:$0xff]  ;;  %v2645_v19 = vld [vmem:[%s2624_s19 + $0x38] sm:$0xff]  ;;  %s2399_s18 = sshll.u32 (%p2607_p5), %s2333_s27, 5 }
  0x24   : > { %v2633_v11 = vld [vmem:[%s2624_s19 + $0x8] sm:$0xff]  ;;  %v2350_v12 = vadd.f32 3.0, %v2627_v9  ;;  %v2349_v13 = vadd.f32 3.0, %v2630_v10  ;;  %v2639_v15 = vld [vmem:[%s2624_s19] sm:$0xff]  ;;  %v2346_v16 = vmul.f32 -1.442695, %v2627_v9  ;;  %s2245_s30 = scalar_lea.vmem (%p2607_p5), %s4840_s7, %s2399_s18 }
  0x25   : > { %v2348_v14 = vadd.f32 3.0, %v2633_v11  ;;  %v2347_v17 = vadd.f32 3.0, %v2639_v15  ;;  %v2345_v18 = vmul.f32 -1.442695, %v2630_v10  ;;  %v2344_v23 = vmul.f32 -1.442695, %v2633_v11 }
  0x26   : > { %v352_v20 = vmul.f32 1.5, %v2350_v12  ;;  %v351_v21 = vmul.f32 1.5, %v2349_v13  ;;  %v2343_v25 = vmul.f32 -1.442695, %v2639_v15  ;;  %v2375_v26 = vadd.f32 3.0, %v2645_v19  ;;  %v2657_v30 = vld [vmem:[%s2624_s19 + $0x30] sm:$0xff] }
  0x27   : > { %v350_v22 = vmul.f32 1.5, %v2348_v14  ;;  %v349_v24 = vmul.f32 1.5, %v2347_v17  ;;  %2428 = vpow2.f32 %v2346_v16  ;;  %v2667_v37 = vadd.f32 3.0, %v2657_v30 }
  0x28   : > { %v2650_v27 = vfloor.f32 %v352_v20  ;;  %v2652_v28 = vfloor.f32 %v351_v21  ;;  %2430 = vpow2.f32 %v2345_v18  ;;  %v2663_v34 = vmul.f32 1.5, %v2375_v26 }
  0x29   : > { %v2654_v29 = vfloor.f32 %v350_v22  ;;  %2432 = vpow2.f32 %v2344_v23  ;;  %v2661_v33 = vfloor.f32 %v349_v24 }
  0x2a   : > { %v360_v31 = vsub.f32 %v352_v20, %v2650_v27  ;;  %v359_v32 = vsub.f32 %v351_v21, %v2652_v28  ;;  %2434 = vpow2.f32 %v2343_v25  ;;  %vm476_vm0 = vcmp.eq.f32.partialorder %v2650_v27, 5.0 }
  0x2b   : > { %vm500_vm1 = vcmp.eq.f32.partialorder %v2650_v27, 6.0  ;;  %v358_v40 = vsub.f32 %v350_v22, %v2654_v29  ;;  %vm524_vm2 = vcmp.eq.f32.partialorder %v2650_v27, 7.0  ;;  %vm548_vm3 = vcmp.eq.f32.partialorder %v2650_v27, 8.0 }
  0x2c   : > { %v364_v35 = vmul.f32 %v360_v31, %v360_v31  ;;  %v388_v36 = vsub.f32 1.0, %v360_v31  ;;  %v363_v38 = vmul.f32 %v359_v32, %v359_v32  ;;  %v387_v39 = vsub.f32 1.0, %v359_v32 }
  0x2d   : > { %v362_v45 = vmul.f32 %v358_v40, %v358_v40  ;;  %v386_v46 = vsub.f32 1.0, %v358_v40  ;;  %vm499_vm4 = vcmp.eq.f32.partialorder %v2652_v28, 6.0  ;;  %vm523_vm5 = vcmp.eq.f32.partialorder %v2652_v28, 7.0 }
  0x2e   : > { %v368_v41 = vmul.f32 %v364_v35, %v360_v31  ;;  %v392_v42 = vmul.f32 %v388_v36, %v388_v36  ;;  %v367_v43 = vmul.f32 %v363_v38, %v359_v32  ;;  %v391_v44 = vmul.f32 %v387_v39, %v387_v39 }
  0x2f   : > { %vm547_vm6 = vcmp.eq.f32.partialorder %v2652_v28, 8.0  ;;  %vm475_vm7 = vcmp.eq.f32.partialorder %v2652_v28, 5.0  ;;  %v366_v52 = vmul.f32 %v362_v45, %v358_v40  ;;  %vm522_vm8 = vcmp.eq.f32.partialorder %v2654_v29, 7.0 }
  0x30   : > { %v376_v47 = vmul.f32 0.5, %v368_v41  ;;  %v396_v48 = vmul.f32 %v392_v42, %v388_v36  ;;  %v2676_v49 = vmul.f32 0.16666667, %v368_v41  ;;  %v375_v50 = vmul.f32 0.5, %v367_v43 }
  0x31   : > { %v395_v51 = vmul.f32 %v391_v44, %v387_v39  ;;  %v2682_v55 = vmul.f32 0.16666667, %v367_v43  ;;  %vm546_vm9 = vcmp.eq.f32.partialorder %v2654_v29, 8.0  ;;  %v374_v58 = vmul.f32 0.5, %v366_v52 }
  0x32   : > { %v380_v53 = vsub.f32 %v376_v47, %v364_v35  ;;  %v2680_v54 = vmul.f32 0.16666667, %v396_v48  ;;  %v379_v56 = vsub.f32 %v375_v50, %v363_v38  ;;  %v390_v59 = vmul.f32 %v386_v46, %v386_v46 }
  0x33   : > { %v2685_v57 = vmul.f32 0.16666667, %v395_v51  ;;  %v2690_v62 = vmul.f32 0.16666667, %v366_v52  ;;  %v357_v63 = vsub.f32 %v349_v24, %v2661_v33  ;;  %vm498_vm10 = vcmp.eq.f32.partialorder %v2654_v29, 6.0 }
  0x34   : > { %v2687_v60 = vadd.f32 0.6666667, %v380_v53  ;;  %v404_v61 = vsub.f32 1.0, %v2680_v54  ;;  %v2693_v0 = vpop.eup %2428  ;;  %v2698_v1 = vsel %vm476_vm0, %v2680_v54, 0.0  ;;  %v552_v2 = vsel %vm548_vm3, %v2680_v54, 0.0 }
  0x35   : > { %v2703_v3 = vadd.f32 0.6666667, %v379_v56  ;;  %v403_v4 = vsub.f32 1.0, %v2685_v57  ;;  %v2706_v5 = vpop.eup %2430  ;;  %v2712_v7 = vsel %vm500_vm1, %v2680_v54, 0.0  ;;  %v528_v12 = vsel %vm524_vm2, %v2680_v54, 0.0 }
  0x36   : > { %v408_v6 = vsub.f32 %v404_v61, %v2687_v60  ;;  %v556_v13 = vsel %vm524_vm2, %v2687_v60, %v552_v2  ;;  %v2721_v14 = vpop.eup %2432  ;;  %v551_v17 = vsel %vm547_vm6, %v2685_v57, 0.0  ;;  %v378_v18 = vsub.f32 %v374_v58, %v362_v45 }
  0x37   : > { %v407_v16 = vsub.f32 %v403_v4, %v2703_v3  ;;  %v394_v20 = vmul.f32 %v390_v59, %v386_v46  ;;  %vm474_vm11 = vcmp.eq.f32.partialorder %v2654_v29, 5.0  ;;  %v2728_v21 = vpop.eup %2434  ;;  %v555_v23 = vsel %vm523_vm5, %v2703_v3, %v551_v17 }
  0x38   : > { %v2731_v22 = vsub.f32 %v408_v6, %v2676_v49  ;;  %v361_v24 = vmul.f32 %v357_v63, %v357_v63  ;;  %v385_v25 = vsub.f32 1.0, %v357_v63  ;;  %v503_v31 = vsel %vm499_vm4, %v2685_v57, 0.0 }
  0x39   : > { %v2737_v26 = vsub.f32 %v407_v16, %v2682_v55  ;;  %v2742_v32 = vadd.f32 0.6666667, %v378_v18  ;;  %v2744_v35 = vmul.f32 0.16666667, %v394_v20  ;;  %v527_v38 = vsel %vm523_vm5, %v2685_v57, 0.0 }
  0x3a   : > { %v560_v36 = vsel %vm500_vm1, %v2731_v22, %v556_v13  ;;  %v365_v39 = vmul.f32 %v361_v24, %v357_v63  ;;  %v389_v40 = vmul.f32 %v385_v25, %v385_v25  ;;  %vm497_vm12 = vcmp.eq.f32.partialorder %v2661_v33, 6.0 }
  0x3b   : > { %v564_v41 = vsel %vm476_vm0, %v2676_v49, %v560_v36  ;;  %v559_v42 = vsel %vm499_vm4, %v2737_v26, %v555_v23  ;;  %v402_v43 = vsub.f32 1.0, %v2744_v35  ;;  %v550_v44 = vsel %vm546_vm9, %v2744_v35, 0.0 }
  0x3c   : > { %632 = vmatprep.subr.mxu0 %v564_v41  ;;  %v563_v45 = vsel %vm475_vm7, %v2682_v55, %v559_v42  ;;  %v554_v46 = vsel %vm522_vm8, %v2742_v32, %v550_v44  ;;  %v2769_v47 = vmul.f32 0.16666667, %v365_v39  ;;  %v373_v48 = vmul.f32 0.5, %v365_v39 }
  0x3d   : > { %633 = vmatpush1.msra.mxu0 %v563_v45  ;;  %v406_v50 = vsub.f32 %v402_v43, %v2742_v32  ;;  %v393_v51 = vmul.f32 %v389_v40, %v385_v25  ;;  %vm473_vm13 = vcmp.eq.f32.partialorder %v2661_v33, 5.0  ;;  %vm521_vm14 = vcmp.eq.f32.partialorder %v2661_v33, 7.0 }
  0x3e   : > { %vm545_vm15 = vcmp.eq.f32.partialorder %v2661_v33, 8.0  ;;  %v377_v52 = vsub.f32 %v373_v48, %v361_v24  ;;  %vm452_vm2 = vcmp.eq.f32.partialorder %v2650_v27, 4.0  ;;  %v532_v53 = vsel %vm500_vm1, %v2687_v60, %v528_v12 }
  0x3f   : > { %vm451_vm3 = vcmp.eq.f32.partialorder %v2652_v28, 4.0  ;;  %v2781_v56 = vsub.f32 %v406_v50, %v2690_v62  ;;  %v2783_v58 = vmul.f32 0.16666667, %v393_v51  ;;  %v536_v59 = vsel %vm476_vm0, %v2731_v22, %v532_v53 }
  0x40   : > { %v531_v61 = vsel %vm499_vm4, %v2703_v3, %v527_v38  ;;  %v2791_v63 = vadd.f32 0.6666667, %v377_v52  ;;  %v540_v2 = vsel %vm452_vm2, %v2676_v49, %v536_v59  ;;  %vm450_vm1 = vcmp.eq.f32.partialorder %v2654_v29, 4.0 }
  0x41   : > { %v535_v4 = vsel %vm475_vm7, %v2737_v26, %v531_v61  ;;  %v558_v6 = vsel %vm498_vm10, %v2781_v56, %v554_v46  ;;  %v401_v12 = vsub.f32 1.0, %v2783_v58  ;;  %v549_v13 = vsel %vm545_vm15, %v2783_v58, 0.0 }
  0x42   : > { %v539_v16 = vsel %vm451_vm3, %v2682_v55, %v535_v4  ;;  %v562_v17 = vsel %vm474_vm11, %v2690_v62, %v558_v6  ;;  %v553_v18 = vsel %vm521_vm14, %v2791_v63, %v549_v13  ;;  %v526_v20 = vsel %vm522_vm8, %v2744_v35, 0.0 }
  0x43   : > { %vm449_vm4 = vcmp.eq.f32.partialorder %v2661_v33, 4.0  ;;  %634 = vmatprep.subr.mxu0 %v562_v17  ;;  %v405_v23 = vsub.f32 %v401_v12, %v2791_v63  ;;  %v530_v24 = vsel %vm498_vm10, %v2742_v32, %v526_v20  ;;  %v525_v25 = vsel %vm521_vm14, %v2783_v58, 0.0 }
  0x44   : > { %vm428_vm5 = vcmp.eq.f32.partialorder %v2650_v27, 3.0  ;;  %v534_v36 = vsel %vm474_vm11, %v2781_v56, %v530_v24  ;;  %v529_v38 = vsel %vm497_vm12, %v2791_v63, %v525_v25  ;;  %v508_v39 = vsel %vm476_vm0, %v2687_v60, %v2712_v7 }
  0x45   : > { %vm427_vm6 = vcmp.eq.f32.partialorder %v2652_v28, 3.0  ;;  %v2838_v40 = vsub.f32 %v405_v23, %v2769_v47  ;;  %v538_v41 = vsel %vm450_vm1, %v2690_v62, %v534_v36  ;;  %v512_v42 = vsel %vm452_vm2, %v2731_v22, %v508_v39 }
  0x46   : > { %v507_v43 = vsel %vm475_vm7, %v2703_v3, %v503_v31  ;;  %v516_v7 = vsel %vm428_vm5, %v2676_v49, %v512_v42  ;;  %vm426_vm0 = vcmp.eq.f32.partialorder %v2654_v29, 3.0  ;;  %v502_v45 = vsel %vm498_vm10, %v2744_v35, 0.0 }
  0x47   : > { %v511_v44 = vsel %vm451_vm3, %v2737_v26, %v507_v43  ;;  %v557_v46 = vsel %vm497_vm12, %v2838_v40, %v553_v18  ;;  %v533_v31 = vsel %vm473_vm13, %v2838_v40, %v529_v38  ;;  %v506_v50 = vsel %vm474_vm11, %v2742_v32, %v502_v45 }
  0x48   : > { %v515_v48 = vsel %vm427_vm6, %v2682_v55, %v511_v44  ;;  %v561_v51 = vsel %vm473_vm13, %v2769_v47, %v557_v46  ;;  %v537_v52 = vsel %vm449_vm4, %v2769_v47, %v533_v31  ;;  %v510_v53 = vsel %vm450_vm1, %v2781_v56, %v506_v50 }
  0x49   : > { %vm425_vm8 = vcmp.eq.f32.partialorder %v2661_v33, 3.0  ;;  %635 = vmatpush1.msra.mxu0 %v561_v51  ;;  %v514_v59 = vsel %vm426_vm0, %v2690_v62, %v510_v53  ;;  %v501_v61 = vsel %vm497_vm12, %v2783_v58, 0.0  ;;  %vm424_vm9 = vcmp.eq.f32.partialorder %v2650_v27, 2.0 }
  0x4a   : > { %v484_v4 = vsel %vm452_vm2, %v2687_v60, %v2698_v1  ;;  %636 = vmatprep.subr.mxu0 %v540_v2  ;;  %v505_v6 = vsel %vm473_vm13, %v2791_v63, %v501_v61  ;;  %vm423_vm10 = vcmp.eq.f32.partialorder %v2652_v28, 2.0  ;;  %v479_v13 = vsel %vm475_vm7, %v2685_v57, 0.0 }
  0x4b   : > { %v488_v12 = vsel %vm428_vm5, %v2731_v22, %v484_v4  ;;  %637 = vmatpush1.msra.mxu0 %v539_v16  ;;  %v509_v1 = vsel %vm449_vm4, %v2838_v40, %v505_v6  ;;  %v483_v17 = vsel %vm451_vm3, %v2703_v3, %v479_v13  ;;  %vm422_vm12 = vcmp.eq.f32.partialorder %v2654_v29, 2.0 }
  0x4c   : > { %v492_v2 = vsel %vm424_vm9, %v2676_v49, %v488_v12  ;;  %638 = vmatprep.subr.mxu0 %v538_v41  ;;  %v513_v18 = vsel %vm425_vm8, %v2769_v47, %v509_v1  ;;  %v487_v16 = vsel %vm427_vm6, %v2737_v26, %v483_v17  ;;  %v478_v20 = vsel %vm474_vm11, %v2744_v35, 0.0 }
  0x4d   : > { %vm421_vm7 = vcmp.eq.f32.partialorder %v2661_v33, 2.0  ;;  %639 = vmatpush1.msra.mxu0 %v537_v52  ;;  %v491_v23 = vsel %vm423_vm10, %v2682_v55, %v487_v16  ;;  %v482_v24 = vsel %vm450_vm1, %v2742_v32, %v478_v20  ;;  %v477_v25 = vsel %vm473_vm13, %v2783_v58, 0.0  ;;  %v3048_v16 = vld [vmem:[%s2624_s19 + $0x10] sm:$0xff] }
  0x4e   : > { %vm420_vm14 = vcmp.eq.f32.partialorder %v2650_v27, 1.0  ;;  %640 = vmatprep.subr.mxu0 %v516_v7  ;;  %v486_v36 = vsel %vm426_vm0, %v2781_v56, %v482_v24  ;;  %v481_v38 = vsel %vm449_vm4, %v2791_v63, %v477_v25  ;;  %v456_v39 = vsel %vm452_vm2, %v2680_v54, 0.0 }
  0x4f   : > { %vm419_vm11 = vcmp.eq.f32.partialorder %v2652_v28, 1.0  ;;  %641 = vmatpush1.msra.mxu0 %v515_v48  ;;  %v490_v41 = vsel %vm422_vm12, %v2690_v62, %v486_v36  ;;  %v485_v42 = vsel %vm425_vm8, %v2838_v40, %v481_v38  ;;  %v460_v43 = vsel %vm428_vm5, %v2687_v60, %v456_v39 }
  0x50   : > { %v455_v7 = vsel %vm451_vm3, %v2685_v57, 0.0  ;;  %642 = vmatprep.subr.mxu0 %v514_v59  ;;  %v489_v44 = vsel %vm421_vm7, %v2769_v47, %v485_v42  ;;  %v464_v45 = vsel %vm424_vm9, %v2731_v22, %v460_v43  ;;  %vm418_vm13 = vcmp.eq.f32.partialorder %v2654_v29, 1.0 }
  0x51   : > { %v459_v46 = vsel %vm427_vm6, %v2703_v3, %v455_v7  ;;  %643 = vmatpush1.msra.mxu0 %v513_v18  ;;  %v468_v31 = vsel %vm420_vm14, %v2676_v49, %v464_v45  ;;  %v454_v50 = vsel %vm450_vm1, %v2744_v35, 0.0  ;;  %vm417_vm15 = vcmp.eq.f32.partialorder %v2661_v33, 1.0 }
  0x52   : > { %v463_v48 = vsel %vm423_vm10, %v2737_v26, %v459_v46  ;;  %644 = vmatprep.subr.mxu0 %v492_v2  ;;  %v458_v52 = vsel %vm426_vm0, %v2742_v32, %v454_v50  ;;  %v453_v53 = vsel %vm449_vm4, %v2783_v58, 0.0  ;;  %vm416_vm2 = vcmp.eq.f32.partialorder %v2650_v27, 0.0 }
  0x53   : > { %v467_v51 = vsel %vm419_vm11, %v2682_v55, %v463_v48  ;;  %645 = vmatpush1.msra.mxu0 %v491_v23  ;;  %v462_v59 = vsel %vm422_vm12, %v2781_v56, %v458_v52  ;;  %v457_v61 = vsel %vm425_vm8, %v2791_v63, %v453_v53  ;;  %v432_v4 = vsel %vm428_vm5, %v2680_v54, 0.0 }
  0x54   : > { %vm415_vm3 = vcmp.eq.f32.partialorder %v2652_v28, 0.0  ;;  %646 = vmatprep.subr.mxu0 %v490_v41  ;;  %v466_v6 = vsel %vm418_vm13, %v2690_v62, %v462_v59  ;;  %v461_v12 = vsel %vm421_vm7, %v2838_v40, %v457_v61  ;;  %v436_v13 = vsel %vm424_vm9, %v2687_v60, %v432_v4 }
  0x55   : > { %v431_v1 = vsel %vm427_vm6, %v2685_v57, 0.0  ;;  %647 = vmatpush1.msra.mxu0 %v489_v44  ;;  %v465_v54 = vsel %vm417_vm15, %v2769_v47, %v461_v12  ;;  %v440_v2 = vsel %vm420_vm14, %v2731_v22, %v436_v13  ;;  %vm414_vm1 = vcmp.eq.f32.partialorder %v2654_v29, 0.0 }
  0x56   : > { %v435_v17 = vsel %vm423_vm10, %v2703_v3, %v431_v1  ;;  %648 = vmatprep.subr.mxu0 %v468_v31  ;;  %v444_v57 = vsel %vm416_vm2, %v2676_v49, %v440_v2  ;;  %v430_v22 = vsel %vm426_vm0, %v2744_v35, 0.0  ;;  %vm413_vm4 = vcmp.eq.f32.partialorder %v2661_v33, 0.0 }
  0x57   : > { %v439_v60 = vsel %vm419_vm11, %v2737_v26, %v435_v17  ;;  %649 = vmatpush1.msra.mxu0 %v467_v51  ;;  %v434_v27 = vsel %vm422_vm12, %v2742_v32, %v430_v22  ;;  %v429_v49 = vsel %vm425_vm8, %v2783_v58, 0.0  ;;  %v328_v26 = vadd.f32 1.0, %v2693_v0  ;;  %v3045_v32 = vld [vmem:[%s2624_s19 + $0x18] sm:$0xff] }
  0x58   : > { %v443_v3 = vsel %vm415_vm3, %v2682_v55, %v439_v60  ;;  %650 = vmatprep.subr.mxu0 %v466_v6  ;;  %v438_v35 = vsel %vm418_vm13, %v2781_v56, %v434_v27  ;;  %v433_v28 = vsel %vm421_vm7, %v2791_v63, %v429_v49  ;;  %v327_v55 = vadd.f32 1.0, %v2706_v5 }
  0x59   : > { %v326_v18 = vadd.f32 1.0, %v2721_v14  ;;  %651 = vmatpush1.msra.mxu0 %v465_v54  ;;  %v442_v0 = vsel %vm414_vm1, %v2690_v62, %v438_v35  ;;  %v437_v56 = vsel %vm417_vm15, %v2838_v40, %v433_v28  ;;  %2436 = vrcp.f32 %v328_v26  ;;  %v3124_v28 = vld [vmem:[%s4834_s1] sm:$0xff] }
  0x5a   : > { %v325_v58 = vadd.f32 1.0, %v2728_v21  ;;  %652 = vmatprep.subr.mxu0 %v444_v57  ;;  %v441_v5 = vsel %vm413_vm4, %v2769_v47, %v437_v56  ;;  %2438 = vrcp.f32 %v327_v55  ;;  %v3061_v14 = vfloor.f32 %v2663_v34 }
  0x5b   : > { %v1316_v63 = vmul.f32 1.5, %v2667_v37  ;;  %653 = vmatpush1.msra.mxu0 %v443_v3  ;;  %2440 = vrcp.f32 %v326_v18  ;;  %v2373_v29 = vadd.f32 3.0, %v3045_v32  ;;  %v2372_v62 = vadd.f32 3.0, %v3048_v16 }
  0x5c   : > { %654 = vmatprep.subr.mxu0 %v442_v0  ;;  %2442 = vrcp.f32 %v325_v58  ;;  %v1325_v21 = vsub.f32 %v2663_v34, %v3061_v14  ;;  %v3076_v38 = vmul.f32 -1.442695, %v2645_v19  ;;  %vm1465_vm5 = vcmp.eq.f32.partialorder %v3061_v14, 6.0 }
  0x5d   : > { %655 = vmatpush1.msra.mxu0 %v441_v5  ;;  %v3068_v33 = vfloor.f32 %v1316_v63  ;;  %v1315_v47 = vmul.f32 1.5, %v2373_v29  ;;  %v3071_v37 = vmul.f32 1.5, %v2372_v62  ;;  %vm1489_vm6 = vcmp.eq.f32.partialorder %v3061_v14, 7.0 }
  0x5e   : > { %v1329_v40 = vmul.f32 %v1325_v21, %v1325_v21  ;;  %v1353_v20 = vsub.f32 1.0, %v1325_v21  ;;  %vm1513_vm0 = vcmp.eq.f32.partialorder %v3061_v14, 8.0  ;;  %vm618_vm8 = vcmask 916480  }
  0x5f   : > { %v1324_v23 = vsub.f32 %v1316_v63, %v3068_v33  ;;  %v3073_v36 = vfloor.f32 %v1315_v47  ;;  %vm1441_vm9 = vcmp.eq.f32.partialorder %v3061_v14, 5.0  ;;  %vm1488_vm10 = vcmp.eq.f32.partialorder %v3068_v33, 7.0 }
  0x60   : > { %v1333_v24 = vmul.f32 %v1329_v40, %v1325_v21  ;;  %v1357_v25 = vmul.f32 %v1353_v20, %v1353_v20  ;;  %vm1512_vm12 = vcmp.eq.f32.partialorder %v3068_v33, 8.0  ;;  %v3086_v44 = vfloor.f32 %v3071_v37 }
  0x61   : > { %v1328_v34 = vmul.f32 %v1324_v23, %v1324_v23  ;;  %v1352_v39 = vsub.f32 1.0, %v1324_v23  ;;  %v1323_v43 = vsub.f32 %v1315_v47, %v3073_v36  ;;  %vm1464_vm7 = vcmp.eq.f32.partialorder %v3068_v33, 6.0 }
  0x62   : > { %v1341_v41 = vmul.f32 0.5, %v1333_v24  ;;  %v1361_v42 = vmul.f32 %v1357_v25, %v1353_v20  ;;  %v3091_v50 = vmul.f32 0.16666667, %v1333_v24  ;;  %vm1440_vm14 = vcmp.eq.f32.partialorder %v3068_v33, 5.0 }
  0x63   : > { %v1332_v7 = vmul.f32 %v1328_v34, %v1324_v23  ;;  %v1356_v19 = vmul.f32 %v1352_v39, %v1352_v39  ;;  %v1327_v31 = vmul.f32 %v1323_v43, %v1323_v43  ;;  %v1351_v48 = vsub.f32 1.0, %v1323_v43 }
  0x64   : > { %v1345_v45 = vsub.f32 %v1341_v41, %v1329_v40  ;;  %v3088_v46 = vmul.f32 0.16666667, %v1361_v42  ;;  %vm1487_vm11 = vcmp.eq.f32.partialorder %v3073_v36, 7.0  ;;  %vm1463_vm13 = vcmp.eq.f32.partialorder %v3073_v36, 6.0 }
  0x65   : > { %v3093_v51 = vmul.f32 0.16666667, %v1332_v7  ;;  %v1340_v52 = vmul.f32 0.5, %v1332_v7  ;;  %v1360_v53 = vmul.f32 %v1356_v19, %v1352_v39  ;;  %v1331_v12 = vmul.f32 %v1327_v31, %v1323_v43  ;;  %v3168_v39 = vld [vmem:[%s4834_s1 + $0x8] sm:$0xff] }
  0x66   : > { %v2437_v59 = vpop.eup %2436  ;;  %v3096_v61 = vadd.f32 0.6666667, %v1345_v45  ;;  %v1369_v4 = vsub.f32 1.0, %v3088_v46  ;;  %v1517_v6 = vsel %vm1513_vm0, %v3088_v46, 0.0  ;;  %v1355_v17 = vmul.f32 %v1351_v48, %v1351_v48 }
  0x67   : > { %v2439_v13 = vpop.eup %2438  ;;  %v340_v1 = vmul.f32 %v2437_v59, %v2627_v9  ;;  %v1344_v54 = vsub.f32 %v1340_v52, %v1328_v34  ;;  %v3103_v2 = vmul.f32 0.16666667, %v1360_v53  ;;  %vm1417_vm15 = vcmp.eq.f32.partialorder %v3061_v14, 4.0 }
  0x68   : > { %v2441_v57 = vpop.eup %2440  ;;  %v339_v60 = vmul.f32 %v2439_v13, %v2630_v10  ;;  %v1373_v22 = vsub.f32 %v1369_v4, %v3096_v61  ;;  %v1521_v3 = vsel %vm1489_vm6, %v3096_v61, %v1517_v6  ;;  %v1339_v55 = vmul.f32 0.5, %v1331_v12  ;;  %v3208_v13 = vld [vmem:[%s4834_s1 + $0x10] sm:$0xff] }
  0x69   : > { %v2443_v27 = vpop.eup %2442  ;;  %656 = vmatprep.subr.mxu0 %v340_v1  ;;  %v338_v49 = vmul.f32 %v2441_v57, %v2633_v11  ;;  %v3112_v9 = vadd.f32 0.6666667, %v1344_v54  ;;  %v1368_v26 = vsub.f32 1.0, %v3103_v2  ;;  %v1516_v10 = vsel %vm1512_vm12, %v3103_v2, 0.0 }
  0x6a   : > { %657 = vmatpush1.msra.mxu0 %v339_v60  ;;  %v337_v35 = vmul.f32 %v2443_v27, %v2639_v15  ;;  %v3127_v11 = vsub.f32 %v1373_v22, %v3091_v50  ;;  %v1359_v18 = vmul.f32 %v1355_v17, %v1351_v48  ;;  %vm1439_vm2 = vcmp.eq.f32.partialorder %v3073_v36, 5.0 }
  0x6b   : > { %658 = vmatprep.subr.mxu0 %v338_v49  ;;  %v1372_v0 = vsub.f32 %v1368_v26, %v3112_v9  ;;  %v3131_v56 = vmul.f32 0.16666667, %v1331_v12  ;;  %vm1511_vm3 = vcmp.eq.f32.partialorder %v3073_v36, 8.0  ;;  %v1322_v15 = vsub.f32 %v3071_v37, %v3086_v44 }
  0x6c   : > { %vm1416_vm1 = vcmp.eq.f32.partialorder %v3068_v33, 4.0  ;;  %659 = vmatpush1.msra.mxu0 %v337_v35  ;;  %v1525_v58 = vsel %vm1465_vm5, %v3127_v11, %v1521_v3  ;;  %v1520_v5 = vsel %vm1488_vm10, %v3112_v9, %v1516_v10  ;;  %v1343_v63 = vsub.f32 %v1339_v55, %v1327_v31 }
  0x6d   : > { %v3143_v29 = vmul.f32 0.16666667, %v1359_v18  ;;  %2351 = vmatmul.mubr.msk.f32.vlgmr.msra.gmra.mxu0 %vm618_vm8, %v3124_v28  ;;  %v1529_v62 = vsel %vm1441_vm9, %v3091_v50, %v1525_v58  ;;  %v3151_v21 = vsub.f32 %v1372_v0, %v3093_v51  ;;  %v1326_v47 = vmul.f32 %v1322_v15, %v1322_v15 }
  0x6e   : > { %v1350_v40 = vsub.f32 1.0, %v1322_v15  ;;  %1596 = vmatprep.subr.mxu0 %v1529_v62  ;;  %v3153_v20 = vadd.f32 0.6666667, %v1343_v63  ;;  %698 = vmatprep.mubr.f32.mxu0 %v2535_v8  ;;  %vm1462_vm4 = vcmp.eq.f32.partialorder %v3086_v44, 6.0  ;;  %vm1486_vm0 = vcmp.eq.f32.partialorder %v3086_v44, 7.0 }
  0x6f   : > { %v1367_v23 = vsub.f32 1.0, %v3143_v29  ;;  %v1515_v37 = vsel %vm1511_vm3, %v3143_v29, 0.0  ;;  %v1524_v24 = vsel %vm1464_vm7, %v3151_v21, %v1520_v5  ;;  %v1330_v25 = vmul.f32 %v1326_v47, %v1322_v15 }
  0x70   : > { %v1354_v34 = vmul.f32 %v1350_v40, %v1350_v40  ;;  %v1528_v41 = vsel %vm1440_vm14, %v3093_v51, %v1524_v24  ;;  %v1519_v43 = vsel %vm1487_vm11, %v3153_v20, %v1515_v37  ;;  %vm1510_vm12 = vcmp.eq.f32.partialorder %v3086_v44, 8.0 }
  0x71   : > { %v1371_v42 = vsub.f32 %v1367_v23, %v3153_v20  ;;  %1597 = vmatpush1.msra.mxu0 %v1528_v41  ;;  %v3178_v7 = vmul.f32 0.16666667, %v1330_v25  ;;  %v1338_v19 = vmul.f32 0.5, %v1330_v25  ;;  %v1493_v31 = vsel %vm1489_vm6, %v3088_v46, 0.0 }
  0x72   : > { %v1358_v45 = vmul.f32 %v1354_v34, %v1350_v40  ;;  %2352 = vmatmul.mubr.msk.f32.gmra.mxu0 %vm618_vm8, %v3168_v39  ;;  %v1497_v52 = vsel %vm1465_vm5, %v3096_v61, %v1493_v31  ;;  %v1492_v53 = vsel %vm1488_vm10, %v3103_v2, 0.0  ;;  %vm1415_vm3 = vcmp.eq.f32.partialorder %v3073_v36, 4.0 }
  0x73   : > { %v3185_v48 = vsub.f32 %v1371_v42, %v3131_v56  ;;  %v1342_v59 = vsub.f32 %v1338_v19, %v1326_v47  ;;  %v1501_v6 = vsel %vm1441_vm9, %v3127_v11, %v1497_v52  ;;  %v1496_v12 = vsel %vm1464_vm7, %v3112_v9, %v1492_v53  ;;  %704 = vmatprep.mubr.f32.mxu0 %v2535_v8 }
  0x74   : > { %v3196_v4 = vmul.f32 0.16666667, %v1358_v45  ;;  %v1505_v54 = vsel %vm1417_vm15, %v3091_v50, %v1501_v6  ;;  %v1500_v17 = vsel %vm1440_vm14, %v3151_v21, %v1496_v12  ;;  %v1491_v57 = vsel %vm1487_vm11, %v3143_v29, 0.0 }
  0x75   : > { %v1523_v1 = vsel %vm1463_vm13, %v3185_v48, %v1519_v43  ;;  %v3225_v22 = vadd.f32 0.6666667, %v1342_v59  ;;  %v1504_v49 = vsel %vm1416_vm1, %v3093_v51, %v1500_v17  ;;  %v1495_v26 = vsel %vm1463_vm13, %v3153_v20, %v1491_v57 }
  0x76   : > { %v1527_v60 = vsel %vm1439_vm2, %v3131_v56, %v1523_v1  ;;  %v1366_v3 = vsub.f32 1.0, %v3196_v4  ;;  %v1514_v27 = vsel %vm1510_vm12, %v3196_v4, 0.0  ;;  %vm1414_vm6 = vcmp.eq.f32.partialorder %v3086_v44, 4.0  ;;  %2353 = vmatmul.mubr.msk.f32.gmra.mxu0 %vm618_vm8, %v3208_v13 }
  0x77   : > { %1598 = vmatprep.subr.mxu0 %v1527_v60  ;;  %v1490_v10 = vsel %vm1486_vm0, %v3196_v4, 0.0  ;;  %v1518_v55 = vsel %vm1486_vm0, %v3225_v22, %v1514_v27  ;;  %v1499_v18 = vsel %vm1439_vm2, %v3185_v48, %v1495_v26  ;;  %1656 = vmatprep.mubr.f32.mxu0 %v2535_v8  ;;  %vm1393_vm10 = vcmp.eq.f32.partialorder %v3061_v14, 3.0 }
  0x78   : > { %v1370_v35 = vsub.f32 %v1366_v3, %v3225_v22  ;;  %v1494_v0 = vsel %vm1462_vm4, %v3225_v22, %v1490_v10  ;;  %v1503_v15 = vsel %vm1415_vm3, %v3131_v56, %v1499_v18  ;;  %v1469_v58 = vsel %vm1465_vm5, %v3088_v46, 0.0 }
  0x79   : > { %vm1392_vm11 = vcmp.eq.f32.partialorder %v3068_v33, 3.0  ;;  %v1473_v63 = vsel %vm1441_vm9, %v3096_v61, %v1469_v58  ;;  %v1468_v62 = vsel %vm1464_vm7, %v3103_v2, 0.0  ;;  %vm1391_vm0 = vcmp.eq.f32.partialorder %v3073_v36, 3.0 }
  0x7a   : > { %v3263_v5 = vsub.f32 %v1370_v35, %v3178_v7  ;;  %v1477_v47 = vsel %vm1417_vm15, %v3127_v11, %v1473_v63  ;;  %v1472_v40 = vsel %vm1440_vm14, %v3112_v9, %v1468_v62  ;;  %v1467_v23 = vsel %vm1463_vm13, %v3143_v29, 0.0 }
  0x7b   : > { %vm1390_vm5 = vcmp.eq.f32.partialorder %v3086_v44, 3.0  ;;  %vm4926_vm7 = vcmp.eq.f32.partialorder %v3086_v44, 5.0  ;;  %v1481_v25 = vsel %vm1393_vm10, %v3091_v50, %v1477_v47  ;;  %v1476_v34 = vsel %vm1416_vm1, %v3151_v21, %v1472_v40 }
  0x7c   : > { %v1522_v37 = vsel %vm1462_vm4, %v3263_v5, %v1518_v55  ;;  %v1498_v24 = vsel %vm4926_vm7, %v3263_v5, %v1494_v0  ;;  %vm4927_vm13 = vmmov %vm4926_vm7  ;;  %v1480_v43 = vsel %vm1392_vm11, %v3093_v51, %v1476_v34  ;;  %v1471_v19 = vsel %vm1439_vm2, %v3153_v20, %v1467_v23 }
  0x7d   : > { %v1526_v41 = vsel %vm4927_vm13, %v3178_v7, %v1522_v37  ;;  %v1502_v42 = vsel %vm1414_vm6, %v3178_v7, %v1498_v24  ;;  %v1475_v45 = vsel %vm1415_vm3, %v3185_v48, %v1471_v19  ;;  %v1466_v31 = vsel %vm1462_vm4, %v3196_v4, 0.0  ;;  %vm4928_vm13 = vmmov %vm4926_vm7 }
  0x7e   : > { %1599 = vmatpush1.msra.mxu0 %v1526_v41  ;;  %vm1389_vm12 = vcmp.eq.f32.partialorder %v3061_v14, 2.0  ;;  %v1445_v52 = vsel %vm1441_vm9, %v3088_v46, 0.0  ;;  %v1479_v53 = vsel %vm1391_vm0, %v3131_v56, %v1475_v45  ;;  %v1470_v59 = vsel %vm4926_vm7, %v3225_v22, %v1466_v31 }
  0x7f   : > { %1600 = vmatprep.subr.mxu0 %v1505_v54  ;;  %v1449_v6 = vsel %vm1417_vm15, %v3096_v61, %v1445_v52  ;;  %vm1388_vm4 = vcmp.eq.f32.partialorder %v3068_v33, 2.0  ;;  %v1474_v12 = vsel %vm1414_vm6, %v3263_v5, %v1470_v59  ;;  %v1444_v54 = vsel %vm1440_vm14, %v3103_v2, 0.0 }
  0x80   : > { %1601 = vmatpush1.msra.mxu0 %v1504_v49  ;;  %v1453_v1 = vsel %vm1393_vm10, %v3127_v11, %v1449_v6  ;;  %vm1387_vm9 = vcmp.eq.f32.partialorder %v3073_v36, 2.0  ;;  %v1478_v17 = vsel %vm1390_vm5, %v3178_v7, %v1474_v12  ;;  %v1448_v60 = vsel %vm1416_vm1, %v3112_v9, %v1444_v54  ;;  %v1691_v54 = vld [vmem:[%s4837_s4] sm:$0xf] }
  0x81   : > { %1602 = vmatprep.subr.mxu0 %v1503_v15  ;;  %v1457_v57 = vsel %vm1389_vm12, %v3091_v50, %v1453_v1  ;;  %v1443_v3 = vsel %vm1439_vm2, %v3143_v29, 0.0  ;;  %v1452_v27 = vsel %vm1392_vm11, %v3151_v21, %v1448_v60  ;;  %vm1386_vm14 = vcmp.eq.f32.partialorder %v3086_v44, 2.0 }
  0x82   : > { %1603 = vmatpush1.msra.mxu0 %v1502_v42  ;;  %v1447_v49 = vsel %vm1415_vm3, %v3153_v20, %v1443_v3  ;;  %v1442_v26 = vsel %vm4928_vm13, %v3196_v4, 0.0  ;;  %v1456_v10 = vsel %vm1388_vm4, %v3093_v51, %v1452_v27  ;;  %vm1385_vm2 = vcmp.eq.f32.partialorder %v3061_v14, 1.0 }
  0x83   : > { %1604 = vmatprep.subr.mxu0 %v1481_v25  ;;  %v1451_v35 = vsel %vm1391_vm0, %v3185_v48, %v1447_v49  ;;  %v1446_v55 = vsel %vm1414_vm6, %v3225_v22, %v1442_v26  ;;  %v1421_v15 = vsel %vm1417_vm15, %v3088_v46, 0.0  ;;  %vm1384_vm7 = vcmp.eq.f32.partialorder %v3068_v33, 1.0  ;;  %v1174_v26 = vld [vmem:[%s4839_s6] sm:$0xff] }
  0x84   : > { %1605 = vmatpush1.msra.mxu0 %v1480_v43  ;;  %v1455_v18 = vsel %vm1387_vm9, %v3131_v56, %v1451_v35  ;;  %v1450_v0 = vsel %vm1390_vm5, %v3263_v5, %v1446_v55  ;;  %v1425_v63 = vsel %vm1393_vm10, %v3096_v61, %v1421_v15  ;;  %v1420_v62 = vsel %vm1416_vm1, %v3103_v2, 0.0  ;;  %v2508_v55 = vld [vmem:[%s2624_s19 + $0x38] sm:$0xff] }
  0x85   : > { %1606 = vmatprep.subr.mxu0 %v1479_v53  ;;  %v1454_v58 = vsel %vm1386_vm14, %v3178_v7, %v1450_v0  ;;  %vm1383_vm13 = vcmp.eq.f32.partialorder %v3073_v36, 1.0  ;;  %v1429_v47 = vsel %vm1389_vm12, %v3127_v11, %v1425_v63  ;;  %v1424_v40 = vsel %vm1392_vm11, %v3112_v9, %v1420_v62 }
  0x86   : > { %1607 = vmatpush1.msra.mxu0 %v1478_v17  ;;  %v1419_v23 = vsel %vm1415_vm3, %v3143_v29, 0.0  ;;  %vm1382_vm15 = vcmp.eq.f32.partialorder %v3086_v44, 1.0  ;;  %v1433_v37 = vsel %vm1385_vm2, %v3091_v50, %v1429_v47  ;;  %v1428_v24 = vsel %vm1388_vm4, %v3151_v21, %v1424_v40 }
  0x87   : > { %1608 = vmatprep.subr.mxu0 %v1457_v57  ;;  %v1423_v25 = vsel %vm1391_vm0, %v3153_v20, %v1419_v23  ;;  %v1418_v34 = vsel %vm1414_vm6, %v3196_v4, 0.0  ;;  %v1432_v41 = vsel %vm1384_vm7, %v3093_v51, %v1428_v24  ;;  %vm1381_vm1 = vcmp.eq.f32.partialorder %v3061_v14, 0.0 }
  0x88   : > { %1609 = vmatpush1.msra.mxu0 %v1456_v10  ;;  %v1427_v42 = vsel %vm1387_vm9, %v3185_v48, %v1423_v25  ;;  %v1422_v43 = vsel %vm1390_vm5, %v3225_v22, %v1418_v34  ;;  %v1397_v31 = vsel %vm1393_vm10, %v3088_v46, 0.0  ;;  %vm1380_vm3 = vcmp.eq.f32.partialorder %v3068_v33, 0.0  ;;  %v1175_v10 = vld [vmem:[%s4839_s6 + $0x8] sm:$0xff] }
  0x89   : > { %1610 = vmatprep.subr.mxu0 %v1455_v18  ;;  %v1431_v19 = vsel %vm1383_vm13, %v3131_v56, %v1427_v42  ;;  %v1426_v45 = vsel %vm1386_vm14, %v3263_v5, %v1422_v43  ;;  %v1401_v53 = vsel %vm1389_vm12, %v3096_v61, %v1397_v31  ;;  %v1396_v59 = vsel %vm1392_vm11, %v3103_v2, 0.0 }
  0x8a   : > { %1611 = vmatpush1.msra.mxu0 %v1454_v58  ;;  %v1430_v52 = vsel %vm1382_vm15, %v3178_v7, %v1426_v45  ;;  %vm1379_vm6 = vcmp.eq.f32.partialorder %v3073_v36, 0.0  ;;  %v1405_v46 = vsel %vm1385_vm2, %v3127_v11, %v1401_v53  ;;  %v1400_v6 = vsel %vm1388_vm4, %v3112_v9, %v1396_v59  ;;  %v2509_v58 = vld [vmem:[%s2624_s19 + $0x30] sm:$0xff] }
  0x8b   : > { %1612 = vmatprep.subr.mxu0 %v1433_v37  ;;  %v1395_v12 = vsel %vm1391_vm0, %v3143_v29, 0.0  ;;  %vm1378_vm10 = vcmp.eq.f32.partialorder %v3086_v44, 0.0  ;;  %v1409_v61 = vsel %vm1381_vm1, %v3091_v50, %v1405_v46  ;;  %v1404_v2 = vsel %vm1384_vm7, %v3151_v21, %v1400_v6  ;;  %v719_v44 = vld [vmem:[%s4836_s3] sm:$0xf] }
  0x8c   : > { %1613 = vmatpush1.msra.mxu0 %v1432_v41  ;;  %v1399_v11 = vsel %vm1387_vm9, %v3153_v20, %v1395_v12  ;;  %v1394_v9 = vsel %vm1390_vm5, %v3196_v4, 0.0  ;;  %v1408_v29 = vsel %vm1380_vm3, %v3093_v51, %v1404_v2  ;;  %2444 = vpow2.f32 %v3076_v38  ;;  %v601_v4 = vld [vmem:[%s4835_s2 + $0x8] sm:$0xff] }
  0x8d   : > { %1614 = vmatprep.subr.mxu0 %v1431_v19  ;;  %v1403_v14 = vsel %vm1383_vm13, %v3185_v48, %v1399_v11  ;;  %v1398_v50 = vsel %vm1386_vm14, %v3225_v22, %v1394_v9  ;;  %v2370_v51 = vmul.f32 -1.442695, %v2657_v30  ;;  %v2369_v20 = vmul.f32 -1.442695, %v3045_v32  ;;  %v602_v48 = vld [vmem:[%s4835_s2 + $0x10] sm:$0xff] }
  0x8e   : > { %1615 = vmatpush1.msra.mxu0 %v1430_v52  ;;  %v1407_v21 = vsel %vm1379_vm6, %v3131_v56, %v1403_v14  ;;  %v1402_v33 = vsel %vm1382_vm15, %v3263_v5, %v1398_v50  ;;  %v2368_v36 = vmul.f32 -1.442695, %v3048_v16  ;;  %v2536_v56 = vmov 0   ;;  %v727_v30 = vld [vmem:[%s4837_s4] sm:$0xf] }
  0x8f   : > { %1616 = vmatprep.subr.mxu0 %v1409_v61  ;;  %v1406_v38 = vsel %vm1378_vm10, %v3178_v7, %v1402_v33  ;;  %2446 = vpow2.f32 %v2370_v51  ;;  %2426 = vset.pattern.permute.xlu0 %v2536_v56  ;;  %v600_v7 = vld [vmem:[%s4835_s2] sm:$0xff]  ;;  %vm4841_vm11 = vcmask 326656  }
  0x90   : > { %1617 = vmatpush1.msra.mxu0 %v1408_v29  ;;  %2448 = vpow2.f32 %v2369_v20  ;;  %615 = vperm.xlu0 %2426, %v602_v48   ;;  %v1683_v5 = vld [vmem:[%s4836_s3] sm:$0xf] }
  0x91   : > { %1618 = vmatprep.subr.mxu0 %v1407_v21  ;;  %2450 = vpow2.f32 %v2368_v36  ;;  %2427 = vset.pattern.permute.xlu1 %v2536_v56 }
  0x92   : > { %1619 = vmatpush1.msra.mxu0 %v1406_v38  ;;  %730 = vperm.xlu1 %2427, %v727_v30  }
  0x94   : > { %722 = vperm.xlu0 %2426, %v719_v44  }
  0x96   : > { %605 = vperm.xlu1 %2427, %v600_v7  }
  0x98   : > { %610 = vperm.xlu0 %2426, %v601_v4  }
  0x99   : > { %v2445_v22 = vpop.eup %2444 }
  0x9a   : > { %v1293_v1 = vadd.f32 1.0, %v2445_v22  ;;  %1580 = vperm.xlu1 %2427, %v602_v48  }
  0x9c   : > { %v2447_v17 = vpop.eup %2446  ;;  %2452 = vrcp.f32 %v1293_v1  ;;  %1686 = vperm.xlu0 %2426, %v1683_v5  }
  0x9d   : > { %v2449_v57 = vpop.eup %2448  ;;  %v1292_v60 = vadd.f32 1.0, %v2447_v17 }
  0x9e   : > { %v2451_v3 = vpop.eup %2450  ;;  %v1291_v27 = vadd.f32 1.0, %v2449_v57  ;;  %1694 = vperm.xlu1 %2427, %v1691_v54  }
  0x9f   : > { %2454 = vrcp.f32 %v1292_v60  ;;  %v1290_v49 = vadd.f32 1.0, %v2451_v3 }
  0xa0   : > { %2456 = vrcp.f32 %v1291_v27  ;;  %1570 = vperm.xlu0 %2426, %v600_v7  }
  0xa1   : > { %2458 = vrcp.f32 %v1290_v49 }
  0xa2   : > { %1575 = vperm.xlu1 %2427, %v601_v4  }
  0xa4   : > { %1178 = vperm.xlu0 %2426, %v1174_v26  }
  0xa6   : > { %1183 = vperm.xlu1 %2427, %v1175_v10  }
  0xa8   : > { %2141 = vperm.xlu0 %2426, %v1174_v26  }
  0xa9   : > { %v2453_v35 = vpop.eup %2452 }
  0xaa   : > { %v1305_v18 = vmul.f32 %v2508_v55, %v2453_v35  ;;  %2146 = vperm.xlu1 %2427, %v1175_v10  }
  0xac   : > { %v2455_v0 = vpop.eup %2454  ;;  %1620 = vmatprep.subr.mxu0 %v1305_v18 }
  0xad   : > { %v2457_v15 = vpop.eup %2456  ;;  %v1304_v63 = vmul.f32 %v2509_v58, %v2455_v0 }
  0xae   : > { %v2459_v62 = vpop.eup %2458  ;;  %v1303_v47 = vmul.f32 %v2457_v15, %v3045_v32 }
  0xaf   : > { %1621 = vmatpush1.msra.mxu0 %v1304_v63  ;;  %v1302_v40 = vmul.f32 %v2459_v62, %v3048_v16  ;;  %v1129_v16 = vld [vmem:[%s4838_s5 + $0x8] sm:$0xff] }
  0xb0   : > { %1622 = vmatprep.subr.mxu0 %v1303_v47  ;;  %2366 = vmatprep.mubr.msk.f32.mxu1 %vm4841_vm11, %v1129_v16 }
  0xb1   : > { %1623 = vmatpush1.msra.mxu0 %v1302_v40 }
  0xb2   : > { %2376 = vmatmul.mubr.msk.f32.vlgmr.msra.gmra.mxu0 %vm618_vm8, %v3124_v28 }
  0xb3   : > { %1662 = vmatprep.mubr.f32.mxu0 %v2535_v8 }
  0xb6   : > { %2377 = vmatmul.mubr.msk.f32.gmra.mxu0 %vm618_vm8, %v3168_v39 }
  0xb7   : > { %1668 = vmatprep.mubr.f32.mxu0 %v2535_v8 }
  0xba   : > { %2378 = vmatmul.mubr.msk.f32.gmra.mxu0 %vm618_vm8, %v3208_v13  ;;  %vm4845_vm8 = vcmask 1043456  }
 0x10b   : > { %v616_v23 = vpop.permute.xlu0 %615 }
 0x10d   : > { %v3523_v32 = vpop.permute.xlu1 %730 }
 0x10f   : > { %v3528_v37 = vpop.permute.xlu0 %722 }
 0x111   : > { %v606_v28 = vpop.permute.xlu1 %605 }
 0x113   : > { %v611_v41 = vpop.permute.xlu0 %610 }
 0x12d   : > { %v694_v24 = vpop.f32.mrf.mxu0 }
 0x12e   : > { %v3531_v39 = vadd.f32 %v694_v24, %v606_v28 }
 0x12f   : > { %v696_v8 = vpop.f32.mrf.mxu0 }
 0x130   : > { %v2354_v25 = vmul.f32 -1.442695, %v3531_v39  ;;  %v2360_v13 = vadd.f32 3.0, %v3531_v39  ;;  %v3535_v34 = vadd.f32 %v696_v8, %v606_v28 }
 0x132   : > { %2460 = vpow2.f32 %v2354_v25  ;;  %v798_v42 = vmul.f32 1.5, %v2360_v13  ;;  %v2355_v43 = vmul.f32 -1.442695, %v3535_v34  ;;  %v2361_v19 = vadd.f32 3.0, %v3535_v34  ;;  %v700_v45 = vpop.f32.mrf.mxu0 }
 0x133   : > { %v3539_v31 = vadd.f32 %v700_v45, %v611_v41 }
 0x134   : > { %v3541_v52 = vfloor.f32 %v798_v42  ;;  %2462 = vpow2.f32 %v2355_v43  ;;  %v799_v53 = vmul.f32 1.5, %v2361_v19  ;;  %v702_v59 = vpop.f32.mrf.mxu0 }
 0x135   : > { %v2356_v46 = vmul.f32 -1.442695, %v3539_v31  ;;  %v2362_v6 = vadd.f32 3.0, %v3539_v31  ;;  %v3545_v12 = vadd.f32 %v702_v59, %v611_v41 }
 0x136   : > { %v810_v61 = vsub.f32 %v798_v42, %v3541_v52  ;;  %v3548_v2 = vfloor.f32 %v799_v53  ;;  %v706_v11 = vpop.f32.mrf.mxu0  ;;  %vm4861_vm0 = vcmp.eq.f32.partialorder %v3541_v52, 5.0  ;;  %vm4852_vm12 = vcmp.eq.f32.partialorder %v3541_v52, 4.0 }
 0x137   : > { %v800_v9 = vmul.f32 1.5, %v2362_v6  ;;  %v2357_v29 = vmul.f32 -1.442695, %v3545_v12  ;;  %v2363_v14 = vadd.f32 3.0, %v3545_v12  ;;  %2464 = vpow2.f32 %v2356_v46 }
 0x138   : > { %v816_v50 = vmul.f32 %v810_v61, %v810_v61  ;;  %v852_v21 = vsub.f32 1.0, %v810_v61  ;;  %v811_v33 = vsub.f32 %v799_v53, %v3548_v2  ;;  %v708_v48 = vpop.f32.mrf.mxu0  ;;  %v707_v30 = vadd.f32 %v706_v11, %v616_v23 }
 0x139   : > { %v3553_v51 = vfloor.f32 %v800_v9  ;;  %2466 = vpow2.f32 %v2357_v29  ;;  %v801_v20 = vmul.f32 1.5, %v2363_v14  ;;  %v709_v1 = vadd.f32 %v708_v48, %v616_v23 }
 0x13a   : > { %v822_v38 = vmul.f32 %v816_v50, %v810_v61  ;;  %v817_v36 = vmul.f32 %v811_v33, %v811_v33  ;;  %v853_v56 = vsub.f32 1.0, %v811_v33  ;;  %v858_v22 = vmul.f32 %v852_v21, %v852_v21 }
 0x13b   : > { %v812_v44 = vsub.f32 %v800_v9, %v3553_v51  ;;  %v3556_v7 = vfloor.f32 %v801_v20  ;;  %v713_v27 = vrot.slane %v707_v30, 4  ;;  %v714_v58 = vrot.slane %v709_v1, 4 }
 0x13c   : > { %v834_v4 = vmul.f32 0.5, %v822_v38  ;;  %v823_v5 = vmul.f32 %v817_v36, %v811_v33  ;;  %v859_v54 = vmul.f32 %v853_v56, %v853_v56  ;;  %v864_v18 = vmul.f32 %v858_v22, %v852_v21 }
 0x13d   : > { %4929 = vst [vmem:[#allocation6_spill] sm:$0xff] %v3556_v7  ;;  %v3558_v17 = vmul.f32 %v812_v44, %v812_v44  ;;  %v854_v57 = vsub.f32 1.0, %v812_v44  ;;  %v813_v60 = vsub.f32 %v801_v20, %v3556_v7  ;;  %v3564_v62 = vmul.f32 0.16666667, %v822_v38 }
 0x13e   : > { %v835_v3 = vmul.f32 0.5, %v823_v5  ;;  %v865_v26 = vmul.f32 %v859_v54, %v853_v56  ;;  %v840_v47 = vsub.f32 %v834_v4, %v816_v50  ;;  %v717_v13 = vmul.f32 %v713_v27, %v707_v30 }
 0x13f   : > { %v2461_v49 = vpop.eup %2460  ;;  %v824_v10 = vmul.f32 %v3558_v17, %v812_v44  ;;  %v860_v35 = vmul.f32 %v854_v57, %v854_v57  ;;  %v3562_v55 = vmul.f32 %v813_v60, %v813_v60  ;;  %v855_v15 = vsub.f32 1.0, %v813_v60 }
 0x140   : > { %v841_v0 = vsub.f32 %v835_v3, %v817_v36  ;;  %v762_v40 = vadd.f32 1.0, %v2461_v49  ;;  %v3566_v23 = vmul.f32 0.16666667, %v865_v26  ;;  %v3571_v41 = vmul.f32 0.16666667, %v864_v18 }
 0x141   : > { %v2463_v63 = vpop.eup %2462  ;;  %v3568_v16 = vmul.f32 0.5, %v824_v10  ;;  %v825_v28 = vmul.f32 %v3562_v55, %v813_v60  ;;  %v866_v8 = vmul.f32 %v860_v35, %v854_v57  ;;  %v861_v25 = vmul.f32 %v855_v15, %v855_v15 }
 0x142   : > { %v763_v24 = vadd.f32 1.0, %v2463_v63  ;;  %v3573_v42 = vadd.f32 0.6666667, %v841_v0  ;;  %v718_v19 = vmul.f32 %v714_v58, %v709_v1  ;;  %v3575_v53 = vadd.f32 0.6666667, %v840_v47 }
 0x143   : > { %v837_v43 = vmul.f32 0.5, %v825_v28  ;;  %v3577_v59 = vmul.f32 0.16666667, %v823_v5  ;;  %v867_v46 = vmul.f32 %v861_v25, %v855_v15  ;;  %v725_v6 = vmul.f32 %v3528_v37, %v717_v13 }
 0x144   : > { %v2465_v45 = vpop.eup %2464  ;;  %2468 = vrcp.f32 %v762_v40  ;;  %v3580_v11 = vmul.f32 0.16666667, %v824_v10  ;;  %v726_v9 = vmul.f32 %v3528_v37, %v718_v19  ;;  %v877_v29 = vsub.f32 1.0, %v3566_v23 }
 0x145   : > { %2470 = vrcp.f32 %v763_v24  ;;  %v842_v14 = vsub.f32 %v3568_v16, %v3558_v17  ;;  %v3586_v50 = vmul.f32 0.16666667, %v866_v8  ;;  %v733_v21 = vadd.f32 %v3523_v32, %v725_v6 }
 0x146   : > { %v2467_v61 = vpop.eup %2466  ;;  %v764_v33 = vadd.f32 1.0, %v2465_v45  ;;  %v843_v20 = vsub.f32 %v837_v43, %v3562_v55  ;;  %v734_v48 = vadd.f32 %v3523_v32, %v726_v9  ;;  %v883_v38 = vsub.f32 %v877_v29, %v3573_v42 }
 0x147   : > { %v765_v37 = vadd.f32 1.0, %v2467_v61  ;;  %v3593_v36 = vmul.f32 0.16666667, %v867_v46  ;;  %v737_v56 = vrot.slane %v733_v21, 4  ;;  %vm949_vm5 = vcmp.eq.f32.partialorder %v3548_v2, 4.0 }
 0x148   : > { %v738_v30 = vrot.slane %v734_v48, 4  ;;  %v3598_v44 = vsub.f32 %v883_v38, %v3577_v59  ;;  %vm4843_vm4 = vcmp.eq.f32.partialorder %v3548_v2, 7.0  ;;  %v876_v32 = vsub.f32 1.0, %v3571_v41 }
 0x149   : > { %4930 = vst [vmem:[#allocation7_spill] sm:$0xff] %v3593_v36  ;;  %v3603_v4 = vsel %vm4845_vm8, %v733_v21, %v737_v56  ;;  %vm4860_vm9 = vcmp.eq.f32.partialorder %v3548_v2, 5.0  ;;  %vm4854_vm14 = vcmp.eq.f32.partialorder %v3548_v2, 6.0  ;;  %v1063_v22 = vsel %vm4843_vm4, %v3566_v23, 0.0 }
 0x14a   : > { %v2358_v5 = vmul.f32 -1.442695, %v3603_v4  ;;  %v2364_v1 = vadd.f32 3.0, %v3603_v4  ;;  %v3613_v54 = vsel %vm4845_vm8, %v734_v48, %v738_v30  ;;  %v1069_v17 = vsel %vm4854_vm14, %v3573_v42, %v1063_v22 }
 0x14b   : > { %v2365_v57 = vadd.f32 3.0, %v3613_v54  ;;  %v1075_v60 = vsel %vm4860_vm9, %v3598_v44, %v1069_v17  ;;  %v882_v3 = vsub.f32 %v876_v32, %v3575_v53  ;;  %vm4842_vm2 = vcmp.eq.f32.partialorder %v3541_v52, 7.0 }
 0x14c   : > { %2472 = vpow2.f32 %v2358_v5  ;;  %v802_v27 = vmul.f32 1.5, %v2364_v1  ;;  %v1081_v49 = vsel %vm949_vm5, %v3577_v59, %v1075_v60  ;;  %v1062_v26 = vsel %vm4842_vm2, %v3571_v41, 0.0 }
 0x14d   : > { %v2359_v10 = vmul.f32 -1.442695, %v3613_v54  ;;  %v803_v35 = vmul.f32 1.5, %v2365_v57  ;;  %1193 = vmatprep.subr.mxu1 %v1081_v49  ;;  %v3632_v55 = vsub.f32 %v882_v3, %v3564_v62  ;;  %vm4853_vm7 = vcmp.eq.f32.partialorder %v3541_v52, 6.0 }
 0x14e   : > { %2474 = vrcp.f32 %v764_v33  ;;  %v3635_v18 = vmul.f32 0.16666667, %v825_v28  ;;  %v3637_v0 = vfloor.f32 %v802_v27  ;;  %v1068_v15 = vsel %vm4853_vm7, %v3575_v53, %v1062_v26 }
 0x14f   : > { %v3642_v58 = vadd.f32 0.6666667, %v843_v20  ;;  %v3644_v63 = vfloor.f32 %v803_v35  ;;  %v1074_v47 = vsel %vm4861_vm0, %v3632_v55, %v1068_v15  ;;  %v879_v40 = vsub.f32 1.0, %v3593_v36 }
 0x150   : > { %4931 = vst [vmem:[#allocation8_spill] sm:$0xff] %v3635_v18  ;;  %v3650_v16 = vadd.f32 0.6666667, %v842_v14  ;;  %2476 = vrcp.f32 %v765_v37  ;;  %v814_v28 = vsub.f32 %v802_v27, %v3637_v0  ;;  %v1080_v24 = vsel %vm4852_vm12, %v3564_v62, %v1074_v47 }
 0x151   : > { %4932 = vst [vmem:[#allocation9_spill] sm:$0xff] %v3642_v58  ;;  %v3656_v8 = vpop.eup %2468  ;;  %2478 = vpow2.f32 %v2359_v10  ;;  %v815_v25 = vsub.f32 %v803_v35, %v3644_v63  ;;  %v3662_v13 = vsel %vm949_vm5, %v3566_v23, 0.0  ;;  %1194 = vmatpush1.msra.mxu1 %v1080_v24  ;;  %vm4847_vm13 = vcmp.eq.f32.partialorder %v3556_v7, 3.0 }
 0x152   : > { %v3665_v43 = vpop.eup %2470  ;;  %v820_v19 = vmul.f32 %v814_v28, %v814_v28  ;;  %v856_v45 = vsub.f32 1.0, %v814_v28  ;;  %vm4850_vm15 = vcmp.eq.f32.partialorder %v3556_v7, 4.0  ;;  %vm4846_vm1 = vcmp.eq.f32.partialorder %v3556_v7, 5.0 }
 0x153   : > { %v821_v46 = vmul.f32 %v815_v25, %v815_v25  ;;  %v857_v6 = vsub.f32 1.0, %v815_v25  ;;  %v885_v61 = vsub.f32 %v879_v40, %v3642_v58  ;;  %vm4844_vm3 = vcmp.eq.f32.partialorder %v3556_v7, 6.0 }
 0x154   : > { %v826_v9 = vmul.f32 %v820_v19, %v814_v28  ;;  %v862_v29 = vmul.f32 %v856_v45, %v856_v45  ;;  %vm4857_vm6 = vcmp.eq.f32.partialorder %v3644_v63, 5.0  ;;  %v1029_v14 = vsel %vm4844_vm3, %v3593_v36, 0.0 }
 0x155   : > { %v878_v21 = vsub.f32 1.0, %v3586_v50  ;;  %v827_v33 = vmul.f32 %v821_v46, %v815_v25  ;;  %v863_v20 = vmul.f32 %v857_v6, %v857_v6  ;;  %vm4849_vm10 = vcmp.eq.f32.partialorder %v3644_v63, 6.0 }
 0x156   : > { %v3678_v48 = vsub.f32 %v885_v61, %v3635_v18  ;;  %v838_v38 = vmul.f32 0.5, %v826_v9  ;;  %v868_v37 = vmul.f32 %v862_v29, %v856_v45  ;;  %v1035_v56 = vsel %vm4846_vm1, %v3642_v58, %v1029_v14 }
 0x157   : > { %v884_v30 = vsub.f32 %v878_v21, %v3650_v16  ;;  %v839_v32 = vmul.f32 0.5, %v827_v33  ;;  %v869_v22 = vmul.f32 %v863_v20, %v857_v6  ;;  %vm4858_vm11 = vcmp.eq.f32.partialorder %v3637_v0, 4.0 }
 0x158   : > { %4933 = vst [vmem:[#allocation10_spill] sm:$0xff] %v3678_v48  ;;  %vm4851_vm2 = vcmp.eq.f32.partialorder %v3637_v0, 5.0  ;;  %v1041_v5 = vsel %vm4850_vm15, %v3678_v48, %v1035_v56  ;;  %v3689_v1 = vmul.f32 0.16666667, %v826_v9  ;;  %v844_v17 = vsub.f32 %v838_v38, %v820_v19 }
 0x159   : > { %v3691_v57 = vmul.f32 0.16666667, %v868_v37  ;;  %vm4862_vm4 = vcmp.eq.f32.partialorder %v3644_v63, 4.0  ;;  %vm4859_vm3 = vcmp.eq.f32.partialorder %v3637_v0, 3.0  ;;  %vm4848_vm8 = vcmp.eq.f32.partialorder %v3637_v0, 6.0  ;;  %v2473_v60 = vpop.eup %2472 }
 0x15a   : > { %4934 = vst [vmem:[#allocation11_spill] sm:$0xff] %v3689_v1  ;;  %v3696_v3 = vmul.f32 0.16666667, %v827_v33  ;;  %v845_v27 = vsub.f32 %v839_v32, %v821_v46  ;;  %v3698_v49 = vmul.f32 0.16666667, %v869_v22  ;;  %vm917_vm1 = vcmp.eq.f32.partialorder %v3644_v63, 3.0 }
 0x15b   : > { %4935 = vst [vmem:[#allocation12_spill] sm:$0xff] %v3691_v57  ;;  %v1047_v26 = vsel %vm4847_vm13, %v3635_v18, %v1041_v5  ;;  %v3704_v10 = vadd.f32 0.6666667, %v844_v17  ;;  %v880_v35 = vsub.f32 1.0, %v3691_v57  ;;  %v1030_v15 = vsel %vm4848_vm8, %v3691_v57, 0.0  ;;  %v3713_v40 = vpop.eup %2474 }
 0x15c   : > { %4936 = vst [vmem:[#allocation13_spill] sm:$0xff] %v3696_v3  ;;  %v3711_v47 = vsub.f32 %v884_v30, %v3580_v11  ;;  %v3715_v28 = vadd.f32 0.6666667, %v845_v27  ;;  %v881_v24 = vsub.f32 1.0, %v3698_v49  ;;  %v1031_v25 = vsel %vm4849_vm10, %v3698_v49, 0.0 }
 0x15d   : > { %4937 = vst [vmem:[#allocation14_spill] sm:$0xff] %v3704_v10  ;;  %vm914_vm13 = vcmp.eq.f32.partialorder %v3553_v51, 3.0  ;;  %v3722_v19 = vadd.f32 1.0, %v2473_v60  ;;  %v886_v45 = vsub.f32 %v880_v35, %v3704_v10  ;;  %v1036_v46 = vsel %vm4851_vm2, %v3704_v10, %v1030_v15  ;;  %v3729_v6 = vpop.eup %2476 }
 0x15e   : > { %vm4865_vm8 = vcmp.eq.f32.partialorder %v3553_v51, 4.0  ;;  %v887_v61 = vsub.f32 %v881_v24, %v3715_v28  ;;  %v1037_v9 = vsel %vm4857_vm6, %v3715_v28, %v1031_v25  ;;  %vm4863_vm10 = vcmp.eq.f32.partialorder %v3553_v51, 5.0  ;;  %v3737_v29 = vpop.eup %2478 }
 0x15f   : > { %vm4855_vm15 = vcmp.eq.f32.partialorder %v3553_v51, 6.0  ;;  %v3740_v14 = vsub.f32 %v886_v45, %v3689_v1  ;;  %vm4856_vm2 = vcmp.eq.f32.partialorder %v3548_v2, 3.0  ;;  %v1027_v33 = vsel %vm4854_vm14, %v3566_v23, 0.0 }
 0x160   : > { %v1028_v21 = vsel %vm4855_vm15, %v3586_v50, 0.0  ;;  %v3750_v20 = vsub.f32 %v887_v61, %v3696_v3  ;;  %v1033_v37 = vsel %vm4860_vm9, %v3573_v42, %v1027_v33  ;;  %vm912_vm12 = vcmp.eq.f32.partialorder %v3541_v52, 3.0 }
 0x161   : > { %4938 = vst [vmem:[#allocation15_spill] sm:$0xff] %v3740_v14  ;;  %v1034_v38 = vsel %vm4863_vm10, %v3650_v16, %v1028_v21  ;;  %v1042_v56 = vsel %vm4858_vm11, %v3740_v14, %v1036_v46  ;;  %v1039_v32 = vsel %vm949_vm5, %v3598_v44, %v1033_v37  ;;  %v1026_v22 = vsel %vm4853_vm7, %v3571_v41, 0.0 }
 0x162   : > { %4939 = vst [vmem:[#allocation16_spill] sm:$0xff] %v3750_v20  ;;  %v1040_v30 = vsel %vm4865_vm8, %v3711_v47, %v1034_v38  ;;  %v1043_v5 = vsel %vm4862_vm4, %v3750_v20, %v1037_v9  ;;  %v1048_v17 = vsel %vm4859_vm3, %v3689_v1, %v1042_v56  ;;  %v1045_v27 = vsel %vm4856_vm2, %v3577_v59, %v1039_v32 }
 0x163   : > { %v1046_v60 = vsel %vm914_vm13, %v3580_v11, %v1040_v30  ;;  %v1049_v35 = vsel %vm917_vm1, %v3696_v3, %v1043_v5  ;;  %v1032_v15 = vsel %vm4861_vm0, %v3575_v53, %v1026_v22  ;;  %vm911_vm7 = vcmp.eq.f32.partialorder %v3644_v63, 2.0 }
 0x164   : > { %v995_v24 = vsel %vm4857_vm6, %v3698_v49, 0.0  ;;  %1195 = vmatprep.subr.mxu1 %v1049_v35  ;;  %vm4940_vm14 = vcmp.eq.f32.partialorder %v3541_v52, 4.0  ;;  %vm910_vm15 = vcmp.eq.f32.partialorder %v3637_v0, 2.0  ;;  %vm4941_vm2 = vcmp.eq.f32.partialorder %v3637_v0, 5.0 }
 0x165   : > { %v1038_v25 = vsel %vm4940_vm14, %v3632_v55, %v1032_v15  ;;  %v1001_v45 = vsel %vm4862_vm4, %v3715_v28, %v995_v24  ;;  %v994_v46 = vsel %vm4941_vm2, %v3691_v57, 0.0  ;;  %1196 = vmatpush1.msra.mxu1 %v1048_v17  ;;  %vm909_vm14 = vcmp.eq.f32.partialorder %v3556_v7, 2.0  ;;  %v3855_v15 = vpop.permute.xlu1 %1580 }
 0x166   : > { %v1044_v61 = vsel %vm912_vm12, %v3564_v62, %v1038_v25  ;;  %v1007_v9 = vsel %vm917_vm1, %v3750_v20, %v1001_v45  ;;  %v1000_v21 = vsel %vm4858_vm11, %v3704_v10, %v994_v46  ;;  %1197 = vmatprep.subr.mxu1 %v1047_v26  ;;  %vm4942_vm2 = vcmp.eq.f32.partialorder %v3556_v7, 5.0  ;;  %v3867_v46 = vpop.permute.xlu0 %1686 }
 0x167   : > { %v1013_v33 = vsel %vm911_vm7, %v3696_v3, %v1007_v9  ;;  %v1006_v38 = vsel %vm4859_vm3, %v3740_v14, %v1000_v21  ;;  %v993_v37 = vsel %vm4942_vm2, %v3593_v36, 0.0  ;;  %vm4866_vm6 = vcmp.eq.f32.partialorder %v3553_v51, 2.0  ;;  %1198 = vmatpush1.msra.mxu1 %v1046_v60 }
 0x168   : > { %v1012_v56 = vsel %vm910_vm15, %v3689_v1, %v1006_v38  ;;  %vm4943_vm11 = vcmp.eq.f32.partialorder %v3556_v7, 4.0  ;;  %v992_v30 = vsel %vm4863_vm10, %v3586_v50, 0.0  ;;  %vm907_vm3 = vcmp.eq.f32.partialorder %v3548_v2, 2.0  ;;  %1199 = vmatprep.subr.mxu1 %v1045_v27 }
 0x169   : > { %v999_v26 = vsel %vm4943_vm11, %v3642_v58, %v993_v37  ;;  %vm4944_vm2 = vcmp.eq.f32.partialorder %v3556_v7, 3.0  ;;  %v998_v22 = vsel %vm4865_vm8, %v3650_v16, %v992_v30  ;;  %v991_v5 = vsel %vm4860_vm9, %v3566_v23, 0.0  ;;  %1200 = vmatpush1.msra.mxu1 %v1044_v61 }
 0x16a   : > { %v1005_v32 = vsel %vm4944_vm2, %v3678_v48, %v999_v26  ;;  %vm4864_vm11 = vcmp.eq.f32.partialorder %v3541_v52, 2.0  ;;  %v1004_v60 = vsel %vm914_vm13, %v3711_v47, %v998_v22  ;;  %v997_v27 = vsel %vm949_vm5, %v3573_v42, %v991_v5  ;;  %1201 = vmatprep.subr.mxu1 %v1013_v33 }
 0x16b   : > { %v1011_v17 = vsel %vm909_vm14, %v3635_v18, %v1005_v32  ;;  %v990_v35 = vsel %vm4861_vm0, %v3571_v41, 0.0  ;;  %v1010_v24 = vsel %vm4866_vm6, %v3580_v11, %v1004_v60  ;;  %vm4945_vm2 = vcmp.eq.f32.partialorder %v3548_v2, 3.0  ;;  %1202 = vmatpush1.msra.mxu1 %v1012_v56 }
 0x16c   : > { %v1003_v25 = vsel %vm4945_vm2, %v3598_v44, %v997_v27  ;;  %vm4946_vm9 = vcmp.eq.f32.partialorder %v3541_v52, 4.0  ;;  %vm905_vm5 = vcmp.eq.f32.partialorder %v3644_v63, 1.0  ;;  %v959_v21 = vsel %vm4862_vm4, %v3698_v49, 0.0  ;;  %1203 = vmatprep.subr.mxu1 %v1011_v17 }
 0x16d   : > { %v996_v45 = vsel %vm4946_vm9, %v3575_v53, %v990_v35  ;;  %v1009_v61 = vsel %vm907_vm3, %v3577_v59, %v1003_v25  ;;  %vm904_vm2 = vcmp.eq.f32.partialorder %v3637_v0, 1.0  ;;  %v965_v38 = vsel %vm917_vm1, %v3715_v28, %v959_v21  ;;  %1204 = vmatpush1.msra.mxu1 %v1010_v24  ;;  %v3921_v24 = vpop.permute.xlu1 %1694 }
 0x16e   : > { %v1002_v9 = vsel %vm912_vm12, %v3632_v55, %v996_v45  ;;  %vm4947_vm9 = vcmp.eq.f32.partialorder %v3637_v0, 4.0  ;;  %vm903_vm0 = vcmp.eq.f32.partialorder %v3556_v7, 1.0  ;;  %v971_v56 = vsel %vm911_vm7, %v3750_v20, %v965_v38  ;;  %1205 = vmatprep.subr.mxu1 %v1009_v61 }
 0x16f   : > { %v1008_v33 = vsel %vm4864_vm11, %v3564_v62, %v1002_v9  ;;  %v958_v37 = vsel %vm4947_vm9, %v3691_v57, 0.0  ;;  %vm4948_vm4 = vcmp.eq.f32.partialorder %v3637_v0, 3.0  ;;  %vm4949_vm10 = vcmp.eq.f32.partialorder %v3556_v7, 4.0  ;;  %v1571_v9 = vpop.permute.xlu0 %1570 }
 0x170   : > { %v964_v26 = vsel %vm4948_vm4, %v3704_v10, %v958_v37  ;;  %v957_v30 = vsel %vm4949_vm10, %v3593_v36, 0.0  ;;  %vm902_vm11 = vcmp.eq.f32.partialorder %v3553_v51, 1.0  ;;  %v977_v32 = vsel %vm905_vm5, %v3696_v3, %v971_v56  ;;  %1206 = vmatpush1.msra.mxu1 %v1008_v33 }
 0x171   : > { %v970_v22 = vsel %vm910_vm15, %v3740_v14, %v964_v26  ;;  %vm4950_vm9 = vcmp.eq.f32.partialorder %v3556_v7, 3.0  ;;  %v956_v17 = vsel %vm4865_vm8, %v3586_v50, 0.0  ;;  %vm4867_vm4 = vcmp.eq.f32.partialorder %v3548_v2, 1.0  ;;  %1207 = vmatprep.subr.mxu1 %v977_v32 }
 0x172   : > { %v963_v5 = vsel %vm4950_vm9, %v3642_v58, %v957_v30  ;;  %v976_v60 = vsel %vm904_vm2, %v3689_v1, %v970_v22  ;;  %v962_v35 = vsel %vm914_vm13, %v3650_v16, %v956_v17  ;;  %vm4951_vm10 = vcmp.eq.f32.partialorder %v3548_v2, 3.0  ;;  %v1658_v21 = vpop.f32.mrf.mxu0 }
 0x173   : > { %v969_v27 = vsel %vm909_vm14, %v3678_v48, %v963_v5  ;;  %v968_v45 = vsel %vm4866_vm6, %v3711_v47, %v962_v35  ;;  %v961_v61 = vsel %vm4951_vm10, %v3573_v42, %v3662_v13  ;;  %vm900_vm9 = vcmp.eq.f32.partialorder %v3541_v52, 1.0  ;;  %1208 = vmatpush1.msra.mxu1 %v976_v60 }
 0x174   : > { %v975_v25 = vsel %vm903_vm0, %v3635_v18, %v969_v27  ;;  %v974_v33 = vsel %vm902_vm11, %v3580_v11, %v968_v45  ;;  %v967_v38 = vsel %vm907_vm3, %v3598_v44, %v961_v61  ;;  %vm4952_vm8 = vcmp.eq.f32.partialorder %v3541_v52, 4.0  ;;  %v1660_v32 = vpop.f32.mrf.mxu0 }
 0x175   : > { %v954_v37 = vsel %vm4952_vm8, %v3571_v41, 0.0  ;;  %vm899_vm6 = vcmp.eq.f32.partialorder %v3644_v63, 0.0  ;;  %v3944_v13 = vadd.f32 %v1658_v21, %v1571_v9  ;;  %1209 = vmatprep.subr.mxu1 %v975_v25  ;;  %v973_v56 = vsel %vm4867_vm4, %v3577_v59, %v967_v38 }
 0x176   : > { %v960_v26 = vsel %vm912_vm12, %v3575_v53, %v954_v37  ;;  %v923_v30 = vsel %vm917_vm1, %v3698_v49, 0.0  ;;  %1210 = vmatpush1.msra.mxu1 %v974_v33  ;;  %vm4954_vm8 = vcmp.eq.f32.partialorder %v3541_v52, 2.0  ;;  %vm898_vm10 = vcmp.eq.f32.partialorder %v3637_v0, 0.0  ;;  %v1664_v45 = vpop.f32.mrf.mxu0  ;;  %v1576_v33 = vpop.permute.xlu1 %1575 }
 0x177   : > { %4953 = vst [vmem:[#allocation17_spill] sm:$0xff] %v3944_v13  ;;  %v966_v22 = vsel %vm4954_vm8, %v3632_v55, %v960_v26  ;;  %v929_v5 = vsel %vm911_vm7, %v3715_v28, %v923_v30  ;;  %vm4955_vm4 = vcmp.eq.f32.partialorder %v3637_v0, 3.0  ;;  %v2379_v60 = vmul.f32 -1.442695, %v3944_v13  ;;  %1211 = vmatprep.subr.mxu1 %v973_v56 }
 0x178   : > { %v922_v17 = vsel %vm4955_vm4, %v3691_v57, 0.0  ;;  %v2385_v27 = vadd.f32 3.0, %v3944_v13  ;;  %v3967_v35 = vadd.f32 %v1660_v32, %v1571_v9  ;;  %v972_v25 = vsel %vm900_vm9, %v3564_v62, %v966_v22  ;;  %v1666_v30 = vpop.f32.mrf.mxu0 }
 0x179   : > { %1212 = vmatpush1.msra.mxu1 %v972_v25  ;;  %v935_v61 = vsel %vm905_vm5, %v3750_v20, %v929_v5  ;;  %v928_v21 = vsel %vm910_vm15, %v3704_v10, %v922_v17  ;;  %vm897_vm7 = vcmp.eq.f32.partialorder %v3556_v7, 0.0  ;;  %vm4957_vm1 = vcmp.eq.f32.partialorder %v3556_v7, 3.0 }
 0x17a   : > { %4956 = vst [vmem:[#allocation18_spill] sm:$0xff] %v3967_v35  ;;  %v921_v9 = vsel %vm4957_vm1, %v3593_v36, 0.0  ;;  %2480 = vpow2.f32 %v2379_v60  ;;  %v1761_v38 = vmul.f32 1.5, %v2385_v27  ;;  %v2380_v37 = vmul.f32 -1.442695, %v3967_v35 }
 0x17b   : > { %v2386_v56 = vadd.f32 3.0, %v3967_v35  ;;  %v3984_v26 = vadd.f32 %v1664_v45, %v1576_v33  ;;  %v941_v32 = vsel %vm899_vm6, %v3696_v3, %v935_v61  ;;  %v934_v22 = vsel %vm904_vm2, %v3740_v14, %v928_v21  ;;  %v1670_v61 = vpop.f32.mrf.mxu0 }
 0x17c   : > { %v927_v5 = vsel %vm909_vm14, %v3642_v58, %v921_v9  ;;  %v3995_v17 = vfloor.f32 %v1761_v38  ;;  %2482 = vpow2.f32 %v2380_v37  ;;  %v3997_v27 = vadd.f32 %v1666_v30, %v1576_v33  ;;  %1213 = vmatprep.subr.mxu1 %v941_v32 }
 0x17d   : > { %4958 = vst [vmem:[#allocation19_spill] sm:$0xff] %v3984_v26  ;;  %v1762_v60 = vmul.f32 1.5, %v2386_v56  ;;  %v2381_v25 = vmul.f32 -1.442695, %v3984_v26  ;;  %v2387_v45 = vadd.f32 3.0, %v3984_v26  ;;  %v940_v21 = vsel %vm898_vm10, %v3689_v1, %v934_v22 }
 0x17e   : > { %4959 = vst [vmem:[#allocation20_spill] sm:$0xff] %v3995_v17  ;;  %4960 = vst [vmem:[#allocation21_spill] sm:$0xff] %v3997_v27  ;;  %v933_v9 = vsel %vm903_vm0, %v3678_v48, %v927_v5  ;;  %v1773_v35 = vsub.f32 %v1761_v38, %v3995_v17  ;;  %v2382_v33 = vmul.f32 -1.442695, %v3997_v27  ;;  %v2388_v56 = vadd.f32 3.0, %v3997_v27  ;;  %1214 = vmatpush1.msra.mxu1 %v940_v21 }
 0x17f   : > { %v4008_v37 = vfloor.f32 %v1762_v60  ;;  %2484 = vpow2.f32 %v2381_v25  ;;  %v1763_v30 = vmul.f32 1.5, %v2387_v45  ;;  %v1671_v32 = vadd.f32 %v1670_v61, %v3855_v15  ;;  %v1672_v25 = vpop.f32.mrf.mxu0 }
 0x180   : > { %v939_v22 = vsel %vm897_vm7, %v3635_v18, %v933_v9  ;;  %v1779_v26 = vmul.f32 %v1773_v35, %v1773_v35  ;;  %v1815_v13 = vsub.f32 1.0, %v1773_v35  ;;  %2486 = vpow2.f32 %v2382_v33 }
 0x181   : > { %4961 = vst [vmem:[#allocation22_spill] sm:$0xff] %v4008_v37  ;;  %v1774_v5 = vsub.f32 %v1762_v60, %v4008_v37  ;;  %1215 = vmatprep.subr.mxu1 %v939_v22  ;;  %v767_v38 = vadd.f32 1.0, %v3737_v29  ;;  %v4018_v17 = vfloor.f32 %v1763_v30  ;;  %v1764_v27 = vmul.f32 1.5, %v2388_v56 }
 0x182   : > { %v1677_v21 = vrot.slane %v1671_v32, 4  ;;  %v1785_v45 = vmul.f32 %v1779_v26, %v1773_v35  ;;  %v1821_v48 = vmul.f32 %v1815_v13, %v1815_v13  ;;  %2488 = vrcp.f32 %v3722_v19 }
 0x183   : > { %4962 = vst [vmem:[#allocation23_spill] sm:$0xff] %v4018_v17  ;;  %v1780_v61 = vmul.f32 %v1774_v5, %v1774_v5  ;;  %v1816_v58 = vsub.f32 1.0, %v1774_v5  ;;  %v1775_v9 = vsub.f32 %v1763_v30, %v4018_v17  ;;  %v4022_v18 = vfloor.f32 %v1764_v27 }
 0x184   : > { %v1797_v60 = vmul.f32 0.5, %v1785_v45  ;;  %v1827_v33 = vmul.f32 %v1821_v48, %v1815_v13  ;;  %v1673_v29 = vadd.f32 %v1672_v25, %v3855_v15  ;;  %2490 = vrcp.f32 %v767_v38 }
 0x185   : > { %v1786_v22 = vmul.f32 %v1780_v61, %v1774_v5  ;;  %v1822_v37 = vmul.f32 %v1816_v58, %v1816_v58  ;;  %v1781_v36 = vmul.f32 %v1775_v9, %v1775_v9  ;;  %v1817_v56 = vsub.f32 1.0, %v1775_v9 }
 0x186   : > { %v1776_v7 = vsub.f32 %v1764_v27, %v4022_v18  ;;  %v1803_v35 = vsub.f32 %v1797_v60, %v1779_v26  ;;  %v1681_v14 = vmul.f32 %v1677_v21, %v1671_v32  ;;  %v4028_v48 = vmul.f32 0.16666667, %v1785_v45 }
 0x187   : > { %v1798_v1 = vmul.f32 0.5, %v1786_v22  ;;  %v2481_v3 = vpop.eup %2480  ;;  %v1828_v19 = vmul.f32 %v1822_v37, %v1816_v58  ;;  %v1787_v10 = vmul.f32 %v1781_v36, %v1775_v9  ;;  %v1823_v30 = vmul.f32 %v1817_v56, %v1817_v56 }
 0x188   : > { %v4026_v17 = vmul.f32 %v1776_v7, %v1776_v7  ;;  %v1725_v20 = vadd.f32 1.0, %v2481_v3  ;;  %v1818_v13 = vsub.f32 1.0, %v1776_v7  ;;  %v1678_v15 = vrot.slane %v1673_v29, 4 }
 0x189   : > { %v2483_v5 = vpop.eup %2482  ;;  %v4030_v25 = vmul.f32 0.16666667, %v1827_v33  ;;  %v1804_v57 = vsub.f32 %v1798_v1, %v1780_v61  ;;  %v1799_v27 = vmul.f32 0.5, %v1787_v10  ;;  %v1829_v38 = vmul.f32 %v1823_v30, %v1817_v56 }
 0x18a   : > { %v4032_v26 = vadd.f32 0.6666667, %v1803_v35  ;;  %v1726_v32 = vadd.f32 1.0, %v2483_v5  ;;  %v4034_v21 = vmul.f32 0.16666667, %v1786_v22  ;;  %v1788_v58 = vmul.f32 %v4026_v17, %v1776_v7 }
 0x18b   : > { %v4037_v37 = vmul.f32 0.16666667, %v1828_v19  ;;  %v1805_v3 = vsub.f32 %v1799_v27, %v1781_v36  ;;  %v1824_v45 = vmul.f32 %v1818_v13, %v1818_v13  ;;  %v1689_v9 = vmul.f32 %v3867_v46, %v1681_v14 }
 0x18c   : > { %v2485_v60 = vpop.eup %2484  ;;  %2492 = vrcp.f32 %v1725_v20  ;;  %v4040_v33 = vmul.f32 0.16666667, %v1787_v10  ;;  %v4042_v1 = vmul.f32 0.5, %v1788_v58  ;;  %v1682_v61 = vmul.f32 %v1678_v15, %v1673_v29 }
 0x18d   : > { %v2487_v56 = vpop.eup %2486  ;;  %v4044_v35 = vadd.f32 0.6666667, %v1804_v57  ;;  %v1727_v22 = vadd.f32 1.0, %v2485_v60  ;;  %v4046_v30 = vmul.f32 0.16666667, %v1829_v38  ;;  %v1697_v7 = vadd.f32 %v3921_v24, %v1689_v9 }
 0x18e   : > { %2494 = vrcp.f32 %v1726_v32  ;;  %v4049_v36 = vadd.f32 0.6666667, %v1805_v3  ;;  %v4051_v19 = vmul.f32 0.16666667, %v1788_v58  ;;  %v1690_v14 = vmul.f32 %v3867_v46, %v1682_v61 }
 0x18f   : > { %v1728_v10 = vadd.f32 1.0, %v2487_v56  ;;  %v1830_v20 = vmul.f32 %v1824_v45, %v1818_v13  ;;  %v1701_v5 = vrot.slane %v1697_v7, 4  ;;  %v920_v57 = vsel %vm914_vm13, %v3586_v50, 0.0  ;;  %v2489_v29 = vpop.eup %2488 }
 0x190   : > { %v1806_v15 = vsub.f32 %v4042_v1, %v4026_v17  ;;  %v1698_v27 = vadd.f32 %v3921_v24, %v1690_v14  ;;  %vm896_vm0 = vcmp.eq.f32.partialorder %v3553_v51, 0.0  ;;  %vm4963_vm15 = vcmp.eq.f32.partialorder %v3553_v51, 2.0 }
 0x191   : > { %v926_v38 = vsel %vm4963_vm15, %v3650_v16, %v920_v57  ;;  %2496 = vrcp.f32 %v1727_v22  ;;  %vm4964_vm6 = vcmask 1043456   ;;  %vm4966_vm13 = vcmp.eq.f32.partialorder %v3548_v2, 3.0  ;;  %v2491_v45 = vpop.eup %2490 }
 0x192   : > { %v4065_v46 = vsel %vm4964_vm6, %v1697_v7, %v1701_v5  ;;  %v932_v13 = vsel %vm902_vm11, %v3711_v47, %v926_v38  ;;  %v919_v17 = vsel %vm4966_vm13, %v3566_v23, 0.0  ;;  %v1702_v58 = vrot.slane %v1698_v27, 4  ;;  %vm4967_vm11 = vmmov %vm4964_vm6 }
 0x193   : > { %4965 = vst [vmem:[#allocation24_spill] sm:$0xff] %v4065_v46  ;;  %v2383_v24 = vmul.f32 -1.442695, %v4065_v46  ;;  %v2389_v32 = vadd.f32 3.0, %v4065_v46  ;;  %v938_v3 = vsel %vm896_vm0, %v3580_v11, %v932_v13  ;;  %v4076_v9 = vmul.f32 0.16666667, %v1830_v20 }
 0x194   : > { %1216 = vmatpush1.msra.mxu1 %v938_v3  ;;  %vm895_vm14 = vcmp.eq.f32.partialorder %v3548_v2, 0.0  ;;  %v925_v60 = vsel %vm907_vm3, %v3573_v42, %v919_v17  ;;  %v918_v1 = vsel %vm912_vm12, %v3571_v41, 0.0  ;;  %v4086_v56 = vsel %vm4967_vm11, %v1698_v27, %v1702_v58  ;;  %vm4970_vm3 = vmmov %vm4954_vm8 }
 0x195   : > { %2498 = vpow2.f32 %v2383_v24  ;;  %v1765_v61 = vmul.f32 1.5, %v2389_v32  ;;  %4968 = vst [vmem:[#allocation25_spill] sm:$0xff] %v4086_v56  ;;  %vm4969_vm5 = vcmp.eq.f32.partialorder %v3548_v2, 1.0  ;;  %v2384_v7 = vmul.f32 -1.442695, %v4086_v56 }
 0x196   : > { %v931_v22 = vsel %vm4969_vm5, %v3598_v44, %v925_v60  ;;  %v2390_v14 = vadd.f32 3.0, %v4086_v56  ;;  %v924_v5 = vsel %vm4970_vm3, %v3575_v53, %v918_v1  ;;  %2500 = vrcp.f32 %v1728_v10  ;;  %v4985_v56 = vld [vmem:[#allocation10_spill] sm:$0xff] }
 0x197   : > { %v937_v20 = vsel %vm895_vm14, %v3577_v59, %v931_v22  ;;  %v4097_v57 = vfloor.f32 %v1765_v61  ;;  %vm894_vm12 = vcmp.eq.f32.partialorder %v3541_v52, 0.0  ;;  %v930_v27 = vsel %vm900_vm9, %v3632_v55, %v924_v5  ;;  %v4973_v22 = vld [vmem:[#allocation16_spill] sm:$0xff] }
 0x198   : > { %1217 = vmatprep.subr.mxu1 %v937_v20  ;;  %2502 = vpow2.f32 %v2384_v7  ;;  %v1766_v38 = vmul.f32 1.5, %v2390_v14  ;;  %v936_v13 = vsel %vm894_vm12, %v3564_v62, %v930_v27  ;;  %v785_v17 = vmul.f32 %v2491_v45, %v3613_v54 }
 0x199   : > { %v1777_v24 = vsub.f32 %v1765_v61, %v4097_v57  ;;  %1218 = vmatpush1.msra.mxu1 %v936_v13  ;;  %v784_v10 = vmul.f32 %v2489_v29, %v3603_v4  ;;  %v783_v32 = vmul.f32 %v3729_v6, %v3545_v12  ;;  %v782_v58 = vmul.f32 %v3713_v40, %v3539_v31  ;;  %v4111_v3 = vpop.eup %2492 }
 0x19a   : > { %v4113_v60 = vfloor.f32 %v1766_v38  ;;  %1219 = vmatprep.subr.mxu1 %v785_v17  ;;  %v781_v1 = vmul.f32 %v3665_v43, %v3535_v34  ;;  %vm1061_vm2 = vcmp.eq.f32.partialorder %v3644_v63, 7.0  ;;  %vm1097_vm4 = vcmp.eq.f32.partialorder %v3644_v63, 8.0  ;;  %v4972_v43 = vld [vmem:[#allocation12_spill] sm:$0xff]  ;;  %v4976_v17 = vld [vmem:[#allocation13_spill] sm:$0xff] }
 0x19b   : > { %v1783_v54 = vmul.f32 %v1777_v24, %v1777_v24  ;;  %v1819_v4 = vsub.f32 1.0, %v1777_v24  ;;  %1220 = vmatpush1.msra.mxu1 %v784_v10  ;;  %v1103_v12 = vsel %vm1097_vm4, %v3698_v49, 0.0  ;;  %vm1096_vm9 = vcmp.eq.f32.partialorder %v3637_v0, 8.0  ;;  %v4121_v31 = vpop.eup %2494  ;;  %v4978_v10 = vld [vmem:[#allocation15_spill] sm:$0xff] }
 0x19c   : > { %4971 = vst [vmem:[#allocation26_spill] sm:$0xff] %v4121_v31  ;;  %v1778_v40 = vsub.f32 %v1766_v38, %v4113_v60  ;;  %1221 = vmatprep.subr.mxu1 %v783_v32  ;;  %v780_v6 = vmul.f32 %v3656_v8, %v3531_v39  ;;  %v1109_v34 = vsel %vm1061_vm2, %v3715_v28, %v1103_v12  ;;  %v1102_v29 = vsel %vm1096_vm9, %v4972_v43, 0.0  ;;  %v4975_v8 = vld [vmem:[#allocation14_spill] sm:$0xff] }
 0x19d   : > { %v1789_v45 = vmul.f32 %v1783_v54, %v1777_v24  ;;  %v1825_v61 = vmul.f32 %v1819_v4, %v1819_v4  ;;  %1222 = vmatpush1.msra.mxu1 %v782_v58  ;;  %vm4974_vm8 = vcmp.eq.f32.partialorder %v3644_v63, 6.0  ;;  %vm1060_vm10 = vcmp.eq.f32.partialorder %v3637_v0, 7.0 }
 0x19e   : > { %v1115_v7 = vsel %vm4974_vm8, %v4973_v22, %v1109_v34  ;;  %v4134_v14 = vadd.f32 0.6666667, %v1806_v15  ;;  %v4136_v20 = vmul.f32 %v1778_v40, %v1778_v40  ;;  %v1820_v39 = vsub.f32 1.0, %v1778_v40  ;;  %1223 = vmatprep.subr.mxu1 %v781_v1  ;;  %v4141_v27 = vpop.eup %2496  ;;  %v4980_v1 = vld [vmem:[#allocation11_spill] sm:$0xff]  ;;  %v4982_v34 = vld [vmem:[#allocation6_spill] sm:$0xff] }
 0x19f   : > { %v1108_v5 = vsel %vm1060_vm10, %v4975_v8, %v1102_v29  ;;  %v1801_v38 = vmul.f32 0.5, %v1789_v45  ;;  %v1831_v13 = vmul.f32 %v1825_v61, %v1819_v4  ;;  %1224 = vmatpush1.msra.mxu1 %v780_v6  ;;  %vm4977_vm7 = vcmp.eq.f32.partialorder %v3644_v63, 5.0  ;;  %v4983_v29 = vld [vmem:[#allocation7_spill] sm:$0xff] }
 0x1a0   : > { %v1121_v24 = vsel %vm4977_vm7, %v4976_v17, %v1115_v7  ;;  %vm4979_vm1 = vcmp.eq.f32.partialorder %v3637_v0, 6.0  ;;  %v1790_v32 = vmul.f32 %v4136_v20, %v1778_v40  ;;  %v1826_v58 = vmul.f32 %v1820_v39, %v1820_v39 }
 0x1a1   : > { %v1114_v15 = vsel %vm4979_vm1, %v4978_v10, %v1108_v5  ;;  %1247 = vmatprep.subr.mxu1 %v1121_v24  ;;  %vm4981_vm0 = vcmp.eq.f32.partialorder %v3637_v0, 5.0  ;;  %vm1095_vm15 = vcmp.eq.f32.partialorder %v4982_v34, 8.0  ;;  %v4154_v4 = vmul.f32 0.16666667, %v1789_v45  ;;  %v4984_v24 = vld [vmem:[#allocation9_spill] sm:$0xff] }
 0x1a2   : > { %v1120_v12 = vsel %vm4981_vm0, %v4980_v1, %v1114_v15  ;;  %v1807_v6 = vsub.f32 %v1801_v38, %v1783_v54  ;;  %vm1059_vm6 = vcmp.eq.f32.partialorder %v4982_v34, 7.0  ;;  %v1101_v61 = vsel %vm1095_vm15, %v4983_v29, 0.0  ;;  %v2499_v7 = vpop.eup %2498 }
 0x1a3   : > { %1248 = vmatpush2.msra.mxu1 %v1120_v12  ;;  %v4158_v5 = vmul.f32 0.16666667, %v1831_v13  ;;  %v1802_v40 = vmul.f32 0.5, %v1790_v32  ;;  %v1832_v31 = vmul.f32 %v1826_v58, %v1820_v39  ;;  %v1107_v46 = vsel %vm1059_vm6, %v4984_v24, %v1101_v61  ;;  %v4168_v54 = vpop.eup %2500  ;;  %v4988_v39 = vld [vmem:[#allocation8_spill] sm:$0xff] }
 0x1a4   : > { %v1729_v15 = vadd.f32 1.0, %v2499_v7  ;;  %vm4986_vm13 = vcmp.eq.f32.partialorder %v4982_v34, 6.0  ;;  %vm1058_vm14 = vcmp.eq.f32.partialorder %v3553_v51, 7.0  ;;  %vm1094_vm11 = vcmp.eq.f32.partialorder %v3553_v51, 8.0  ;;  %4987 = vst [vmem:[#allocation12_spill] sm:$0xff] %v4168_v54 }
 0x1a5   : > { %v1113_v45 = vsel %vm4986_vm13, %v4985_v56, %v1107_v46  ;;  %v4170_v38 = vadd.f32 0.6666667, %v1807_v6  ;;  %v4172_v13 = vmul.f32 0.16666667, %v1790_v32  ;;  %vm4989_vm5 = vcmp.eq.f32.partialorder %v4982_v34, 5.0  ;;  %v2503_v61 = vpop.eup %2502 }
 0x1a6   : > { %v1119_v58 = vsel %vm4989_vm5, %v4988_v39, %v1113_v45  ;;  %v1100_v12 = vsel %vm1094_vm11, %v3586_v50, 0.0  ;;  %v1808_v7 = vsub.f32 %v1802_v40, %v4136_v20  ;;  %v4179_v46 = vmul.f32 0.16666667, %v1832_v31 }
 0x1a7   : > { %1249 = vmatprep.subr.mxu1 %v1119_v58  ;;  %v1106_v54 = vsel %vm1058_vm14, %v3650_v16, %v1100_v12  ;;  %vm1093_vm3 = vcmp.eq.f32.partialorder %v3548_v2, 8.0  ;;  %2504 = vrcp.f32 %v1729_v15  ;;  %vm4990_vm12 = vcmp.eq.f32.partialorder %v3553_v51, 6.0  ;;  %v5011_v58 = vld [vmem:[#allocation20_spill] sm:$0xff] }
 0x1a8   : > { %v1112_v32 = vsel %vm4990_vm12, %v3711_v47, %v1106_v54  ;;  %v1099_v6 = vsel %vm1093_vm3, %v3566_v23, 0.0  ;;  %vm1092_vm4 = vcmp.eq.f32.partialorder %v3541_v52, 8.0  ;;  %vm4991_vm9 = vcmp.eq.f32.partialorder %v3553_v51, 5.0 }
 0x1a9   : > { %v1118_v31 = vsel %vm4991_vm9, %v3580_v11, %v1112_v32  ;;  %vm4992_vm8 = vcmp.eq.f32.partialorder %v3548_v2, 7.0  ;;  %v1098_v40 = vsel %vm1092_vm4, %v3571_v41, 0.0  ;;  %v1067_v15 = vsel %vm1061_vm2, %v3698_v49, 0.0  ;;  %v4305_v32 = vld [vmem:[%s4838_s5 + $0x10] sm:$0xff] }
 0x1aa   : > { %v1105_v20 = vsel %vm4992_vm8, %v3573_v42, %v1099_v6  ;;  %v1730_v45 = vadd.f32 1.0, %v2503_v61  ;;  %1250 = vmatpush2.msra.mxu1 %v1118_v31  ;;  %vm4993_vm7 = vcmp.eq.f32.partialorder %v3548_v2, 6.0  ;;  %vm4994_vm1 = vcmp.eq.f32.partialorder %v3541_v52, 7.0 }
 0x1ab   : > { %v1111_v23 = vsel %vm4993_vm7, %v3598_v44, %v1105_v20  ;;  %v1104_v54 = vsel %vm4994_vm1, %v3575_v53, %v1098_v40  ;;  %vm4995_vm0 = vcmp.eq.f32.partialorder %v3644_v63, 6.0  ;;  %vm4996_vm15 = vcmp.eq.f32.partialorder %v3548_v2, 5.0 }
 0x1ac   : > { %v1073_v42 = vsel %vm4995_vm0, %v3715_v28, %v1067_v15  ;;  %v1117_v41 = vsel %vm4996_vm15, %v3577_v59, %v1111_v23  ;;  %vm4997_vm2 = vcmp.eq.f32.partialorder %v3541_v52, 6.0  ;;  %vm4998_vm13 = vcmp.eq.f32.partialorder %v3644_v63, 5.0 }
 0x1ad   : > { %v1110_v49 = vsel %vm4997_vm2, %v3632_v55, %v1104_v54  ;;  %v1079_v44 = vsel %vm4998_vm13, %v4973_v22, %v1073_v42  ;;  %v1066_v53 = vsel %vm1060_vm10, %v4972_v43, 0.0  ;;  %1251 = vmatprep.subr.mxu1 %v1117_v41  ;;  %vm4999_vm11 = vcmp.eq.f32.partialorder %v3541_v52, 5.0 }
 0x1ae   : > { %v1116_v28 = vsel %vm4999_vm11, %v3564_v62, %v1110_v49  ;;  %vm5000_vm5 = vcmp.eq.f32.partialorder %v3644_v63, 4.0  ;;  %vm5001_vm3 = vcmp.eq.f32.partialorder %v3637_v0, 6.0  ;;  %v1065_v55 = vsel %vm1059_vm6, %v4983_v29, 0.0 }
 0x1af   : > { %v1085_v2 = vsel %vm5000_vm5, %v4976_v17, %v1079_v44  ;;  %v1072_v59 = vsel %vm5001_vm3, %v4975_v8, %v1066_v53  ;;  %1252 = vmatpush2.msra.mxu1 %v1116_v28  ;;  %vm5002_vm10 = vcmp.eq.f32.partialorder %v3637_v0, 5.0  ;;  %vm5003_vm12 = vcmp.eq.f32.partialorder %v4982_v34, 6.0  ;;  %v2510_v44 = vld [vmem:[%s4838_s5 + $0x8] sm:$0xff] }
 0x1b0   : > { %v1078_v43 = vsel %vm5002_vm10, %v4978_v10, %v1072_v59  ;;  %v1071_v52 = vsel %vm5003_vm12, %v4984_v24, %v1065_v55  ;;  %v1064_v62 = vsel %vm1058_vm14, %v3586_v50, 0.0  ;;  %v1840_v63 = vsub.f32 1.0, %v4037_v37  ;;  %1253 = vmatprep.subr.mxu1 %v1085_v2 }
 0x1b1   : > { %v4243_v22 = vadd.f32 0.6666667, %v1808_v7  ;;  %vm5004_vm6 = vcmp.eq.f32.partialorder %v3637_v0, 4.0  ;;  %vm5005_vm4 = vcmp.eq.f32.partialorder %v4982_v34, 5.0  ;;  %vm5006_vm9 = vcmp.eq.f32.partialorder %v3553_v51, 6.0  ;;  %v4263_v0 = vld [vmem:[%s4838_s5] sm:$0xff] }
 0x1b2   : > { %v1084_v8 = vsel %vm5004_vm6, %v4980_v1, %v1078_v43  ;;  %v1077_v17 = vsel %vm5005_vm4, %v4985_v56, %v1071_v52  ;;  %v1070_v10 = vsel %vm5006_vm9, %v3650_v16, %v1064_v62  ;;  %2506 = vrcp.f32 %v1730_v45  ;;  %v5010_v1 = vld [vmem:[#allocation22_spill] sm:$0xff] }
 0x1b3   : > { %1254 = vmatpush2.msra.mxu1 %v1084_v8  ;;  %vm5007_vm14 = vcmp.eq.f32.partialorder %v4982_v34, 4.0  ;;  %vm5008_vm8 = vcmp.eq.f32.partialorder %v3553_v51, 5.0  ;;  %v1846_v56 = vsub.f32 %v1840_v63, %v4044_v35  ;;  %vm5009_vm7 = vcmp.eq.f32.partialorder %v3553_v51, 4.0 }
 0x1b4   : > { %v1083_v50 = vsel %vm5007_vm14, %v4988_v39, %v1077_v17  ;;  %v1076_v29 = vsel %vm5008_vm8, %v3711_v47, %v1070_v10  ;;  %vm1912_vm1 = vcmp.eq.f32.partialorder %v5010_v1, 4.0  ;;  %vm4903_vm0 = vcmp.eq.f32.partialorder %v5010_v1, 7.0  ;;  %v4275_v47 = vld [vmem:[%s4838_s5 + $0x18] sm:$0xff]  ;;  %v4315_v20 = vpop.eup %2504 }
 0x1b5   : > { %1255 = vmatprep.subr.mxu1 %v1083_v50  ;;  %v1082_v16 = vsel %vm5009_vm7, %v3580_v11, %v1076_v29  ;;  %v1839_v34 = vsub.f32 1.0, %v4030_v25  ;;  %v4278_v24 = vsub.f32 %v1846_v56, %v4034_v21  ;;  %vm4917_vm15 = vcmp.eq.f32.partialorder %v5010_v1, 5.0 }
 0x1b6   : > { %1256 = vmatpush2.msra.mxu1 %v1082_v16  ;;  %vm4910_vm2 = vcmp.eq.f32.partialorder %v5010_v1, 6.0  ;;  %v2026_v51 = vsel %vm4903_vm0, %v4037_v37, 0.0  ;;  %vm4914_vm13 = vcmp.eq.f32.partialorder %v5011_v58, 4.0  ;;  %vm4902_vm11 = vcmp.eq.f32.partialorder %v5011_v58, 7.0 }
 0x1b7   : > { %1258 = vmatmul.mubr.f32.vlgmr.msra.gmra.mxu1 %v4263_v0  ;;  %v2032_v11 = vsel %vm4910_vm2, %v4044_v35, %v2026_v51  ;;  %v1845_v39 = vsub.f32 %v1839_v34, %v4032_v26  ;;  %vm4916_vm5 = vcmp.eq.f32.partialorder %v5011_v58, 5.0  ;;  %v2025_v61 = vsel %vm4902_vm11, %v4030_v25, 0.0  ;;  %v5014_v34 = vld [vmem:[#allocation23_spill] sm:$0xff] }
 0x1b8   : > { %v2038_v12 = vsel %vm4917_vm15, %v4278_v24, %v2032_v11  ;;  %v1844_v7 = vsub.f32 1.0, %v4179_v46  ;;  %vm5012_vm3 = vcmask 326656   ;;  %vm4912_vm10 = vcmp.eq.f32.partialorder %v5011_v58, 6.0 }
 0x1b9   : > { %2367 = vmatprep.mubr.msk.f32.mxu1 %vm5012_vm3, %v4275_v47  ;;  %v2044_v6 = vsel %vm1912_vm1, %v4034_v21, %v2038_v12  ;;  %v4311_v31 = vsub.f32 %v1845_v39, %v4028_v48  ;;  %vm1880_vm12 = vcmp.eq.f32.partialorder %v4113_v60, 3.0  ;;  %v2031_v40 = vsel %vm4912_vm10, %v4032_v26, %v2025_v61  ;;  %vm5013_vm8 = vmmov %vm5012_vm3 }
 0x1ba   : > { %2155 = vmatprep.subr.mxu1 %v2044_v6  ;;  %v1850_v15 = vsub.f32 %v1844_v7, %v4243_v22  ;;  %vm4905_vm6 = vcmp.eq.f32.partialorder %v4113_v60, 6.0  ;;  %v1843_v45 = vsub.f32 1.0, %v4158_v5  ;;  %vm4915_vm4 = vcmp.eq.f32.partialorder %v4113_v60, 4.0 }
 0x1bb   : > { %v2037_v23 = vsel %vm4916_vm5, %v4311_v31, %v2031_v40  ;;  %vm4913_vm9 = vcmp.eq.f32.partialorder %v4113_v60, 5.0  ;;  %v1994_v54 = vsel %vm4905_vm6, %v4179_v46, 0.0  ;;  %1264 = vmatmul.mubr.f32.gmra.mxu1 %v4305_v32  ;;  %vm4907_vm14 = vcmp.eq.f32.partialorder %v4097_v57, 3.0 }
 0x1bc   : > { %v2043_v42 = vsel %vm4914_vm13, %v4028_v48, %v2037_v23  ;;  %v4336_v41 = vsub.f32 %v1850_v15, %v4172_v13  ;;  %v1849_v49 = vsub.f32 %v1843_v45, %v4170_v38  ;;  %2391 = vmatprep.mubr.msk.f32.mxu1 %vm5013_vm8, %v2510_v44  ;;  %v2000_v53 = vsel %vm4913_vm9, %v4243_v22, %v1994_v54 }
 0x1bd   : > { %2156 = vmatpush1.msra.mxu1 %v2043_v42  ;;  %vm4906_vm7 = vcmp.eq.f32.partialorder %v4097_v57, 4.0  ;;  %vm4904_vm3 = vcmp.eq.f32.partialorder %v4097_v57, 6.0  ;;  %v1842_v28 = vsub.f32 1.0, %v4076_v9  ;;  %vm4908_vm8 = vcmp.eq.f32.partialorder %v4097_v57, 5.0 }
 0x1be   : > { %v2006_v2 = vsel %vm4915_vm4, %v4336_v41, %v2000_v53  ;;  %v4354_v59 = vsub.f32 %v1849_v49, %v4154_v4  ;;  %v1993_v55 = vsel %vm4904_vm3, %v4158_v5, 0.0  ;;  %vm1878_vm11 = vcmp.eq.f32.partialorder %v4022_v18, 3.0 }
 0x1bf   : > { %v2012_v43 = vsel %vm1880_vm12, %v4172_v13, %v2006_v2  ;;  %v1999_v52 = vsel %vm4908_vm8, %v4170_v38, %v1993_v55  ;;  %v1848_v62 = vsub.f32 %v1842_v28, %v4134_v14  ;;  %vm4922_vm0 = vcmp.eq.f32.partialorder %v4022_v18, 4.0  ;;  %v4374_v17 = vpop.eup %2506 }
 0x1c0   : > { %2157 = vmatprep.subr.mxu1 %v2012_v43  ;;  %v2005_v63 = vsel %vm4906_vm7, %v4354_v59, %v1999_v52  ;;  %vm4909_vm3 = vcmp.eq.f32.partialorder %v4022_v18, 6.0  ;;  %v1841_v8 = vsub.f32 1.0, %v4046_v30  ;;  %vm4919_vm6 = vcmp.eq.f32.partialorder %v4022_v18, 5.0 }
 0x1c1   : > { %v2011_v10 = vsel %vm4907_vm14, %v4154_v4, %v2005_v63  ;;  %v4380_v50 = vsub.f32 %v1848_v62, %v4051_v19  ;;  %v1992_v29 = vsel %vm4909_vm3, %v4076_v9, 0.0  ;;  %vm1877_vm7 = vcmp.eq.f32.partialorder %v5014_v34, 3.0 }
 0x1c2   : > { %2158 = vmatpush1.msra.mxu1 %v2011_v10  ;;  %v1998_v56 = vsel %vm4919_vm6, %v4134_v14, %v1992_v29  ;;  %v1847_v16 = vsub.f32 %v1841_v8, %v4049_v36  ;;  %vm4911_vm14 = vcmp.eq.f32.partialorder %v5014_v34, 6.0  ;;  %vm4923_vm8 = vcmp.eq.f32.partialorder %v5014_v34, 4.0 }
 0x1c3   : > { %v2004_v51 = vsel %vm4922_vm0, %v4380_v50, %v1998_v56  ;;  %v1991_v11 = vsel %vm4911_vm14, %v4046_v30, 0.0  ;;  %v1990_v39 = vsel %vm4910_vm2, %v4037_v37, 0.0  ;;  %vm4918_vm3 = vcmp.eq.f32.partialorder %v5014_v34, 5.0 }
 0x1c4   : > { %v2010_v12 = vsel %vm1878_vm11, %v4051_v19, %v2004_v51  ;;  %v4406_v61 = vsub.f32 %v1847_v16, %v4040_v33  ;;  %v1996_v7 = vsel %vm4917_vm15, %v4044_v35, %v1990_v39  ;;  %v1997_v6 = vsel %vm4918_vm3, %v4049_v36, %v1991_v11 }
 0x1c5   : > { %2159 = vmatprep.subr.mxu1 %v2010_v12  ;;  %vm1876_vm2 = vcmp.eq.f32.partialorder %v5010_v1, 3.0  ;;  %v2002_v40 = vsel %vm1912_vm1, %v4278_v24, %v1996_v7  ;;  %v1989_v15 = vsel %vm4912_vm10, %v4030_v25, 0.0  ;;  %vm1875_vm14 = vcmp.eq.f32.partialorder %v5011_v58, 3.0 }
 0x1c6   : > { %v2003_v45 = vsel %vm4923_vm8, %v4406_v61, %v1997_v6  ;;  %v1995_v23 = vsel %vm4916_vm5, %v4032_v26, %v1989_v15  ;;  %v1958_v54 = vsel %vm4913_vm9, %v4179_v46, 0.0  ;;  %vm1874_vm10 = vcmp.eq.f32.partialorder %v4113_v60, 2.0 }
 0x1c7   : > { %v2009_v42 = vsel %vm1877_vm7, %v4040_v33, %v2003_v45  ;;  %v2001_v49 = vsel %vm4914_vm13, %v4311_v31, %v1995_v23  ;;  %v1964_v44 = vsel %vm4915_vm4, %v4243_v22, %v1958_v54  ;;  %v2008_v53 = vsel %vm1876_vm2, %v4034_v21, %v2002_v40 }
 0x1c8   : > { %2160 = vmatpush1.msra.mxu1 %v2009_v42  ;;  %v1970_v28 = vsel %vm1880_vm12, %v4336_v41, %v1964_v44  ;;  %vm1873_vm9 = vcmp.eq.f32.partialorder %v4097_v57, 2.0  ;;  %vm5015_vm13 = vcmp.eq.f32.partialorder %v4097_v57, 5.0  ;;  %v2007_v55 = vsel %vm1875_vm14, %v4028_v48, %v2001_v49 }
 0x1c9   : > { %v1957_v2 = vsel %vm5015_vm13, %v4158_v5, 0.0  ;;  %2161 = vmatprep.subr.mxu1 %v2008_v53  ;;  %vm5016_vm4 = vcmp.eq.f32.partialorder %v4097_v57, 4.0  ;;  %vm1872_vm5 = vcmp.eq.f32.partialorder %v4022_v18, 2.0  ;;  %v1956_v52 = vsel %vm4919_vm6, %v4076_v9, 0.0 }
 0x1ca   : > { %v1963_v43 = vsel %vm5016_vm4, %v4170_v38, %v1957_v2  ;;  %2162 = vmatpush1.msra.mxu1 %v2007_v55  ;;  %v1976_v62 = vsel %vm1874_vm10, %v4172_v13, %v1970_v28  ;;  %vm5017_vm13 = vcmp.eq.f32.partialorder %v4097_v57, 3.0  ;;  %v1962_v8 = vsel %vm4922_vm0, %v4134_v14, %v1956_v52 }
 0x1cb   : > { %v1969_v63 = vsel %vm5017_vm13, %v4354_v59, %v1963_v43  ;;  %v1955_v10 = vsel %vm4918_vm3, %v4046_v30, 0.0  ;;  %2163 = vmatprep.subr.mxu1 %v1976_v62  ;;  %v1968_v56 = vsel %vm1878_vm11, %v4380_v50, %v1962_v8  ;;  %v1954_v51 = vsel %vm4917_vm15, %v4037_v37, 0.0 }
 0x1cc   : > { %v1975_v29 = vsel %vm1873_vm9, %v4154_v4, %v1969_v63  ;;  %v1961_v16 = vsel %vm4923_vm8, %v4049_v36, %v1955_v10  ;;  %v1974_v11 = vsel %vm1872_vm5, %v4051_v19, %v1968_v56  ;;  %vm4920_vm4 = vcmp.eq.f32.partialorder %v5014_v34, 2.0 }
 0x1cd   : > { %2164 = vmatpush1.msra.mxu1 %v1975_v29  ;;  %v1967_v39 = vsel %vm1877_vm7, %v4406_v61, %v1961_v16  ;;  %v1960_v12 = vsel %vm1912_vm1, %v4044_v35, %v1954_v51  ;;  %vm4921_vm13 = vcmp.eq.f32.partialorder %v5010_v1, 2.0  ;;  %vm5018_vm15 = vcmp.eq.f32.partialorder %v5011_v58, 5.0 }
 0x1ce   : > { %2165 = vmatprep.subr.mxu1 %v1974_v11  ;;  %v1973_v7 = vsel %vm4920_vm4, %v4040_v33, %v1967_v39  ;;  %v1966_v6 = vsel %vm1876_vm2, %v4278_v24, %v1960_v12  ;;  %v1953_v40 = vsel %vm5018_vm15, %v4030_v25, 0.0  ;;  %vm1869_vm3 = vcmp.eq.f32.partialorder %v5011_v58, 2.0 }
 0x1cf   : > { %2166 = vmatpush1.msra.mxu1 %v1973_v7  ;;  %v1972_v15 = vsel %vm4921_vm13, %v4034_v21, %v1966_v6  ;;  %vm5019_vm6 = vcmp.eq.f32.partialorder %v5011_v58, 4.0  ;;  %vm5020_vm4 = vcmp.eq.f32.partialorder %v4113_v60, 4.0  ;;  %vm1868_vm15 = vcmp.eq.f32.partialorder %v4113_v60, 1.0 }
 0x1d0   : > { %v1959_v45 = vsel %vm5019_vm6, %v4032_v26, %v1953_v40  ;;  %v1922_v23 = vsel %vm5020_vm4, %v4179_v46, 0.0  ;;  %2167 = vmatprep.subr.mxu1 %v1972_v15  ;;  %vm5021_vm13 = vcmp.eq.f32.partialorder %v4097_v57, 4.0  ;;  %vm5022_vm6 = vcmp.eq.f32.partialorder %v4097_v57, 3.0 }
 0x1d1   : > { %v1965_v54 = vsel %vm1875_vm14, %v4311_v31, %v1959_v45  ;;  %v1928_v42 = vsel %vm1880_vm12, %v4243_v22, %v1922_v23  ;;  %v1921_v49 = vsel %vm5021_vm13, %v4158_v5, 0.0  ;;  %v1920_v2 = vsel %vm4922_vm0, %v4076_v9, 0.0 }
 0x1d2   : > { %v1971_v44 = vsel %vm1869_vm3, %v4028_v48, %v1965_v54  ;;  %v1934_v53 = vsel %vm1874_vm10, %v4336_v41, %v1928_v42  ;;  %v1927_v28 = vsel %vm5022_vm6, %v4170_v38, %v1921_v49  ;;  %vm1867_vm4 = vcmp.eq.f32.partialorder %v4097_v57, 1.0 }
 0x1d3   : > { %2168 = vmatpush1.msra.mxu1 %v1971_v44  ;;  %v1940_v55 = vsel %vm1868_vm15, %v4172_v13, %v1934_v53  ;;  %v1933_v43 = vsel %vm1873_vm9, %v4354_v59, %v1927_v28  ;;  %v1926_v52 = vsel %vm1878_vm11, %v4134_v14, %v1920_v2  ;;  %vm4924_vm13 = vcmp.eq.f32.partialorder %v4022_v18, 1.0 }
 0x1d4   : > { %2169 = vmatprep.subr.mxu1 %v1940_v55  ;;  %v1939_v62 = vsel %vm1867_vm4, %v4154_v4, %v1933_v43  ;;  %v1932_v63 = vsel %vm1872_vm5, %v4380_v50, %v1926_v52  ;;  %v1919_v8 = vsel %vm4923_vm8, %v4046_v30, 0.0  ;;  %vm1865_vm6 = vcmp.eq.f32.partialorder %v5014_v34, 1.0 }
 0x1d5   : > { %2170 = vmatpush1.msra.mxu1 %v1939_v62  ;;  %v1938_v10 = vsel %vm4924_vm13, %v4051_v19, %v1932_v63  ;;  %v1925_v29 = vsel %vm1877_vm7, %v4049_v36, %v1919_v8  ;;  %v1918_v56 = vsel %vm1912_vm1, %v4037_v37, 0.0  ;;  %vm5023_vm0 = vcmp.eq.f32.partialorder %v5014_v34, 2.0 }
 0x1d6   : > { %2171 = vmatprep.subr.mxu1 %v1938_v10  ;;  %v1931_v16 = vsel %vm5023_vm0, %v4406_v61, %v1925_v29  ;;  %vm1864_vm8 = vcmp.eq.f32.partialorder %v5010_v1, 1.0  ;;  %v1924_v51 = vsel %vm1876_vm2, %v4044_v35, %v1918_v56  ;;  %vm5024_vm13 = vcmp.eq.f32.partialorder %v5011_v58, 4.0 }
 0x1d7   : > { %v1917_v11 = vsel %vm5024_vm13, %v4030_v25, 0.0  ;;  %v1937_v39 = vsel %vm1865_vm6, %v4040_v33, %v1931_v16  ;;  %vm5025_vm1 = vcmp.eq.f32.partialorder %v5010_v1, 2.0  ;;  %v1886_v6 = vsel %vm1880_vm12, %v4179_v46, 0.0 }
 0x1d8   : > { %v1930_v12 = vsel %vm5025_vm1, %v4278_v24, %v1924_v51  ;;  %v1923_v7 = vsel %vm1875_vm14, %v4032_v26, %v1917_v11  ;;  %2172 = vmatpush1.msra.mxu1 %v1937_v39  ;;  %vm1863_vm0 = vcmp.eq.f32.partialorder %v5011_v58, 1.0  ;;  %v1892_v45 = vsel %vm1874_vm10, %v4243_v22, %v1886_v6  ;;  %v5030_v11 = vld [vmem:[#allocation17_spill] sm:$0xff]  ;;  %v5031_v6 = vld [vmem:[#allocation19_spill] sm:$0xff] }
 0x1d9   : > { %v1936_v40 = vsel %vm1864_vm8, %v4034_v21, %v1930_v12  ;;  %v1929_v15 = vsel %vm1869_vm3, %v4311_v31, %v1923_v7  ;;  %vm1862_vm12 = vcmp.eq.f32.partialorder %v4113_v60, 0.0  ;;  %v1898_v54 = vsel %vm1868_vm15, %v4336_v41, %v1892_v45  ;;  %v5032_v45 = vld [vmem:[#allocation25_spill] sm:$0xff] }
 0x1da   : > { %2173 = vmatprep.subr.mxu1 %v1936_v40  ;;  %v1935_v23 = vsel %vm1863_vm0, %v4028_v48, %v1929_v15  ;;  %vm5026_vm13 = vcmp.eq.f32.partialorder %v4097_v57, 3.0  ;;  %v1904_v49 = vsel %vm1862_vm12, %v4172_v13, %v1898_v54  ;;  %vm1861_vm10 = vcmp.eq.f32.partialorder %v4097_v57, 0.0 }
 0x1db   : > { %v1885_v42 = vsel %vm5026_vm13, %v4158_v5, 0.0  ;;  %2174 = vmatpush1.msra.mxu1 %v1935_v23  ;;  %v1884_v53 = vsel %vm1878_vm11, %v4076_v9, 0.0  ;;  %vm1860_vm15 = vcmp.eq.f32.partialorder %v4022_v18, 0.0  ;;  %v1883_v55 = vsel %vm1877_vm7, %v4046_v30, 0.0  ;;  %vm5029_vm7 = vmmov %vm5025_vm1 }
 0x1dc   : > { %v1891_v44 = vsel %vm1873_vm9, %v4170_v38, %v1885_v42  ;;  %2175 = vmatprep.subr.mxu1 %v1904_v49  ;;  %v1890_v2 = vsel %vm1872_vm5, %v4134_v14, %v1884_v53  ;;  %vm5027_vm11 = vcmp.eq.f32.partialorder %v4022_v18, 1.0  ;;  %vm5028_vm9 = vcmp.eq.f32.partialorder %v5014_v34, 2.0  ;;  %v5035_v53 = vld [vmem:[#allocation12_spill] sm:$0xff] }
 0x1dd   : > { %v1897_v28 = vsel %vm1867_vm4, %v4354_v59, %v1891_v44  ;;  %v1896_v52 = vsel %vm5027_vm11, %v4380_v50, %v1890_v2  ;;  %v1889_v62 = vsel %vm5028_vm9, %v4049_v36, %v1883_v55  ;;  %v1882_v63 = vsel %vm1876_vm2, %v4037_v37, 0.0  ;;  %v5034_v44 = vld [vmem:[#allocation21_spill] sm:$0xff]  ;;  %v5036_v2 = vld [vmem:[#allocation18_spill] sm:$0xff] }
 0x1de   : > { %v1903_v43 = vsel %vm1861_vm10, %v4154_v4, %v1897_v28  ;;  %v1902_v8 = vsel %vm1860_vm15, %v4051_v19, %v1896_v52  ;;  %vm1859_vm5 = vcmp.eq.f32.partialorder %v5014_v34, 0.0  ;;  %v1895_v10 = vsel %vm1865_vm6, %v4406_v61, %v1889_v62 }
 0x1df   : > { %2176 = vmatpush1.msra.mxu1 %v1903_v43  ;;  %v1888_v29 = vsel %vm5029_vm7, %v4044_v35, %v1882_v63  ;;  %v1901_v56 = vsel %vm1859_vm5, %v4040_v33, %v1895_v10  ;;  %vm1858_vm4 = vcmp.eq.f32.partialorder %v5010_v1, 0.0  ;;  %v1881_v51 = vsel %vm1875_vm14, %v4030_v25, 0.0 }
 0x1e0   : > { %2177 = vmatprep.subr.mxu1 %v1902_v8  ;;  %v1894_v16 = vsel %vm1864_vm8, %v4278_v24, %v1888_v29  ;;  %v1743_v39 = vmul.f32 %v4111_v3, %v5030_v11  ;;  %v1887_v7 = vsel %vm1869_vm3, %v4032_v26, %v1881_v51  ;;  %v1745_v40 = vmul.f32 %v4141_v27, %v5031_v6  ;;  %v5033_v27 = vld [vmem:[#allocation24_spill] sm:$0xff] }
 0x1e1   : > { %2178 = vmatpush1.msra.mxu1 %v1901_v56  ;;  %v1900_v12 = vsel %vm1858_vm4, %v4034_v21, %v1894_v16  ;;  %vm1857_vm2 = vcmp.eq.f32.partialorder %v5011_v58, 0.0  ;;  %v1893_v15 = vsel %vm1863_vm0, %v4311_v31, %v1887_v7  ;;  %vm2060_vm14 = vcmp.eq.f32.partialorder %v4113_v60, 8.0 }
 0x1e2   : > { %2179 = vmatprep.subr.mxu1 %v1900_v12  ;;  %v1899_v3 = vsel %vm1857_vm2, %v4028_v48, %v1893_v15  ;;  %v1748_v23 = vmul.f32 %v4374_v17, %v5032_v45  ;;  %v2066_v54 = vsel %vm2060_vm14, %v4179_v46, 0.0  ;;  %vm2059_vm3 = vcmp.eq.f32.partialorder %v4097_v57, 8.0  ;;  %v5037_v17 = vld [vmem:[#allocation26_spill] sm:$0xff] }
 0x1e3   : > { %2180 = vmatpush1.msra.mxu1 %v1899_v3  ;;  %v1747_v42 = vmul.f32 %v4315_v20, %v5033_v27  ;;  %vm2024_vm8 = vcmp.eq.f32.partialorder %v4113_v60, 7.0  ;;  %v2065_v49 = vsel %vm2059_vm3, %v4158_v5, 0.0  ;;  %vm2058_vm6 = vcmp.eq.f32.partialorder %v4022_v18, 8.0 }
 0x1e4   : > { %2181 = vmatprep.subr.mxu1 %v1748_v23  ;;  %v1746_v28 = vmul.f32 %v5035_v53, %v5034_v44  ;;  %v1744_v55 = vmul.f32 %v5037_v17, %v5036_v2  ;;  %v2072_v43 = vsel %vm2024_vm8, %v4243_v22, %v2066_v54  ;;  %v2064_v52 = vsel %vm2058_vm6, %v4076_v9, 0.0 }
 0x1e5   : > { %2182 = vmatpush1.msra.mxu1 %v1747_v42  ;;  %vm5038_vm1 = vcmp.eq.f32.partialorder %v4113_v60, 6.0  ;;  %vm2023_vm0 = vcmp.eq.f32.partialorder %v4097_v57, 7.0  ;;  %vm2022_vm12 = vcmp.eq.f32.partialorder %v4022_v18, 7.0  ;;  %vm2057_vm13 = vcmp.eq.f32.partialorder %v5014_v34, 8.0 }
 0x1e6   : > { %v2078_v20 = vsel %vm5038_vm1, %v4336_v41, %v2072_v43  ;;  %2183 = vmatprep.subr.mxu1 %v1746_v28  ;;  %v2071_v62 = vsel %vm2023_vm0, %v4170_v38, %v2065_v49  ;;  %vm2021_vm10 = vcmp.eq.f32.partialorder %v5014_v34, 7.0  ;;  %v2063_v63 = vsel %vm2057_vm13, %v4046_v30, 0.0 }
 0x1e7   : > { %vm2056_vm15 = vcmp.eq.f32.partialorder %v5010_v1, 8.0  ;;  %2184 = vmatpush1.msra.mxu1 %v1745_v40  ;;  %vm5039_vm11 = vcmp.eq.f32.partialorder %v4097_v57, 6.0  ;;  %v2070_v10 = vsel %vm2022_vm12, %v4134_v14, %v2064_v52  ;;  %vm2055_vm9 = vcmp.eq.f32.partialorder %v5011_v58, 8.0 }
 0x1e8   : > { %v2077_v8 = vsel %vm5039_vm11, %v4354_v59, %v2071_v62  ;;  %v2062_v29 = vsel %vm2056_vm15, %v4037_v37, 0.0  ;;  %2185 = vmatprep.subr.mxu1 %v1744_v55  ;;  %vm5040_vm5 = vcmp.eq.f32.partialorder %v4022_v18, 6.0  ;;  %v2069_v16 = vsel %vm2021_vm10, %v4049_v36, %v2063_v63 }
 0x1e9   : > { %v2076_v56 = vsel %vm5040_vm5, %v4380_v50, %v2070_v10  ;;  %v2061_v51 = vsel %vm2055_vm9, %v4030_v25, 0.0  ;;  %v2030_v11 = vsel %vm2024_vm8, %v4179_v46, 0.0  ;;  %2186 = vmatpush1.msra.mxu1 %v1743_v39  ;;  %vm5041_vm7 = vcmp.eq.f32.partialorder %v4113_v60, 5.0 }
 0x1ea   : > { %v2084_v37 = vsel %vm5041_vm7, %v4172_v13, %v2078_v20  ;;  %vm5042_vm4 = vcmp.eq.f32.partialorder %v5014_v34, 6.0  ;;  %vm5043_vm2 = vcmp.eq.f32.partialorder %v5010_v1, 7.0  ;;  %vm5044_vm14 = vcmp.eq.f32.partialorder %v4097_v57, 5.0  ;;  %vm5051_vm15 = vmmov %vm5041_vm7 }
 0x1eb   : > { %v2075_v12 = vsel %vm5042_vm4, %v4406_v61, %v2069_v16  ;;  %v2068_v7 = vsel %vm5043_vm2, %v4044_v35, %v2062_v29  ;;  %2209 = vmatprep.subr.mxu1 %v2084_v37  ;;  %v2083_v25 = vsel %vm5044_vm14, %v4154_v4, %v2077_v8  ;;  %vm5045_vm3 = vcmp.eq.f32.partialorder %v5010_v1, 6.0  ;;  %vm5053_vm9 = vmmov %vm5044_vm14 }
 0x1ec   : > { %v2074_v46 = vsel %vm5045_vm3, %v4278_v24, %v2068_v7  ;;  %vm5046_vm8 = vcmp.eq.f32.partialorder %v5011_v58, 7.0  ;;  %v2029_v6 = vsel %vm2023_vm0, %v4158_v5, 0.0  ;;  %2210 = vmatpush2.msra.mxu1 %v2083_v25  ;;  %vm5047_vm6 = vcmp.eq.f32.partialorder %v4022_v18, 5.0 }
 0x1ed   : > { %v2067_v39 = vsel %vm5046_vm8, %v4032_v26, %v2061_v51  ;;  %v2082_v35 = vsel %vm5047_vm6, %v4051_v19, %v2076_v56  ;;  %vm5048_vm1 = vcmp.eq.f32.partialorder %v5011_v58, 6.0  ;;  %vm5049_vm13 = vcmp.eq.f32.partialorder %v4113_v60, 6.0 }
 0x1ee   : > { %v2073_v40 = vsel %vm5048_vm1, %v4311_v31, %v2067_v39  ;;  %v2036_v24 = vsel %vm5049_vm13, %v4243_v22, %v2030_v11  ;;  %v2028_v26 = vsel %vm2022_vm12, %v4076_v9, 0.0  ;;  %2211 = vmatprep.subr.mxu1 %v2082_v35  ;;  %vm5050_vm0 = vcmp.eq.f32.partialorder %v5014_v34, 5.0 }
 0x1ef   : > { %v2081_v5 = vsel %vm5050_vm0, %v4040_v33, %v2075_v12  ;;  %v2042_v15 = vsel %vm5051_vm15, %v4336_v41, %v2036_v24  ;;  %v2035_v31 = vsel %vm5039_vm11, %v4170_v38, %v2029_v6  ;;  %v2027_v22 = vsel %vm2021_vm10, %v4046_v30, 0.0  ;;  %vm5055_vm10 = vmmov %vm5047_vm6 }
 0x1f0   : > { %2212 = vmatpush2.msra.mxu1 %v2081_v5  ;;  %vm5052_vm12 = vcmp.eq.f32.partialorder %v5010_v1, 5.0  ;;  %v2041_v3 = vsel %vm5053_vm9, %v4354_v59, %v2035_v31  ;;  %v2034_v41 = vsel %vm5040_vm5, %v4134_v14, %v2028_v26  ;;  %vm5054_vm7 = vcmp.eq.f32.partialorder %v5011_v58, 5.0  ;;  %vm5057_vm14 = vmmov %vm5050_vm0 }
 0x1f1   : > { %v2080_v9 = vsel %vm5052_vm12, %v4034_v21, %v2074_v46  ;;  %v2079_v38 = vsel %vm5054_vm7, %v4028_v48, %v2073_v40  ;;  %v2040_v30 = vsel %vm5055_vm10, %v4380_v50, %v2034_v41  ;;  %v2033_v21 = vsel %vm5042_vm4, %v4049_v36, %v2027_v22 }
 0x1f2   : > { %2213 = vmatprep.subr.mxu1 %v2080_v9  ;;  %vm5056_vm2 = vcmp.eq.f32.partialorder %v4113_v60, 4.0  ;;  %v2039_v14 = vsel %vm5057_vm14, %v4406_v61, %v2033_v21  ;;  %vm5058_vm3 = vcmp.eq.f32.partialorder %v4097_v57, 4.0  ;;  %vm5059_vm8 = vcmp.eq.f32.partialorder %v4022_v18, 4.0  ;;  %v1179_v57 = vpop.permute.xlu0 %1178 }
 0x1f3   : > { %2214 = vmatpush2.msra.mxu1 %v2079_v38  ;;  %v2048_v1 = vsel %vm5056_vm2, %v4172_v13, %v2042_v15  ;;  %v2047_v48 = vsel %vm5058_vm3, %v4154_v4, %v2041_v3  ;;  %v2046_v36 = vsel %vm5059_vm8, %v4051_v19, %v2040_v30  ;;  %vm5060_vm6 = vcmp.eq.f32.partialorder %v5014_v34, 4.0 }
 0x1f4   : > { %2215 = vmatprep.subr.mxu1 %v2048_v1  ;;  %v2045_v60 = vsel %vm5060_vm6, %v4040_v33, %v2039_v14  ;;  %vm5061_vm1 = vcmask 326656   ;;  %v1184_v33 = vpop.permute.xlu1 %1183 }
 0x1f5   : > { %2216 = vmatpush2.msra.mxu1 %v2047_v48 }
 0x1f6   : > { %2217 = vmatprep.subr.mxu1 %v2046_v36  ;;  %v2142_v59 = vpop.permute.xlu0 %2141 }
 0x1f7   : > { %2218 = vmatpush2.msra.mxu1 %v2045_v60 }
 0x1f8   : > { %2220 = vmatmul.mubr.f32.vlgmr.msra.gmra.mxu1 %v4263_v0  ;;  %v2147_v23 = vpop.permute.xlu1 %2146 }
 0x1f9   : > { %2392 = vmatprep.mubr.msk.f32.mxu1 %vm5061_vm1, %v4275_v47 }
 0x1fc   : > { %2226 = vmatmul.mubr.f32.gmra.mxu1 %v4305_v32 }
 0x277   : > { %v1259_v4 = vpop.f32.mrf.mxu1 }
 0x278   : > { %v1260_v13 = vadd.f32 %v1259_v4, %v1179_v57 }
 0x279   : > { %v1261_v58 = vpop.f32.mrf.mxu1 }
 0x27a   : > { %1270 = vst [vmem:[%s4798_s23] sm:$0xff] %v1260_v13  ;;  %v1262_v18 = vadd.f32 %v1261_v58, %v1179_v57 }
 0x27b   : > { %v1265_v19 = vpop.f32.mrf.mxu1 }
 0x27c   : > { %1271 = vst [vmem:[%s4798_s23 + $0x8] sm:$0xff] %v1262_v18  ;;  %v1266_v0 = vadd.f32 %v1265_v19, %v1184_v33 }
 0x27d   : > { %v1267_v47 = vpop.f32.mrf.mxu1 }
 0x27e   : > { %1272 = vst [vmem:[%s4798_s23 + $0x20] sm:$0xff] %v1266_v0  ;;  %v1268_v32 = vadd.f32 %v1267_v47, %v1184_v33 }
 0x280   : > { %1273 = vst [vmem:[%s4798_s23 + $0x28] sm:$0xff] %v1268_v32 }
 0x281   : > { %v2258_v44 = vld [vmem:[%s4798_s23] sm:$0xff] (%p2607_p5) }
 0x282   : > { %2259 = vst [vmem:[%s2245_s30] sm:$0xff] (%p2607_p5), %v2258_v44 }
 0x283   : > { %v2260_v53 = vld [vmem:[%s4798_s23 + $0x8] sm:$0xff] (%p2607_p5) }
 0x284   : > { %2261 = vst [vmem:[%s2245_s30 + $0x8] sm:$0xff] (%p2607_p5), %v2260_v53 }
 0x285   : > { %v2266_v17 = vld [vmem:[%s4798_s23 + $0x20] sm:$0xff] (%p2607_p5) }
 0x286   : > { %2267 = vst [vmem:[%s2245_s30 + $0x80] sm:$0xff] (%p2607_p5), %v2266_v17 }
 0x287   : > { %v2268_v55 = vld [vmem:[%s4798_s23 + $0x28] sm:$0xff] (%p2607_p5) }
 0x288   : > { %2269 = vst [vmem:[%s2245_s30 + $0x88] sm:$0xff] (%p2607_p5), %v2268_v55 }
 0x2b8   : > { %v2221_v50 = vpop.f32.mrf.mxu1 }
 0x2b9   : > { %v2222_v34 = vadd.f32 %v2221_v50, %v2142_v59 }
 0x2ba   : > { %v2223_v61 = vpop.f32.mrf.mxu1 }
 0x2bb   : > { %2232 = vst [vmem:[%s4798_s23 + $0x10] sm:$0xff] %v2222_v34  ;;  %v2224_v45 = vadd.f32 %v2223_v61, %v2142_v59 }
 0x2bc   : > { %v2227_v54 = vpop.f32.mrf.mxu1 }
 0x2bd   : > { %2233 = vst [vmem:[%s4798_s23 + $0x18] sm:$0xff] %v2224_v45  ;;  %v2228_v27 = vadd.f32 %v2227_v54, %v2147_v23  ;;  %2242 = sbr.rel (!%p2607_p5) target bundleno = 714 (0x2ca), region = 75 }
 0x2be   : > { %v2229_v42 = vpop.f32.mrf.mxu1 }
 0x2bf   : > { %2234 = vst [vmem:[%s4798_s23 + $0x30] sm:$0xff] %v2228_v27  ;;  %v2230_v49 = vadd.f32 %v2229_v42, %v2147_v23 }
 0x2c1   : > { %2235 = vst [vmem:[%s4798_s23 + $0x38] sm:$0xff] %v2230_v49 }
 0x2c2   : > { %v2262_v28 = vld [vmem:[%s4798_s23 + $0x10] sm:$0xff] }
 0x2c3   : > { %2263 = vst [vmem:[%s2245_s30 + $0x10] sm:$0xff] %v2262_v28 }
 0x2c4   : > { %v2264_v2 = vld [vmem:[%s4798_s23 + $0x18] sm:$0xff] }
 0x2c5   : > { %2265 = vst [vmem:[%s2245_s30 + $0x18] sm:$0xff] %v2264_v2 }
 0x2c6   : > { %v2270_v43 = vld [vmem:[%s4798_s23 + $0x30] sm:$0xff] }
 0x2c7   : > { %2271 = vst [vmem:[%s2245_s30 + $0x90] sm:$0xff] %v2270_v43 }
 0x2c8   : > { %v2272_v52 = vld [vmem:[%s4798_s23 + $0x38] sm:$0xff] }
 0x2c9   : > { %2273 = vst [vmem:[%s2245_s30 + $0x98] sm:$0xff] %v2272_v52 }
 0x2ca PF: > { %p14_p10 = scmp.ge.s32.totalorder %s2594_s28, 6   ;;  %s5062_s24 = smov %s2529_s25 }
 0x2cb   : > { %s5063_s25 = smov %s2605_s8  ;;  %s5064_s26 = smov %s2594_s28 }
 0x2cc   :  { %16 = sbr.rel (!%p14_p10) target bundleno = 2 (0x2), region = 129 }

</bundles_post_ra>
